<compile_context>
chip_gen: v7x
topology: tpu7x:2x2x1
jax: 0.10.0
libtpu: 0.0.40
codegen_flags: <defaults>
</compile_context>

<pallas_src>
import math
import numpy as np

import jax
import jax.numpy as jnp
from jax import lax
from jax.experimental import pallas as pl
from jax.experimental.pallas import tpu as pltpu  # noqa: F401  (TPU backend)


# --------------------------------------------------------------------------
# Fused decoder kernel: 2-branch multi-layer LSTM + Linear heads + reparam.
# --------------------------------------------------------------------------
def _make_decoder_kernel(T, B, O, num_layers, SP):
    """Build the fused decoder kernel for static (T, B, O, num_layers, SP)."""
    GP = 4 * SP
    n_deep = num_layers - 1
    f32 = jnp.float32
    bf16 = jnp.bfloat16

    def kernel(*refs):
        x_ref, eps_ref, w0_in_ref, b0_ref, w0_rec_ref = refs[:5]
        rest = refs[5:]
        deep_refs = rest[:3 * n_deep]                  # (w_in, b, w_rec) per layer
        wh_ref, bh_ref, mu_ref, lv_ref, z_ref = rest[3 * n_deep:]

        def run_layer(gin, w_rec_ref):
            """gin: (T*B, GP) f32 = hoisted input projection (+bias) for all t."""
            w_rec = w_rec_ref[...]                     # bf16 (SP, GP)
            h = jnp.zeros((B, SP), f32)                # [h_mean | h_logvar | pad]
            c = jnp.zeros((B, SP), f32)
            hs = []
            # TODO(synk): switch to lax.fori_loop carrying (h, c) + VMEM staging
            # if T grows beyond ~32; at T=8 the static unroll is fine.
            for t in range(T):
                g = gin[t * B:(t + 1) * B, :] + jnp.dot(
                    h.astype(bf16), w_rec, preferred_element_type=f32)
                # 128-aligned gate blocks: [i | f | g | o], each SP lanes wide.
                i = jax.nn.sigmoid(g[:, 0:SP])
                f = jax.nn.sigmoid(g[:, SP:2 * SP])
                gg = jnp.tanh(g[:, 2 * SP:3 * SP])
                o = jax.nn.sigmoid(g[:, 3 * SP:4 * SP])
                c = f * c + i * gg
                h = o * jnp.tanh(c)
                hs.append(h)
            return jnp.concatenate(hs, axis=0)         # (T*B, SP), row = t*B + b

        # Layer 0: hoisted input projection (shared x drives both branches).
        gin = jnp.dot(x_ref[...].astype(bf16), w0_in_ref[...],
                      preferred_element_type=f32) + b0_ref[...]      # (T*B, GP)
        hs = run_layer(gin, w0_rec_ref)

        # Deeper layers: one hoisted (T*B, SP) @ (SP, GP) matmul each.
        for l in range(n_deep):
            w_in_ref, b_ref, w_rec_ref = deep_refs[3 * l:3 * l + 3]
            gin = jnp.dot(hs.astype(bf16), w_in_ref[...],
                          preferred_element_type=f32) + b_ref[...]
            hs = run_layer(gin, w_rec_ref)

        # Both Linear heads (mu | logvar) in one matmul + reparametrize, once.
        heads = jnp.dot(hs.astype(bf16), wh_ref[...],
                        preferred_element_type=f32) + bh_ref[...]    # (T*B, 2O)
        mu = heads[:, 0:O]
        lv = heads[:, O:2 * O]
        z = eps_ref[...] * jnp.exp(0.5 * lv) + mu

        # Three whole-block stores (no per-step masked stores).
        mu_ref[...] = mu
        lv_ref[...] = lv
        z_ref[...] = z

    return kernel


@jax.jit
def decoder_forward(x_btd, packed, eps_bto):
    """x_btd: (B, T, D) f32 (batch_first, like PyTorch); returns mu, logvar, z."""
    B, T, D = x_btd.shape
    SP = packed["w0_rec"].shape[0]
    O = packed["wh"].shape[1] // 2
    num_layers = 1 + len(packed["deep"])

    # Wrapper-side layout plumbing: row index = t*B + b (per-step row blocks
    # are sublane-contiguous inside the kernel).
    x_flat = jnp.swapaxes(x_btd, 0, 1).reshape(T * B, D)
    eps_flat = jnp.swapaxes(eps_bto, 0, 1).reshape(T * B, O)

    deep_flat = []
    for w_in, b, w_rec in packed["deep"]:
        deep_flat += [w_in, b, w_rec]

    out_sds = jax.ShapeDtypeStruct((T * B, O), jnp.float32)
    kernel = _make_decoder_kernel(T, B, O, num_layers, SP)
    # Grid-less single invocation: every operand is a whole-array VMEM block
    # (total footprint is a few hundred KiB; no pipelining needed).
    mu_f, lv_f, z_f = pl.pallas_call(
        kernel,
        out_shape=(out_sds, out_sds, out_sds),
    )(x_flat, eps_flat, packed["w0_in"], packed["b0"], packed["w0_rec"],
      *deep_flat, packed["wh"], packed["bh"])

    def unflat(a):
        return jnp.swapaxes(a.reshape(T, B, O), 0, 1)

    return unflat(mu_f), unflat(lv_f), unflat(z_f)


# --------------------------------------------------------------------------
# Parameter construction (PyTorch-style U(-1/sqrt(H), 1/sqrt(H))) and one-time
# packing into the block-structured, gate-padded layout used by the kernel.
# --------------------------------------------------------------------------
def init_decoder_params(key, input_dim, hidden_dim, output_dim, num_layers):
    k = 1.0 / math.sqrt(hidden_dim)

    def u(key, shape):
        return jax.random.uniform(key, shape, jnp.float32, minval=-k, maxval=k)

    params = {}
    for branch in ("mean", "logvar"):
        layers = []
        for l in range(num_layers):
            d_in = input_dim if l == 0 else hidden_dim
            key, k1, k2, k3, k4 = jax.random.split(key, 5)
            layers.append({
                "wih": u(k1, (4 * hidden_dim, d_in)),
                "whh": u(k2, (4 * hidden_dim, hidden_dim)),
                "bih": u(k3, (4 * hidden_dim,)),
                "bhh": u(k4, (4 * hidden_dim,)),
            })
        key, k5, k6 = jax.random.split(key, 3)
        params[branch] = {
            "lstm": layers,
            "w_out": u(k5, (output_dim, hidden_dim)),
            "b_out": u(k6, (output_dim,)),
        }
    return params


def pack_decoder_params(params):
    """One-time packing: transpose, bias combine, branch stacking, gate padding.

    Layout: state = [h_mean (H) | h_logvar (H) | zero pad] -> SP lanes,
            gates = [i | f | g | o] blocks, each SP lanes (128-aligned),
            within a gate block: [mean (H) | logvar (H) | zero pad].
    Zero off-diagonal / padding blocks keep the two branches exactly isolated
    (0 is exact in bf16).
    """
    lm = params["mean"]["lstm"]
    lvp = params["logvar"]["lstm"]
    num_layers = len(lm)
    H = lm[0]["whh"].shape[1]
    D = lm[0]["wih"].shape[1]
    O = params["mean"]["w_out"].shape[0]
    SP = ((2 * H + 127) // 128) * 128
    GP = 4 * SP

    def gate_cols(g):
        return slice(g * SP, g * SP + H), slice(g * SP + H, g * SP + 2 * H)

    # Layer 0 input projection (x is shared by both branches).
    w0_in = jnp.zeros((D, GP), jnp.float32)
    b0 = jnp.zeros((1, GP), jnp.float32)
    for g in range(4):
        cm, cv = gate_cols(g)
        rows = slice(g * H, (g + 1) * H)
        w0_in = w0_in.at[:, cm].set(lm[0]["wih"][rows, :].T)
        w0_in = w0_in.at[:, cv].set(lvp[0]["wih"][rows, :].T)
        b0 = b0.at[0, cm].set(lm[0]["bih"][rows] + lm[0]["bhh"][rows])
        b0 = b0.at[0, cv].set(lvp[0]["bih"][rows] + lvp[0]["bhh"][rows])

    def pack_rec(l):
        w = jnp.zeros((SP, GP), jnp.float32)
        for g in range(4):
            cm, cv = gate_cols(g)
            rows = slice(g * H, (g + 1) * H)
            w = w.at[0:H, cm].set(lm[l]["whh"][rows, :].T)
            w = w.at[H:2 * H, cv].set(lvp[l]["whh"][rows, :].T)
        return w.astype(jnp.bfloat16)

    deep = []
    for l in range(1, num_layers):
        w_in = jnp.zeros((SP, GP), jnp.float32)
        b = jnp.zeros((1, GP), jnp.float32)
        for g in range(4):
            cm, cv = gate_cols(g)
            rows = slice(g * H, (g + 1) * H)
            w_in = w_in.at[0:H, cm].set(lm[l]["wih"][rows, :].T)
            w_in = w_in.at[H:2 * H, cv].set(lvp[l]["wih"][rows, :].T)
            b = b.at[0, cm].set(lm[l]["bih"][rows] + lm[l]["bhh"][rows])
            b = b.at[0, cv].set(lvp[l]["bih"][rows] + lvp[l]["bhh"][rows])
        deep.append((w_in.astype(jnp.bfloat16), b, pack_rec(l)))

    # Heads: input [h_mean | h_logvar | pad] -> [mu | logvar], block-diagonal.
    wh = jnp.zeros((SP, 2 * O), jnp.float32)
    wh = wh.at[0:H, 0:O].set(params["mean"]["w_out"].T)
    wh = wh.at[H:2 * H, O:2 * O].set(params["logvar"]["w_out"].T)
    bh = jnp.concatenate([params["mean"]["b_out"],
                          params["logvar"]["b_out"]])[None, :]

    return {"w0_in": w0_in.astype(jnp.bfloat16), "b0": b0,
            "w0_rec": pack_rec(0), "deep": tuple(deep),
            "wh": wh.astype(jnp.bfloat16), "bh": bh}


# --------------------------------------------------------------------------
# Pure-JAX reference (independent formulation, for correctness check)
# --------------------------------------------------------------------------
def _lstm_ref(x_btd, layer):
    B, T, _ = x_btd.shape
    H = layer["whh"].shape[1]

    def step(carry, xt):
        h, c = carry
        gates = xt @ layer["wih"].T + h @ layer["whh"].T + layer["bih"] + layer["bhh"]
        i, f, g, o = jnp.split(gates, 4, axis=-1)
        i, f, o = jax.nn.sigmoid(i), jax.nn.sigmoid(f), jax.nn.sigmoid(o)
        g = jnp.tanh(g)
        c = f * c + i * g
        h = o * jnp.tanh(c)
        return (h, c), h

    h0 = jnp.zeros((B, H), jnp.float32)
    c0 = jnp.zeros((B, H), jnp.float32)
    (_, _), hs = lax.scan(step, (h0, c0), jnp.swapaxes(x_btd, 0, 1))
    return jnp.swapaxes(hs, 0, 1)


def decoder_ref(x_btd, params, eps_bto):
    def run_branch(branch):
        h = x_btd
        for layer in params[branch]["lstm"]:
            h = _lstm_ref(h, layer)
        return h @ params[branch]["w_out"].T + params[branch]["b_out"]

    mu = run_branch("mean")
    lv = run_branch("logvar")
    z = eps_bto * jnp.exp(0.5 * lv) + mu
    return mu, lv, z


# --------------------------------------------------------------------------
if __name__ == "__main__":
    class Args:
        decoder_layer = 2

    B, T = 2, 8
    input_dim, hidden_dim, output_dim = 16, 32, 16

    root = jax.random.PRNGKey(0)
    kx, kp, ke = jax.random.split(root, 3)

    x = jax.random.normal(kx, (B, T, input_dim), dtype=jnp.float32)
    params = init_decoder_params(kp, input_dim, hidden_dim, output_dim,
                                 Args.decoder_layer)
    # torch.FloatTensor(std.size()).normal_() -> deterministic seeded N(0,1)
    # drawn on the host side and passed in (no in-kernel torch RNG equivalent).
    eps = jax.random.normal(ke, (B, T, output_dim), dtype=jnp.float32)

    packed = pack_decoder_params(params)      # one-time weight packing

    mu, logvar, z = decoder_forward(x, packed, eps)
    jax.block_until_ready((mu, logvar, z))

    mu_r, lv_r, z_r = decoder_ref(x, params, eps)
    # Matmul operands are bf16 (f32 accumulation); the tolerance covers bf16
    # operand rounding carried through the T=8, 2-layer recurrence.
    np.testing.assert_allclose(np.asarray(mu), np.asarray(mu_r), atol=2e-2, rtol=2e-2)
    np.testing.assert_allclose(np.asarray(logvar), np.asarray(lv_r), atol=2e-2, rtol=2e-2)
    np.testing.assert_allclose(np.asarray(z), np.asarray(z_r), atol=2e-2, rtol=2e-2)

    print("KERNEL_OK")
</pallas_src>

<mosaic_0001>
module attributes {stable_mosaic.version = 11 : i64} {
  func.func @kernel(%arg0: memref<16x16xf32, #tpu.memory_space<vmem>>, %arg1: memref<16x16xf32, #tpu.memory_space<vmem>>, %arg2: memref<16x512xbf16, #tpu.memory_space<vmem>>, %arg3: memref<1x512xf32, #tpu.memory_space<vmem>>, %arg4: memref<128x512xbf16, #tpu.memory_space<vmem>>, %arg5: memref<128x512xbf16, #tpu.memory_space<vmem>>, %arg6: memref<1x512xf32, #tpu.memory_space<vmem>>, %arg7: memref<128x512xbf16, #tpu.memory_space<vmem>>, %arg8: memref<128x32xbf16, #tpu.memory_space<vmem>>, %arg9: memref<1x32xf32, #tpu.memory_space<vmem>>, %arg10: memref<16x16xf32, #tpu.memory_space<vmem>>, %arg11: memref<16x16xf32, #tpu.memory_space<vmem>>, %arg12: memref<16x16xf32, #tpu.memory_space<vmem>>) attributes {dimension_semantics = [], scalar_prefetch = 0 : i64, scratch_operands = 0 : i64, tpu.core_type = #tpu.core_type<tc>} {
    %c0 = arith.constant 0 : index
    %c0_0 = arith.constant 0 : index
    %0 = vector.load %arg0[%c0, %c0_0] : memref<16x16xf32, #tpu.memory_space<vmem>>, vector<16x16xf32>
    %1 = arith.truncf %0 : vector<16x16xf32> to vector<16x16xbf16>
    %c0_1 = arith.constant 0 : index
    %c0_2 = arith.constant 0 : index
    %2 = vector.load %arg2[%c0_1, %c0_2] : memref<16x512xbf16, #tpu.memory_space<vmem>>, vector<16x512xbf16>
    %cst = arith.constant dense<0.000000e+00> : vector<16x512xf32>
    %3 = tpu.matmul %1, %2, %cst {dimension_numbers = #tpu.dot_dimension_numbers<[1], [0], [0], [1], [0, 0, 1, 1], [], []>} : vector<16x16xbf16>, vector<16x512xbf16>, vector<16x512xf32> -> vector<16x512xf32>
    %c0_3 = arith.constant 0 : index
    %c0_4 = arith.constant 0 : index
    %4 = vector.load %arg3[%c0_3, %c0_4] : memref<1x512xf32, #tpu.memory_space<vmem>>, vector<1x512xf32>
    %5 = vector.broadcast %4 : vector<1x512xf32> to vector<16x512xf32>
    %6 = arith.addf %3, %5 : vector<16x512xf32>
    %c0_5 = arith.constant 0 : index
    %c0_6 = arith.constant 0 : index
    %7 = vector.load %arg4[%c0_5, %c0_6] : memref<128x512xbf16, #tpu.memory_space<vmem>>, vector<128x512xbf16>
    %cst_7 = arith.constant 0.000000e+00 : f32
    %8 = vector.broadcast %cst_7 : f32 to vector<2x128xf32>
    %cst_8 = arith.constant 0.000000e+00 : f32
    %9 = vector.broadcast %cst_8 : f32 to vector<2x128xf32>
    %10 = vector.extract_strided_slice %6 {offsets = [0, 0], sizes = [2, 512], strides = [1, 1]} : vector<16x512xf32> to vector<2x512xf32>
    %11 = arith.truncf %8 : vector<2x128xf32> to vector<2x128xbf16>
    %cst_9 = arith.constant dense<0.000000e+00> : vector<2x512xf32>
    %12 = tpu.matmul %11, %7, %cst_9 {dimension_numbers = #tpu.dot_dimension_numbers<[1], [0], [0], [1], [0, 0, 1, 1], [], []>} : vector<2x128xbf16>, vector<128x512xbf16>, vector<2x512xf32> -> vector<2x512xf32>
    %13 = arith.addf %10, %12 : vector<2x512xf32>
    %14 = vector.extract_strided_slice %13 {offsets = [0, 0], sizes = [2, 128], strides = [1, 1]} : vector<2x512xf32> to vector<2x128xf32>
    %15 = arith.negf %14 : vector<2x128xf32>
    %16 = math.exp %15 : vector<2x128xf32>
    %cst_10 = arith.constant 1.000000e+00 : f32
    %17 = vector.broadcast %cst_10 : f32 to vector<2x128xf32>
    %18 = arith.addf %17, %16 : vector<2x128xf32>
    %19 = arith.divf %17, %18 : vector<2x128xf32>
    %20 = vector.extract_strided_slice %13 {offsets = [0, 128], sizes = [2, 128], strides = [1, 1]} : vector<2x512xf32> to vector<2x128xf32>
    %21 = arith.negf %20 : vector<2x128xf32>
    %22 = math.exp %21 : vector<2x128xf32>
    %cst_11 = arith.constant 1.000000e+00 : f32
    %23 = vector.broadcast %cst_11 : f32 to vector<2x128xf32>
    %24 = arith.addf %23, %22 : vector<2x128xf32>
    %25 = arith.divf %23, %24 : vector<2x128xf32>
    %26 = vector.extract_strided_slice %13 {offsets = [0, 256], sizes = [2, 128], strides = [1, 1]} : vector<2x512xf32> to vector<2x128xf32>
    %27 = math.tanh %26 : vector<2x128xf32>
    %28 = vector.extract_strided_slice %13 {offsets = [0, 384], sizes = [2, 128], strides = [1, 1]} : vector<2x512xf32> to vector<2x128xf32>
    %29 = arith.negf %28 : vector<2x128xf32>
    %30 = math.exp %29 : vector<2x128xf32>
    %cst_12 = arith.constant 1.000000e+00 : f32
    %31 = vector.broadcast %cst_12 : f32 to vector<2x128xf32>
    %32 = arith.addf %31, %30 : vector<2x128xf32>
    %33 = arith.divf %31, %32 : vector<2x128xf32>
    %34 = arith.mulf %25, %9 : vector<2x128xf32>
    %35 = arith.mulf %19, %27 : vector<2x128xf32>
    %36 = arith.addf %34, %35 : vector<2x128xf32>
    %37 = math.tanh %36 : vector<2x128xf32>
    %38 = arith.mulf %33, %37 : vector<2x128xf32>
    %39 = vector.extract_strided_slice %6 {offsets = [2, 0], sizes = [2, 512], strides = [1, 1]} : vector<16x512xf32> to vector<2x512xf32>
    %40 = arith.truncf %38 : vector<2x128xf32> to vector<2x128xbf16>
    %cst_13 = arith.constant dense<0.000000e+00> : vector<2x512xf32>
    %41 = tpu.matmul %40, %7, %cst_13 {dimension_numbers = #tpu.dot_dimension_numbers<[1], [0], [0], [1], [0, 0, 1, 1], [], []>} : vector<2x128xbf16>, vector<128x512xbf16>, vector<2x512xf32> -> vector<2x512xf32>
    %42 = arith.addf %39, %41 : vector<2x512xf32>
    %43 = vector.extract_strided_slice %42 {offsets = [0, 0], sizes = [2, 128], strides = [1, 1]} : vector<2x512xf32> to vector<2x128xf32>
    %44 = arith.negf %43 : vector<2x128xf32>
    %45 = math.exp %44 : vector<2x128xf32>
    %cst_14 = arith.constant 1.000000e+00 : f32
    %46 = vector.broadcast %cst_14 : f32 to vector<2x128xf32>
    %47 = arith.addf %46, %45 : vector<2x128xf32>
    %48 = arith.divf %46, %47 : vector<2x128xf32>
    %49 = vector.extract_strided_slice %42 {offsets = [0, 128], sizes = [2, 128], strides = [1, 1]} : vector<2x512xf32> to vector<2x128xf32>
    %50 = arith.negf %49 : vector<2x128xf32>
    %51 = math.exp %50 : vector<2x128xf32>
    %cst_15 = arith.constant 1.000000e+00 : f32
    %52 = vector.broadcast %cst_15 : f32 to vector<2x128xf32>
    %53 = arith.addf %52, %51 : vector<2x128xf32>
    %54 = arith.divf %52, %53 : vector<2x128xf32>
    %55 = vector.extract_strided_slice %42 {offsets = [0, 256], sizes = [2, 128], strides = [1, 1]} : vector<2x512xf32> to vector<2x128xf32>
    %56 = math.tanh %55 : vector<2x128xf32>
    %57 = vector.extract_strided_slice %42 {offsets = [0, 384], sizes = [2, 128], strides = [1, 1]} : vector<2x512xf32> to vector<2x128xf32>
    %58 = arith.negf %57 : vector<2x128xf32>
    %59 = math.exp %58 : vector<2x128xf32>
    %cst_16 = arith.constant 1.000000e+00 : f32
    %60 = vector.broadcast %cst_16 : f32 to vector<2x128xf32>
    %61 = arith.addf %60, %59 : vector<2x128xf32>
    %62 = arith.divf %60, %61 : vector<2x128xf32>
    %63 = arith.mulf %54, %36 : vector<2x128xf32>
    %64 = arith.mulf %48, %56 : vector<2x128xf32>
    %65 = arith.addf %63, %64 : vector<2x128xf32>
    %66 = math.tanh %65 : vector<2x128xf32>
    %67 = arith.mulf %62, %66 : vector<2x128xf32>
    %68 = vector.extract_strided_slice %6 {offsets = [4, 0], sizes = [2, 512], strides = [1, 1]} : vector<16x512xf32> to vector<2x512xf32>
    %69 = arith.truncf %67 : vector<2x128xf32> to vector<2x128xbf16>
    %cst_17 = arith.constant dense<0.000000e+00> : vector<2x512xf32>
    %70 = tpu.matmul %69, %7, %cst_17 {dimension_numbers = #tpu.dot_dimension_numbers<[1], [0], [0], [1], [0, 0, 1, 1], [], []>} : vector<2x128xbf16>, vector<128x512xbf16>, vector<2x512xf32> -> vector<2x512xf32>
    %71 = arith.addf %68, %70 : vector<2x512xf32>
    %72 = vector.extract_strided_slice %71 {offsets = [0, 0], sizes = [2, 128], strides = [1, 1]} : vector<2x512xf32> to vector<2x128xf32>
    %73 = arith.negf %72 : vector<2x128xf32>
    %74 = math.exp %73 : vector<2x128xf32>
    %cst_18 = arith.constant 1.000000e+00 : f32
    %75 = vector.broadcast %cst_18 : f32 to vector<2x128xf32>
    %76 = arith.addf %75, %74 : vector<2x128xf32>
    %77 = arith.divf %75, %76 : vector<2x128xf32>
    %78 = vector.extract_strided_slice %71 {offsets = [0, 128], sizes = [2, 128], strides = [1, 1]} : vector<2x512xf32> to vector<2x128xf32>
    %79 = arith.negf %78 : vector<2x128xf32>
    %80 = math.exp %79 : vector<2x128xf32>
    %cst_19 = arith.constant 1.000000e+00 : f32
    %81 = vector.broadcast %cst_19 : f32 to vector<2x128xf32>
    %82 = arith.addf %81, %80 : vector<2x128xf32>
    %83 = arith.divf %81, %82 : vector<2x128xf32>
    %84 = vector.extract_strided_slice %71 {offsets = [0, 256], sizes = [2, 128], strides = [1, 1]} : vector<2x512xf32> to vector<2x128xf32>
    %85 = math.tanh %84 : vector<2x128xf32>
    %86 = vector.extract_strided_slice %71 {offsets = [0, 384], sizes = [2, 128], strides = [1, 1]} : vector<2x512xf32> to vector<2x128xf32>
    %87 = arith.negf %86 : vector<2x128xf32>
    %88 = math.exp %87 : vector<2x128xf32>
    %cst_20 = arith.constant 1.000000e+00 : f32
    %89 = vector.broadcast %cst_20 : f32 to vector<2x128xf32>
    %90 = arith.addf %89, %88 : vector<2x128xf32>
    %91 = arith.divf %89, %90 : vector<2x128xf32>
    %92 = arith.mulf %83, %65 : vector<2x128xf32>
    %93 = arith.mulf %77, %85 : vector<2x128xf32>
    %94 = arith.addf %92, %93 : vector<2x128xf32>
    %95 = math.tanh %94 : vector<2x128xf32>
    %96 = arith.mulf %91, %95 : vector<2x128xf32>
    %97 = vector.extract_strided_slice %6 {offsets = [6, 0], sizes = [2, 512], strides = [1, 1]} : vector<16x512xf32> to vector<2x512xf32>
    %98 = arith.truncf %96 : vector<2x128xf32> to vector<2x128xbf16>
    %cst_21 = arith.constant dense<0.000000e+00> : vector<2x512xf32>
    %99 = tpu.matmul %98, %7, %cst_21 {dimension_numbers = #tpu.dot_dimension_numbers<[1], [0], [0], [1], [0, 0, 1, 1], [], []>} : vector<2x128xbf16>, vector<128x512xbf16>, vector<2x512xf32> -> vector<2x512xf32>
    %100 = arith.addf %97, %99 : vector<2x512xf32>
    %101 = vector.extract_strided_slice %100 {offsets = [0, 0], sizes = [2, 128], strides = [1, 1]} : vector<2x512xf32> to vector<2x128xf32>
    %102 = arith.negf %101 : vector<2x128xf32>
    %103 = math.exp %102 : vector<2x128xf32>
    %cst_22 = arith.constant 1.000000e+00 : f32
    %104 = vector.broadcast %cst_22 : f32 to vector<2x128xf32>
    %105 = arith.addf %104, %103 : vector<2x128xf32>
    %106 = arith.divf %104, %105 : vector<2x128xf32>
    %107 = vector.extract_strided_slice %100 {offsets = [0, 128], sizes = [2, 128], strides = [1, 1]} : vector<2x512xf32> to vector<2x128xf32>
    %108 = arith.negf %107 : vector<2x128xf32>
    %109 = math.exp %108 : vector<2x128xf32>
    %cst_23 = arith.constant 1.000000e+00 : f32
    %110 = vector.broadcast %cst_23 : f32 to vector<2x128xf32>
    %111 = arith.addf %110, %109 : vector<2x128xf32>
    %112 = arith.divf %110, %111 : vector<2x128xf32>
    %113 = vector.extract_strided_slice %100 {offsets = [0, 256], sizes = [2, 128], strides = [1, 1]} : vector<2x512xf32> to vector<2x128xf32>
    %114 = math.tanh %113 : vector<2x128xf32>
    %115 = vector.extract_strided_slice %100 {offsets = [0, 384], sizes = [2, 128], strides = [1, 1]} : vector<2x512xf32> to vector<2x128xf32>
    %116 = arith.negf %115 : vector<2x128xf32>
    %117 = math.exp %116 : vector<2x128xf32>
    %cst_24 = arith.constant 1.000000e+00 : f32
    %118 = vector.broadcast %cst_24 : f32 to vector<2x128xf32>
    %119 = arith.addf %118, %117 : vector<2x128xf32>
    %120 = arith.divf %118, %119 : vector<2x128xf32>
    %121 = arith.mulf %112, %94 : vector<2x128xf32>
    %122 = arith.mulf %106, %114 : vector<2x128xf32>
    %123 = arith.addf %121, %122 : vector<2x128xf32>
    %124 = math.tanh %123 : vector<2x128xf32>
    %125 = arith.mulf %120, %124 : vector<2x128xf32>
    %126 = vector.extract_strided_slice %6 {offsets = [8, 0], sizes = [2, 512], strides = [1, 1]} : vector<16x512xf32> to vector<2x512xf32>
    %127 = arith.truncf %125 : vector<2x128xf32> to vector<2x128xbf16>
    %cst_25 = arith.constant dense<0.000000e+00> : vector<2x512xf32>
    %128 = tpu.matmul %127, %7, %cst_25 {dimension_numbers = #tpu.dot_dimension_numbers<[1], [0], [0], [1], [0, 0, 1, 1], [], []>} : vector<2x128xbf16>, vector<128x512xbf16>, vector<2x512xf32> -> vector<2x512xf32>
    %129 = arith.addf %126, %128 : vector<2x512xf32>
    %130 = vector.extract_strided_slice %129 {offsets = [0, 0], sizes = [2, 128], strides = [1, 1]} : vector<2x512xf32> to vector<2x128xf32>
    %131 = arith.negf %130 : vector<2x128xf32>
    %132 = math.exp %131 : vector<2x128xf32>
    %cst_26 = arith.constant 1.000000e+00 : f32
    %133 = vector.broadcast %cst_26 : f32 to vector<2x128xf32>
    %134 = arith.addf %133, %132 : vector<2x128xf32>
    %135 = arith.divf %133, %134 : vector<2x128xf32>
    %136 = vector.extract_strided_slice %129 {offsets = [0, 128], sizes = [2, 128], strides = [1, 1]} : vector<2x512xf32> to vector<2x128xf32>
    %137 = arith.negf %136 : vector<2x128xf32>
    %138 = math.exp %137 : vector<2x128xf32>
    %cst_27 = arith.constant 1.000000e+00 : f32
    %139 = vector.broadcast %cst_27 : f32 to vector<2x128xf32>
    %140 = arith.addf %139, %138 : vector<2x128xf32>
    %141 = arith.divf %139, %140 : vector<2x128xf32>
    %142 = vector.extract_strided_slice %129 {offsets = [0, 256], sizes = [2, 128], strides = [1, 1]} : vector<2x512xf32> to vector<2x128xf32>
    %143 = math.tanh %142 : vector<2x128xf32>
    %144 = vector.extract_strided_slice %129 {offsets = [0, 384], sizes = [2, 128], strides = [1, 1]} : vector<2x512xf32> to vector<2x128xf32>
    %145 = arith.negf %144 : vector<2x128xf32>
    %146 = math.exp %145 : vector<2x128xf32>
    %cst_28 = arith.constant 1.000000e+00 : f32
    %147 = vector.broadcast %cst_28 : f32 to vector<2x128xf32>
    %148 = arith.addf %147, %146 : vector<2x128xf32>
    %149 = arith.divf %147, %148 : vector<2x128xf32>
    %150 = arith.mulf %141, %123 : vector<2x128xf32>
    %151 = arith.mulf %135, %143 : vector<2x128xf32>
    %152 = arith.addf %150, %151 : vector<2x128xf32>
    %153 = math.tanh %152 : vector<2x128xf32>
    %154 = arith.mulf %149, %153 : vector<2x128xf32>
    %155 = vector.extract_strided_slice %6 {offsets = [10, 0], sizes = [2, 512], strides = [1, 1]} : vector<16x512xf32> to vector<2x512xf32>
    %156 = arith.truncf %154 : vector<2x128xf32> to vector<2x128xbf16>
    %cst_29 = arith.constant dense<0.000000e+00> : vector<2x512xf32>
    %157 = tpu.matmul %156, %7, %cst_29 {dimension_numbers = #tpu.dot_dimension_numbers<[1], [0], [0], [1], [0, 0, 1, 1], [], []>} : vector<2x128xbf16>, vector<128x512xbf16>, vector<2x512xf32> -> vector<2x512xf32>
    %158 = arith.addf %155, %157 : vector<2x512xf32>
    %159 = vector.extract_strided_slice %158 {offsets = [0, 0], sizes = [2, 128], strides = [1, 1]} : vector<2x512xf32> to vector<2x128xf32>
    %160 = arith.negf %159 : vector<2x128xf32>
    %161 = math.exp %160 : vector<2x128xf32>
    %cst_30 = arith.constant 1.000000e+00 : f32
    %162 = vector.broadcast %cst_30 : f32 to vector<2x128xf32>
    %163 = arith.addf %162, %161 : vector<2x128xf32>
    %164 = arith.divf %162, %163 : vector<2x128xf32>
    %165 = vector.extract_strided_slice %158 {offsets = [0, 128], sizes = [2, 128], strides = [1, 1]} : vector<2x512xf32> to vector<2x128xf32>
    %166 = arith.negf %165 : vector<2x128xf32>
    %167 = math.exp %166 : vector<2x128xf32>
    %cst_31 = arith.constant 1.000000e+00 : f32
    %168 = vector.broadcast %cst_31 : f32 to vector<2x128xf32>
    %169 = arith.addf %168, %167 : vector<2x128xf32>
    %170 = arith.divf %168, %169 : vector<2x128xf32>
    %171 = vector.extract_strided_slice %158 {offsets = [0, 256], sizes = [2, 128], strides = [1, 1]} : vector<2x512xf32> to vector<2x128xf32>
    %172 = math.tanh %171 : vector<2x128xf32>
    %173 = vector.extract_strided_slice %158 {offsets = [0, 384], sizes = [2, 128], strides = [1, 1]} : vector<2x512xf32> to vector<2x128xf32>
    %174 = arith.negf %173 : vector<2x128xf32>
    %175 = math.exp %174 : vector<2x128xf32>
    %cst_32 = arith.constant 1.000000e+00 : f32
    %176 = vector.broadcast %cst_32 : f32 to vector<2x128xf32>
    %177 = arith.addf %176, %175 : vector<2x128xf32>
    %178 = arith.divf %176, %177 : vector<2x128xf32>
    %179 = arith.mulf %170, %152 : vector<2x128xf32>
    %180 = arith.mulf %164, %172 : vector<2x128xf32>
    %181 = arith.addf %179, %180 : vector<2x128xf32>
    %182 = math.tanh %181 : vector<2x128xf32>
    %183 = arith.mulf %178, %182 : vector<2x128xf32>
    %184 = vector.extract_strided_slice %6 {offsets = [12, 0], sizes = [2, 512], strides = [1, 1]} : vector<16x512xf32> to vector<2x512xf32>
    %185 = arith.truncf %183 : vector<2x128xf32> to vector<2x128xbf16>
    %cst_33 = arith.constant dense<0.000000e+00> : vector<2x512xf32>
    %186 = tpu.matmul %185, %7, %cst_33 {dimension_numbers = #tpu.dot_dimension_numbers<[1], [0], [0], [1], [0, 0, 1, 1], [], []>} : vector<2x128xbf16>, vector<128x512xbf16>, vector<2x512xf32> -> vector<2x512xf32>
    %187 = arith.addf %184, %186 : vector<2x512xf32>
    %188 = vector.extract_strided_slice %187 {offsets = [0, 0], sizes = [2, 128], strides = [1, 1]} : vector<2x512xf32> to vector<2x128xf32>
    %189 = arith.negf %188 : vector<2x128xf32>
    %190 = math.exp %189 : vector<2x128xf32>
    %cst_34 = arith.constant 1.000000e+00 : f32
    %191 = vector.broadcast %cst_34 : f32 to vector<2x128xf32>
    %192 = arith.addf %191, %190 : vector<2x128xf32>
    %193 = arith.divf %191, %192 : vector<2x128xf32>
    %194 = vector.extract_strided_slice %187 {offsets = [0, 128], sizes = [2, 128], strides = [1, 1]} : vector<2x512xf32> to vector<2x128xf32>
    %195 = arith.negf %194 : vector<2x128xf32>
    %196 = math.exp %195 : vector<2x128xf32>
    %cst_35 = arith.constant 1.000000e+00 : f32
    %197 = vector.broadcast %cst_35 : f32 to vector<2x128xf32>
    %198 = arith.addf %197, %196 : vector<2x128xf32>
    %199 = arith.divf %197, %198 : vector<2x128xf32>
    %200 = vector.extract_strided_slice %187 {offsets = [0, 256], sizes = [2, 128], strides = [1, 1]} : vector<2x512xf32> to vector<2x128xf32>
    %201 = math.tanh %200 : vector<2x128xf32>
    %202 = vector.extract_strided_slice %187 {offsets = [0, 384], sizes = [2, 128], strides = [1, 1]} : vector<2x512xf32> to vector<2x128xf32>
    %203 = arith.negf %202 : vector<2x128xf32>
    %204 = math.exp %203 : vector<2x128xf32>
    %cst_36 = arith.constant 1.000000e+00 : f32
    %205 = vector.broadcast %cst_36 : f32 to vector<2x128xf32>
    %206 = arith.addf %205, %204 : vector<2x128xf32>
    %207 = arith.divf %205, %206 : vector<2x128xf32>
    %208 = arith.mulf %199, %181 : vector<2x128xf32>
    %209 = arith.mulf %193, %201 : vector<2x128xf32>
    %210 = arith.addf %208, %209 : vector<2x128xf32>
    %211 = math.tanh %210 : vector<2x128xf32>
    %212 = arith.mulf %207, %211 : vector<2x128xf32>
    %213 = vector.extract_strided_slice %6 {offsets = [14, 0], sizes = [2, 512], strides = [1, 1]} : vector<16x512xf32> to vector<2x512xf32>
    %214 = arith.truncf %212 : vector<2x128xf32> to vector<2x128xbf16>
    %cst_37 = arith.constant dense<0.000000e+00> : vector<2x512xf32>
    %215 = tpu.matmul %214, %7, %cst_37 {dimension_numbers = #tpu.dot_dimension_numbers<[1], [0], [0], [1], [0, 0, 1, 1], [], []>} : vector<2x128xbf16>, vector<128x512xbf16>, vector<2x512xf32> -> vector<2x512xf32>
    %216 = arith.addf %213, %215 : vector<2x512xf32>
    %217 = vector.extract_strided_slice %216 {offsets = [0, 0], sizes = [2, 128], strides = [1, 1]} : vector<2x512xf32> to vector<2x128xf32>
    %218 = arith.negf %217 : vector<2x128xf32>
    %219 = math.exp %218 : vector<2x128xf32>
    %cst_38 = arith.constant 1.000000e+00 : f32
    %220 = vector.broadcast %cst_38 : f32 to vector<2x128xf32>
    %221 = arith.addf %220, %219 : vector<2x128xf32>
    %222 = arith.divf %220, %221 : vector<2x128xf32>
    %223 = vector.extract_strided_slice %216 {offsets = [0, 128], sizes = [2, 128], strides = [1, 1]} : vector<2x512xf32> to vector<2x128xf32>
    %224 = arith.negf %223 : vector<2x128xf32>
    %225 = math.exp %224 : vector<2x128xf32>
    %cst_39 = arith.constant 1.000000e+00 : f32
    %226 = vector.broadcast %cst_39 : f32 to vector<2x128xf32>
    %227 = arith.addf %226, %225 : vector<2x128xf32>
    %228 = arith.divf %226, %227 : vector<2x128xf32>
    %229 = vector.extract_strided_slice %216 {offsets = [0, 256], sizes = [2, 128], strides = [1, 1]} : vector<2x512xf32> to vector<2x128xf32>
    %230 = math.tanh %229 : vector<2x128xf32>
    %231 = vector.extract_strided_slice %216 {offsets = [0, 384], sizes = [2, 128], strides = [1, 1]} : vector<2x512xf32> to vector<2x128xf32>
    %232 = arith.negf %231 : vector<2x128xf32>
    %233 = math.exp %232 : vector<2x128xf32>
    %cst_40 = arith.constant 1.000000e+00 : f32
    %234 = vector.broadcast %cst_40 : f32 to vector<2x128xf32>
    %235 = arith.addf %234, %233 : vector<2x128xf32>
    %236 = arith.divf %234, %235 : vector<2x128xf32>
    %237 = arith.mulf %228, %210 : vector<2x128xf32>
    %238 = arith.mulf %222, %230 : vector<2x128xf32>
    %239 = arith.addf %237, %238 : vector<2x128xf32>
    %240 = math.tanh %239 : vector<2x128xf32>
    %241 = arith.mulf %236, %240 : vector<2x128xf32>
    %242 = tpu.concatenate %38, %67, %96, %125, %154, %183, %212, %241 in 0 : vector<2x128xf32>, vector<2x128xf32>, vector<2x128xf32>, vector<2x128xf32>, vector<2x128xf32>, vector<2x128xf32>, vector<2x128xf32>, vector<2x128xf32> -> vector<16x128xf32>
    %243 = arith.truncf %242 : vector<16x128xf32> to vector<16x128xbf16>
    %c0_41 = arith.constant 0 : index
    %c0_42 = arith.constant 0 : index
    %244 = vector.load %arg5[%c0_41, %c0_42] : memref<128x512xbf16, #tpu.memory_space<vmem>>, vector<128x512xbf16>
    %cst_43 = arith.constant dense<0.000000e+00> : vector<16x512xf32>
    %245 = tpu.matmul %243, %244, %cst_43 {dimension_numbers = #tpu.dot_dimension_numbers<[1], [0], [0], [1], [0, 0, 1, 1], [], []>} : vector<16x128xbf16>, vector<128x512xbf16>, vector<16x512xf32> -> vector<16x512xf32>
    %c0_44 = arith.constant 0 : index
    %c0_45 = arith.constant 0 : index
    %246 = vector.load %arg6[%c0_44, %c0_45] : memref<1x512xf32, #tpu.memory_space<vmem>>, vector<1x512xf32>
    %247 = vector.broadcast %246 : vector<1x512xf32> to vector<16x512xf32>
    %248 = arith.addf %245, %247 : vector<16x512xf32>
    %c0_46 = arith.constant 0 : index
    %c0_47 = arith.constant 0 : index
    %249 = vector.load %arg7[%c0_46, %c0_47] : memref<128x512xbf16, #tpu.memory_space<vmem>>, vector<128x512xbf16>
    %cst_48 = arith.constant 0.000000e+00 : f32
    %250 = vector.broadcast %cst_48 : f32 to vector<2x128xf32>
    %cst_49 = arith.constant 0.000000e+00 : f32
    %251 = vector.broadcast %cst_49 : f32 to vector<2x128xf32>
    %252 = vector.extract_strided_slice %248 {offsets = [0, 0], sizes = [2, 512], strides = [1, 1]} : vector<16x512xf32> to vector<2x512xf32>
    %253 = arith.truncf %250 : vector<2x128xf32> to vector<2x128xbf16>
    %cst_50 = arith.constant dense<0.000000e+00> : vector<2x512xf32>
    %254 = tpu.matmul %253, %249, %cst_50 {dimension_numbers = #tpu.dot_dimension_numbers<[1], [0], [0], [1], [0, 0, 1, 1], [], []>} : vector<2x128xbf16>, vector<128x512xbf16>, vector<2x512xf32> -> vector<2x512xf32>
    %255 = arith.addf %252, %254 : vector<2x512xf32>
    %256 = vector.extract_strided_slice %255 {offsets = [0, 0], sizes = [2, 128], strides = [1, 1]} : vector<2x512xf32> to vector<2x128xf32>
    %257 = arith.negf %256 : vector<2x128xf32>
    %258 = math.exp %257 : vector<2x128xf32>
    %cst_51 = arith.constant 1.000000e+00 : f32
    %259 = vector.broadcast %cst_51 : f32 to vector<2x128xf32>
    %260 = arith.addf %259, %258 : vector<2x128xf32>
    %261 = arith.divf %259, %260 : vector<2x128xf32>
    %262 = vector.extract_strided_slice %255 {offsets = [0, 128], sizes = [2, 128], strides = [1, 1]} : vector<2x512xf32> to vector<2x128xf32>
    %263 = arith.negf %262 : vector<2x128xf32>
    %264 = math.exp %263 : vector<2x128xf32>
    %cst_52 = arith.constant 1.000000e+00 : f32
    %265 = vector.broadcast %cst_52 : f32 to vector<2x128xf32>
    %266 = arith.addf %265, %264 : vector<2x128xf32>
    %267 = arith.divf %265, %266 : vector<2x128xf32>
    %268 = vector.extract_strided_slice %255 {offsets = [0, 256], sizes = [2, 128], strides = [1, 1]} : vector<2x512xf32> to vector<2x128xf32>
    %269 = math.tanh %268 : vector<2x128xf32>
    %270 = vector.extract_strided_slice %255 {offsets = [0, 384], sizes = [2, 128], strides = [1, 1]} : vector<2x512xf32> to vector<2x128xf32>
    %271 = arith.negf %270 : vector<2x128xf32>
    %272 = math.exp %271 : vector<2x128xf32>
    %cst_53 = arith.constant 1.000000e+00 : f32
    %273 = vector.broadcast %cst_53 : f32 to vector<2x128xf32>
    %274 = arith.addf %273, %272 : vector<2x128xf32>
    %275 = arith.divf %273, %274 : vector<2x128xf32>
    %276 = arith.mulf %267, %251 : vector<2x128xf32>
    %277 = arith.mulf %261, %269 : vector<2x128xf32>
    %278 = arith.addf %276, %277 : vector<2x128xf32>
    %279 = math.tanh %278 : vector<2x128xf32>
    %280 = arith.mulf %275, %279 : vector<2x128xf32>
    %281 = vector.extract_strided_slice %248 {offsets = [2, 0], sizes = [2, 512], strides = [1, 1]} : vector<16x512xf32> to vector<2x512xf32>
    %282 = arith.truncf %280 : vector<2x128xf32> to vector<2x128xbf16>
    %cst_54 = arith.constant dense<0.000000e+00> : vector<2x512xf32>
    %283 = tpu.matmul %282, %249, %cst_54 {dimension_numbers = #tpu.dot_dimension_numbers<[1], [0], [0], [1], [0, 0, 1, 1], [], []>} : vector<2x128xbf16>, vector<128x512xbf16>, vector<2x512xf32> -> vector<2x512xf32>
    %284 = arith.addf %281, %283 : vector<2x512xf32>
    %285 = vector.extract_strided_slice %284 {offsets = [0, 0], sizes = [2, 128], strides = [1, 1]} : vector<2x512xf32> to vector<2x128xf32>
    %286 = arith.negf %285 : vector<2x128xf32>
    %287 = math.exp %286 : vector<2x128xf32>
    %cst_55 = arith.constant 1.000000e+00 : f32
    %288 = vector.broadcast %cst_55 : f32 to vector<2x128xf32>
    %289 = arith.addf %288, %287 : vector<2x128xf32>
    %290 = arith.divf %288, %289 : vector<2x128xf32>
    %291 = vector.extract_strided_slice %284 {offsets = [0, 128], sizes = [2, 128], strides = [1, 1]} : vector<2x512xf32> to vector<2x128xf32>
    %292 = arith.negf %291 : vector<2x128xf32>
    %293 = math.exp %292 : vector<2x128xf32>
    %cst_56 = arith.constant 1.000000e+00 : f32
    %294 = vector.broadcast %cst_56 : f32 to vector<2x128xf32>
    %295 = arith.addf %294, %293 : vector<2x128xf32>
    %296 = arith.divf %294, %295 : vector<2x128xf32>
    %297 = vector.extract_strided_slice %284 {offsets = [0, 256], sizes = [2, 128], strides = [1, 1]} : vector<2x512xf32> to vector<2x128xf32>
    %298 = math.tanh %297 : vector<2x128xf32>
    %299 = vector.extract_strided_slice %284 {offsets = [0, 384], sizes = [2, 128], strides = [1, 1]} : vector<2x512xf32> to vector<2x128xf32>
    %300 = arith.negf %299 : vector<2x128xf32>
    %301 = math.exp %300 : vector<2x128xf32>
    %cst_57 = arith.constant 1.000000e+00 : f32
    %302 = vector.broadcast %cst_57 : f32 to vector<2x128xf32>
    %303 = arith.addf %302, %301 : vector<2x128xf32>
    %304 = arith.divf %302, %303 : vector<2x128xf32>
    %305 = arith.mulf %296, %278 : vector<2x128xf32>
    %306 = arith.mulf %290, %298 : vector<2x128xf32>
    %307 = arith.addf %305, %306 : vector<2x128xf32>
    %308 = math.tanh %307 : vector<2x128xf32>
    %309 = arith.mulf %304, %308 : vector<2x128xf32>
    %310 = vector.extract_strided_slice %248 {offsets = [4, 0], sizes = [2, 512], strides = [1, 1]} : vector<16x512xf32> to vector<2x512xf32>
    %311 = arith.truncf %309 : vector<2x128xf32> to vector<2x128xbf16>
    %cst_58 = arith.constant dense<0.000000e+00> : vector<2x512xf32>
    %312 = tpu.matmul %311, %249, %cst_58 {dimension_numbers = #tpu.dot_dimension_numbers<[1], [0], [0], [1], [0, 0, 1, 1], [], []>} : vector<2x128xbf16>, vector<128x512xbf16>, vector<2x512xf32> -> vector<2x512xf32>
    %313 = arith.addf %310, %312 : vector<2x512xf32>
    %314 = vector.extract_strided_slice %313 {offsets = [0, 0], sizes = [2, 128], strides = [1, 1]} : vector<2x512xf32> to vector<2x128xf32>
    %315 = arith.negf %314 : vector<2x128xf32>
    %316 = math.exp %315 : vector<2x128xf32>
    %cst_59 = arith.constant 1.000000e+00 : f32
    %317 = vector.broadcast %cst_59 : f32 to vector<2x128xf32>
    %318 = arith.addf %317, %316 : vector<2x128xf32>
    %319 = arith.divf %317, %318 : vector<2x128xf32>
    %320 = vector.extract_strided_slice %313 {offsets = [0, 128], sizes = [2, 128], strides = [1, 1]} : vector<2x512xf32> to vector<2x128xf32>
    %321 = arith.negf %320 : vector<2x128xf32>
    %322 = math.exp %321 : vector<2x128xf32>
    %cst_60 = arith.constant 1.000000e+00 : f32
    %323 = vector.broadcast %cst_60 : f32 to vector<2x128xf32>
    %324 = arith.addf %323, %322 : vector<2x128xf32>
    %325 = arith.divf %323, %324 : vector<2x128xf32>
    %326 = vector.extract_strided_slice %313 {offsets = [0, 256], sizes = [2, 128], strides = [1, 1]} : vector<2x512xf32> to vector<2x128xf32>
    %327 = math.tanh %326 : vector<2x128xf32>
    %328 = vector.extract_strided_slice %313 {offsets = [0, 384], sizes = [2, 128], strides = [1, 1]} : vector<2x512xf32> to vector<2x128xf32>
    %329 = arith.negf %328 : vector<2x128xf32>
    %330 = math.exp %329 : vector<2x128xf32>
    %cst_61 = arith.constant 1.000000e+00 : f32
    %331 = vector.broadcast %cst_61 : f32 to vector<2x128xf32>
    %332 = arith.addf %331, %330 : vector<2x128xf32>
    %333 = arith.divf %331, %332 : vector<2x128xf32>
    %334 = arith.mulf %325, %307 : vector<2x128xf32>
    %335 = arith.mulf %319, %327 : vector<2x128xf32>
    %336 = arith.addf %334, %335 : vector<2x128xf32>
    %337 = math.tanh %336 : vector<2x128xf32>
    %338 = arith.mulf %333, %337 : vector<2x128xf32>
    %339 = vector.extract_strided_slice %248 {offsets = [6, 0], sizes = [2, 512], strides = [1, 1]} : vector<16x512xf32> to vector<2x512xf32>
    %340 = arith.truncf %338 : vector<2x128xf32> to vector<2x128xbf16>
    %cst_62 = arith.constant dense<0.000000e+00> : vector<2x512xf32>
    %341 = tpu.matmul %340, %249, %cst_62 {dimension_numbers = #tpu.dot_dimension_numbers<[1], [0], [0], [1], [0, 0, 1, 1], [], []>} : vector<2x128xbf16>, vector<128x512xbf16>, vector<2x512xf32> -> vector<2x512xf32>
    %342 = arith.addf %339, %341 : vector<2x512xf32>
    %343 = vector.extract_strided_slice %342 {offsets = [0, 0], sizes = [2, 128], strides = [1, 1]} : vector<2x512xf32> to vector<2x128xf32>
    %344 = arith.negf %343 : vector<2x128xf32>
    %345 = math.exp %344 : vector<2x128xf32>
    %cst_63 = arith.constant 1.000000e+00 : f32
    %346 = vector.broadcast %cst_63 : f32 to vector<2x128xf32>
    %347 = arith.addf %346, %345 : vector<2x128xf32>
    %348 = arith.divf %346, %347 : vector<2x128xf32>
    %349 = vector.extract_strided_slice %342 {offsets = [0, 128], sizes = [2, 128], strides = [1, 1]} : vector<2x512xf32> to vector<2x128xf32>
    %350 = arith.negf %349 : vector<2x128xf32>
    %351 = math.exp %350 : vector<2x128xf32>
    %cst_64 = arith.constant 1.000000e+00 : f32
    %352 = vector.broadcast %cst_64 : f32 to vector<2x128xf32>
    %353 = arith.addf %352, %351 : vector<2x128xf32>
    %354 = arith.divf %352, %353 : vector<2x128xf32>
    %355 = vector.extract_strided_slice %342 {offsets = [0, 256], sizes = [2, 128], strides = [1, 1]} : vector<2x512xf32> to vector<2x128xf32>
    %356 = math.tanh %355 : vector<2x128xf32>
    %357 = vector.extract_strided_slice %342 {offsets = [0, 384], sizes = [2, 128], strides = [1, 1]} : vector<2x512xf32> to vector<2x128xf32>
    %358 = arith.negf %357 : vector<2x128xf32>
    %359 = math.exp %358 : vector<2x128xf32>
    %cst_65 = arith.constant 1.000000e+00 : f32
    %360 = vector.broadcast %cst_65 : f32 to vector<2x128xf32>
    %361 = arith.addf %360, %359 : vector<2x128xf32>
    %362 = arith.divf %360, %361 : vector<2x128xf32>
    %363 = arith.mulf %354, %336 : vector<2x128xf32>
    %364 = arith.mulf %348, %356 : vector<2x128xf32>
    %365 = arith.addf %363, %364 : vector<2x128xf32>
    %366 = math.tanh %365 : vector<2x128xf32>
    %367 = arith.mulf %362, %366 : vector<2x128xf32>
    %368 = vector.extract_strided_slice %248 {offsets = [8, 0], sizes = [2, 512], strides = [1, 1]} : vector<16x512xf32> to vector<2x512xf32>
    %369 = arith.truncf %367 : vector<2x128xf32> to vector<2x128xbf16>
    %cst_66 = arith.constant dense<0.000000e+00> : vector<2x512xf32>
    %370 = tpu.matmul %369, %249, %cst_66 {dimension_numbers = #tpu.dot_dimension_numbers<[1], [0], [0], [1], [0, 0, 1, 1], [], []>} : vector<2x128xbf16>, vector<128x512xbf16>, vector<2x512xf32> -> vector<2x512xf32>
    %371 = arith.addf %368, %370 : vector<2x512xf32>
    %372 = vector.extract_strided_slice %371 {offsets = [0, 0], sizes = [2, 128], strides = [1, 1]} : vector<2x512xf32> to vector<2x128xf32>
    %373 = arith.negf %372 : vector<2x128xf32>
    %374 = math.exp %373 : vector<2x128xf32>
    %cst_67 = arith.constant 1.000000e+00 : f32
    %375 = vector.broadcast %cst_67 : f32 to vector<2x128xf32>
    %376 = arith.addf %375, %374 : vector<2x128xf32>
    %377 = arith.divf %375, %376 : vector<2x128xf32>
    %378 = vector.extract_strided_slice %371 {offsets = [0, 128], sizes = [2, 128], strides = [1, 1]} : vector<2x512xf32> to vector<2x128xf32>
    %379 = arith.negf %378 : vector<2x128xf32>
    %380 = math.exp %379 : vector<2x128xf32>
    %cst_68 = arith.constant 1.000000e+00 : f32
    %381 = vector.broadcast %cst_68 : f32 to vector<2x128xf32>
    %382 = arith.addf %381, %380 : vector<2x128xf32>
    %383 = arith.divf %381, %382 : vector<2x128xf32>
    %384 = vector.extract_strided_slice %371 {offsets = [0, 256], sizes = [2, 128], strides = [1, 1]} : vector<2x512xf32> to vector<2x128xf32>
    %385 = math.tanh %384 : vector<2x128xf32>
    %386 = vector.extract_strided_slice %371 {offsets = [0, 384], sizes = [2, 128], strides = [1, 1]} : vector<2x512xf32> to vector<2x128xf32>
    %387 = arith.negf %386 : vector<2x128xf32>
    %388 = math.exp %387 : vector<2x128xf32>
    %cst_69 = arith.constant 1.000000e+00 : f32
    %389 = vector.broadcast %cst_69 : f32 to vector<2x128xf32>
    %390 = arith.addf %389, %388 : vector<2x128xf32>
    %391 = arith.divf %389, %390 : vector<2x128xf32>
    %392 = arith.mulf %383, %365 : vector<2x128xf32>
    %393 = arith.mulf %377, %385 : vector<2x128xf32>
    %394 = arith.addf %392, %393 : vector<2x128xf32>
    %395 = math.tanh %394 : vector<2x128xf32>
    %396 = arith.mulf %391, %395 : vector<2x128xf32>
    %397 = vector.extract_strided_slice %248 {offsets = [10, 0], sizes = [2, 512], strides = [1, 1]} : vector<16x512xf32> to vector<2x512xf32>
    %398 = arith.truncf %396 : vector<2x128xf32> to vector<2x128xbf16>
    %cst_70 = arith.constant dense<0.000000e+00> : vector<2x512xf32>
    %399 = tpu.matmul %398, %249, %cst_70 {dimension_numbers = #tpu.dot_dimension_numbers<[1], [0], [0], [1], [0, 0, 1, 1], [], []>} : vector<2x128xbf16>, vector<128x512xbf16>, vector<2x512xf32> -> vector<2x512xf32>
    %400 = arith.addf %397, %399 : vector<2x512xf32>
    %401 = vector.extract_strided_slice %400 {offsets = [0, 0], sizes = [2, 128], strides = [1, 1]} : vector<2x512xf32> to vector<2x128xf32>
    %402 = arith.negf %401 : vector<2x128xf32>
    %403 = math.exp %402 : vector<2x128xf32>
    %cst_71 = arith.constant 1.000000e+00 : f32
    %404 = vector.broadcast %cst_71 : f32 to vector<2x128xf32>
    %405 = arith.addf %404, %403 : vector<2x128xf32>
    %406 = arith.divf %404, %405 : vector<2x128xf32>
    %407 = vector.extract_strided_slice %400 {offsets = [0, 128], sizes = [2, 128], strides = [1, 1]} : vector<2x512xf32> to vector<2x128xf32>
    %408 = arith.negf %407 : vector<2x128xf32>
    %409 = math.exp %408 : vector<2x128xf32>
    %cst_72 = arith.constant 1.000000e+00 : f32
    %410 = vector.broadcast %cst_72 : f32 to vector<2x128xf32>
    %411 = arith.addf %410, %409 : vector<2x128xf32>
    %412 = arith.divf %410, %411 : vector<2x128xf32>
    %413 = vector.extract_strided_slice %400 {offsets = [0, 256], sizes = [2, 128], strides = [1, 1]} : vector<2x512xf32> to vector<2x128xf32>
    %414 = math.tanh %413 : vector<2x128xf32>
    %415 = vector.extract_strided_slice %400 {offsets = [0, 384], sizes = [2, 128], strides = [1, 1]} : vector<2x512xf32> to vector<2x128xf32>
    %416 = arith.negf %415 : vector<2x128xf32>
    %417 = math.exp %416 : vector<2x128xf32>
    %cst_73 = arith.constant 1.000000e+00 : f32
    %418 = vector.broadcast %cst_73 : f32 to vector<2x128xf32>
    %419 = arith.addf %418, %417 : vector<2x128xf32>
    %420 = arith.divf %418, %419 : vector<2x128xf32>
    %421 = arith.mulf %412, %394 : vector<2x128xf32>
    %422 = arith.mulf %406, %414 : vector<2x128xf32>
    %423 = arith.addf %421, %422 : vector<2x128xf32>
    %424 = math.tanh %423 : vector<2x128xf32>
    %425 = arith.mulf %420, %424 : vector<2x128xf32>
    %426 = vector.extract_strided_slice %248 {offsets = [12, 0], sizes = [2, 512], strides = [1, 1]} : vector<16x512xf32> to vector<2x512xf32>
    %427 = arith.truncf %425 : vector<2x128xf32> to vector<2x128xbf16>
    %cst_74 = arith.constant dense<0.000000e+00> : vector<2x512xf32>
    %428 = tpu.matmul %427, %249, %cst_74 {dimension_numbers = #tpu.dot_dimension_numbers<[1], [0], [0], [1], [0, 0, 1, 1], [], []>} : vector<2x128xbf16>, vector<128x512xbf16>, vector<2x512xf32> -> vector<2x512xf32>
    %429 = arith.addf %426, %428 : vector<2x512xf32>
    %430 = vector.extract_strided_slice %429 {offsets = [0, 0], sizes = [2, 128], strides = [1, 1]} : vector<2x512xf32> to vector<2x128xf32>
    %431 = arith.negf %430 : vector<2x128xf32>
    %432 = math.exp %431 : vector<2x128xf32>
    %cst_75 = arith.constant 1.000000e+00 : f32
    %433 = vector.broadcast %cst_75 : f32 to vector<2x128xf32>
    %434 = arith.addf %433, %432 : vector<2x128xf32>
    %435 = arith.divf %433, %434 : vector<2x128xf32>
    %436 = vector.extract_strided_slice %429 {offsets = [0, 128], sizes = [2, 128], strides = [1, 1]} : vector<2x512xf32> to vector<2x128xf32>
    %437 = arith.negf %436 : vector<2x128xf32>
    %438 = math.exp %437 : vector<2x128xf32>
    %cst_76 = arith.constant 1.000000e+00 : f32
    %439 = vector.broadcast %cst_76 : f32 to vector<2x128xf32>
    %440 = arith.addf %439, %438 : vector<2x128xf32>
    %441 = arith.divf %439, %440 : vector<2x128xf32>
    %442 = vector.extract_strided_slice %429 {offsets = [0, 256], sizes = [2, 128], strides = [1, 1]} : vector<2x512xf32> to vector<2x128xf32>
    %443 = math.tanh %442 : vector<2x128xf32>
    %444 = vector.extract_strided_slice %429 {offsets = [0, 384], sizes = [2, 128], strides = [1, 1]} : vector<2x512xf32> to vector<2x128xf32>
    %445 = arith.negf %444 : vector<2x128xf32>
    %446 = math.exp %445 : vector<2x128xf32>
    %cst_77 = arith.constant 1.000000e+00 : f32
    %447 = vector.broadcast %cst_77 : f32 to vector<2x128xf32>
    %448 = arith.addf %447, %446 : vector<2x128xf32>
    %449 = arith.divf %447, %448 : vector<2x128xf32>
    %450 = arith.mulf %441, %423 : vector<2x128xf32>
    %451 = arith.mulf %435, %443 : vector<2x128xf32>
    %452 = arith.addf %450, %451 : vector<2x128xf32>
    %453 = math.tanh %452 : vector<2x128xf32>
    %454 = arith.mulf %449, %453 : vector<2x128xf32>
    %455 = vector.extract_strided_slice %248 {offsets = [14, 0], sizes = [2, 512], strides = [1, 1]} : vector<16x512xf32> to vector<2x512xf32>
    %456 = arith.truncf %454 : vector<2x128xf32> to vector<2x128xbf16>
    %cst_78 = arith.constant dense<0.000000e+00> : vector<2x512xf32>
    %457 = tpu.matmul %456, %249, %cst_78 {dimension_numbers = #tpu.dot_dimension_numbers<[1], [0], [0], [1], [0, 0, 1, 1], [], []>} : vector<2x128xbf16>, vector<128x512xbf16>, vector<2x512xf32> -> vector<2x512xf32>
    %458 = arith.addf %455, %457 : vector<2x512xf32>
    %459 = vector.extract_strided_slice %458 {offsets = [0, 0], sizes = [2, 128], strides = [1, 1]} : vector<2x512xf32> to vector<2x128xf32>
    %460 = arith.negf %459 : vector<2x128xf32>
    %461 = math.exp %460 : vector<2x128xf32>
    %cst_79 = arith.constant 1.000000e+00 : f32
    %462 = vector.broadcast %cst_79 : f32 to vector<2x128xf32>
    %463 = arith.addf %462, %461 : vector<2x128xf32>
    %464 = arith.divf %462, %463 : vector<2x128xf32>
    %465 = vector.extract_strided_slice %458 {offsets = [0, 128], sizes = [2, 128], strides = [1, 1]} : vector<2x512xf32> to vector<2x128xf32>
    %466 = arith.negf %465 : vector<2x128xf32>
    %467 = math.exp %466 : vector<2x128xf32>
    %cst_80 = arith.constant 1.000000e+00 : f32
    %468 = vector.broadcast %cst_80 : f32 to vector<2x128xf32>
    %469 = arith.addf %468, %467 : vector<2x128xf32>
    %470 = arith.divf %468, %469 : vector<2x128xf32>
    %471 = vector.extract_strided_slice %458 {offsets = [0, 256], sizes = [2, 128], strides = [1, 1]} : vector<2x512xf32> to vector<2x128xf32>
    %472 = math.tanh %471 : vector<2x128xf32>
    %473 = vector.extract_strided_slice %458 {offsets = [0, 384], sizes = [2, 128], strides = [1, 1]} : vector<2x512xf32> to vector<2x128xf32>
    %474 = arith.negf %473 : vector<2x128xf32>
    %475 = math.exp %474 : vector<2x128xf32>
    %cst_81 = arith.constant 1.000000e+00 : f32
    %476 = vector.broadcast %cst_81 : f32 to vector<2x128xf32>
    %477 = arith.addf %476, %475 : vector<2x128xf32>
    %478 = arith.divf %476, %477 : vector<2x128xf32>
    %479 = arith.mulf %470, %452 : vector<2x128xf32>
    %480 = arith.mulf %464, %472 : vector<2x128xf32>
    %481 = arith.addf %479, %480 : vector<2x128xf32>
    %482 = math.tanh %481 : vector<2x128xf32>
    %483 = arith.mulf %478, %482 : vector<2x128xf32>
    %484 = tpu.concatenate %280, %309, %338, %367, %396, %425, %454, %483 in 0 : vector<2x128xf32>, vector<2x128xf32>, vector<2x128xf32>, vector<2x128xf32>, vector<2x128xf32>, vector<2x128xf32>, vector<2x128xf32>, vector<2x128xf32> -> vector<16x128xf32>
    %485 = arith.truncf %484 : vector<16x128xf32> to vector<16x128xbf16>
    %c0_82 = arith.constant 0 : index
    %c0_83 = arith.constant 0 : index
    %486 = vector.load %arg8[%c0_82, %c0_83] : memref<128x32xbf16, #tpu.memory_space<vmem>>, vector<128x32xbf16>
    %cst_84 = arith.constant dense<0.000000e+00> : vector<16x32xf32>
    %487 = tpu.matmul %485, %486, %cst_84 {dimension_numbers = #tpu.dot_dimension_numbers<[1], [0], [0], [1], [0, 0, 1, 1], [], []>} : vector<16x128xbf16>, vector<128x32xbf16>, vector<16x32xf32> -> vector<16x32xf32>
    %c0_85 = arith.constant 0 : index
    %c0_86 = arith.constant 0 : index
    %488 = vector.load %arg9[%c0_85, %c0_86] : memref<1x32xf32, #tpu.memory_space<vmem>>, vector<1x32xf32>
    %489 = vector.broadcast %488 : vector<1x32xf32> to vector<16x32xf32>
    %490 = arith.addf %487, %489 : vector<16x32xf32>
    %491 = vector.extract_strided_slice %490 {offsets = [0, 0], sizes = [16, 16], strides = [1, 1]} : vector<16x32xf32> to vector<16x16xf32>
    %492 = vector.extract_strided_slice %490 {offsets = [0, 16], sizes = [16, 16], strides = [1, 1]} : vector<16x32xf32> to vector<16x16xf32>
    %c0_87 = arith.constant 0 : index
    %c0_88 = arith.constant 0 : index
    %493 = vector.load %arg1[%c0_87, %c0_88] : memref<16x16xf32, #tpu.memory_space<vmem>>, vector<16x16xf32>
    %cst_89 = arith.constant 5.000000e-01 : f32
    %494 = vector.broadcast %cst_89 : f32 to vector<16x16xf32>
    %495 = arith.mulf %494, %492 : vector<16x16xf32>
    %496 = math.exp %495 : vector<16x16xf32>
    %497 = arith.mulf %493, %496 : vector<16x16xf32>
    %498 = arith.addf %497, %491 : vector<16x16xf32>
    %c0_90 = arith.constant 0 : index
    %c0_91 = arith.constant 0 : index
    %499 = vector.load %arg10[%c0_90, %c0_91] : memref<16x16xf32, #tpu.memory_space<vmem>>, vector<16x16xf32>
    tpu.vector_store %arg10[%c0_90, %c0_91], %491 {strides = array<i32>} : memref<16x16xf32, #tpu.memory_space<vmem>>, vector<16x16xf32>,
    %c0_92 = arith.constant 0 : index
    %c0_93 = arith.constant 0 : index
    %500 = vector.load %arg11[%c0_92, %c0_93] : memref<16x16xf32, #tpu.memory_space<vmem>>, vector<16x16xf32>
    tpu.vector_store %arg11[%c0_92, %c0_93], %492 {strides = array<i32>} : memref<16x16xf32, #tpu.memory_space<vmem>>, vector<16x16xf32>,
    %c0_94 = arith.constant 0 : index
    %c0_95 = arith.constant 0 : index
    %501 = vector.load %arg12[%c0_94, %c0_95] : memref<16x16xf32, #tpu.memory_space<vmem>>, vector<16x16xf32>
    tpu.vector_store %arg12[%c0_94, %c0_95], %498 {strides = array<i32>} : memref<16x16xf32, #tpu.memory_space<vmem>>, vector<16x16xf32>,
    return
  }
}

</mosaic_0001>

<bundles_post_ra>
// kernel: decoder_forward.1
= control target key start
LH: loop header
LB: loop body
LE: loop exit
PB: predicated region body
PF: predicated region fallthrough
CT: control target
= control target key end

     0   :  { %18 = vsyncpa [#allocation3], 0  ;;  %s4981_s0 = inlined_call_operand.vmem [shape: f32[16,16], index: 0, kind: input, shape index: {}]   ;;  %s4982_s1 = inlined_call_operand.vmem [shape: f32[16,16], index: 1, kind: input, shape index: {}]   ;;  %s4983_s2 = inlined_call_operand.vmem [shape: bf16[16,512], index: 2, kind: input, shape index: {}]   ;;  %s4984_s3 = inlined_call_operand.vmem [shape: f32[1,512], index: 3, kind: input, shape index: {}]   ;;  %s4985_s4 = inlined_call_operand.hbm [shape: bf16[128,512], index: 4, kind: input, shape index: {}]   ;;  %s4986_s5 = inlined_call_operand.hbm [shape: bf16[128,512], index: 5, kind: input, shape index: {}]   ;;  %s4987_s6 = inlined_call_operand.vmem [shape: f32[1,512], index: 6, kind: input, shape index: {}]   ;;  %s4988_s7 = inlined_call_operand.hbm [shape: bf16[128,512], index: 7, kind: input, shape index: {}]   ;;  %s4989_s8 = inlined_call_operand.vmem [shape: bf16[128,32], index: 8, kind: input, shape index: {}]   ;;  %s4990_s9 = inlined_call_operand.vmem [shape: f32[1,32], index: 9, kind: input, shape index: {}]   ;;  %s4991_s10 = inlined_call_operand.vmem [shape: f32[16,16], index: 10, kind: output, shape index: {0}]   ;;  %s4992_s11 = inlined_call_operand.vmem [shape: f32[16,16], index: 11, kind: output, shape index: {1}]   ;;  %s4993_s12 = inlined_call_operand.vmem [shape: f32[16,16], index: 12, kind: output, shape index: {2}]  }
   0x1   :  { %19 = vsyncpa [#allocation5], 0  ;;  %s3819_s21 = smov [#allocation4]   ;;  %s3820_s23 = smov [#allocation2]  }
   0x2   :  { %s45_s22 = sshll.u32 %s3819_s21, 4  ;;  %s33_s24 = sshll.u32 %s3820_s23, 4  ;;  %s46_s22 = int_to_ptr.vmem [resolvable:$true] %s45_s22  ;;  %s3893_s24 = int_to_ptr.vmem [resolvable:$true] %s33_s24 }
   0x3   :  { %s3749_s27 = scalar_lea.hbm %s4986_s5, 4096 }
   0x4   :  { %p3750_p0 = scmp.ne.s32.totalorder %s4986_s5, %s3749_s27  ;;  %p3753_p1 = scmp.lt.u32.totalorder %s3749_s27, %s4986_s5 }
   0x6   :  { %p3755_p2 = pnand %p3753_p1, %p3750_p0 }
   0x8   :  { %3758 = shalt.err (!%p3755_p2)
}
   0x9   :  { %s3759_s14 = scalar_lea.vmem %s46_s22, 4096  ;;  %p3764_p4 = scmp.lt.s32.totalorder %s46_s22, %s46_s22 }
   0xa   :  { %p3760_p3 = scmp.ne.s32.totalorder %s46_s22, %s3759_s14  ;;  %p3765_p5 = scmp.lt.s32.totalorder %s3759_s14, %s3759_s14 }
   0xc   :  { %p3766_p6 = por %p3765_p5, %p3764_p4 }
   0xe   :  { %p3767_p7 = pnand %p3766_p6, %p3760_p3 }
  0x10   :  { %3770 = shalt.err (!%p3767_p7)
}
  0x11   :  { %s3821_s15 = smov 256   ;;  %s3822_s16 = smov 16  }
  0x12   :  { %51 = dma.hbm_to_vmem [thread:$0]  %s4986_s5, 4096, %s46_s22, [#allocation5], %s3821_s15, %s3821_s15, %s3822_s16  }
  0x13   :  { %s3771_s21 = scalar_lea.hbm %s4985_s4, 4096 }
  0x14   :  { %p3772_p8 = scmp.ne.s32.totalorder %s4985_s4, %s3771_s21  ;;  %p3775_p9 = scmp.lt.u32.totalorder %s3771_s21, %s4985_s4 }
  0x16   :  { %p3777_p10 = pnand %p3775_p9, %p3772_p8 }
  0x18   :  { %3780 = shalt.err (!%p3777_p10)
}
  0x19   :  { %s3781_s28 = scalar_lea.vmem %s3893_s24, 4096  ;;  %p3786_p12 = scmp.lt.s32.totalorder %s3893_s24, %s3893_s24 }
  0x1a   :  { %p3782_p11 = scmp.ne.s32.totalorder %s3893_s24, %s3781_s28  ;;  %p3787_p13 = scmp.lt.s32.totalorder %s3781_s28, %s3781_s28 }
  0x1c   :  { %p3788_p0 = por %p3787_p13, %p3786_p12 }
  0x1e   :  { %p3789_p1 = pnand %p3788_p0, %p3782_p11 }
  0x20   :  { %3792 = shalt.err (!%p3789_p1)
}
  0x21   :  { %39 = dma.hbm_to_vmem [thread:$0]  %s4985_s4, 4096, %s3893_s24, [#allocation3], %s3821_s15, %s3821_s15, %s3822_s16  }
  0x22   :  { %s3823_s29 = smov [#allocation6]   ;;  %s3793_s17 = scalar_lea.hbm %s4988_s7, 4096 }
  0x23   :  { %s59_s30 = sshll.u32 %s3823_s29, 4  ;;  %p3794_p2 = scmp.ne.s32.totalorder %s4988_s7, %s3793_s17  ;;  %s60_s30 = int_to_ptr.vmem [resolvable:$true] %s59_s30 }
  0x24   :  { %p3797_p3 = scmp.lt.u32.totalorder %s3793_s17, %s4988_s7 }
  0x26   :  { %p3799_p4 = pnand %p3797_p3, %p3794_p2 }
  0x28   :  { %3802 = shalt.err (!%p3799_p4)
}
  0x29   :  { %s3803_s23 = scalar_lea.vmem %s60_s30, 4096  ;;  %p3808_p6 = scmp.lt.s32.totalorder %s60_s30, %s60_s30 }
  0x2a   :  { %p3804_p5 = scmp.ne.s32.totalorder %s60_s30, %s3803_s23  ;;  %p3809_p7 = scmp.lt.s32.totalorder %s3803_s23, %s3803_s23 }
  0x2c   :  { %p3810_p8 = por %p3809_p7, %p3808_p6 }
  0x2e   :  { %p3811_p9 = pnand %p3810_p8, %p3804_p5 }
  0x30   :  { %3814 = shalt.err (!%p3811_p9)
}
  0x31   :  { %65 = dma.hbm_to_vmem [thread:$0]  %s4988_s7, 4096, %s60_s30, [#allocation5], %s3821_s15, %s3821_s15, %s3822_s16  }
  0x32   :  { %3815 = dma.done.wait [#allocation3], 4096  }
  0x33   :  { %3816 = vsyncadd [#allocation3], 4294963200 }
  0x34   :  { %3817 = dma.done.wait [#allocation5], 8192  }
  0x35   :  { %3818 = vsyncadd [#allocation5], 4294959104  ;;  %v3824_v0 = vmov 0   ;;  %v3267_v1 = vld [vmem:[%s4983_s2 + $0x4] ss:$16 sps:$4 sm:$0xff]   ;;  %v81_v6 = vld [vmem:[%s4981_s0 + $0x8] sm:$0xff]  ;;  %v89_v40 = vlaneseq }
  0x36   :  { %165 = vmatprep.mubr.bf16.mxu1 %v3824_v0  ;;  %443 = vmatprep.mubr.bf16.mxu0 %v3824_v0  ;;  %v3950_v2 = vld [vmem:[#allocation2 + $0x4] ss:$16 sps:$4 sm:$0xff]   ;;  %v3271_v3 = vld [vmem:[%s4983_s2] ss:$16 sps:$4 sm:$0xff]   ;;  %vm129_vm0 = vcmask 130048   ;;  %vm1406_vm1 = vcmask 1041408  }
  0x37   :  { %133 = vmatprep.subr.bf16.mxu1 %v3267_v1  ;;  %v3955_v4 = vld [vmem:[#allocation2] ss:$16 sps:$4 sm:$0xff]   ;;  %411 = vmatprep.subr.bf16.mxu0 %v3950_v2  ;;  %v3965_v8 = vld [vmem:[#allocation2 + $0x24] ss:$16 sps:$4 sm:$0xff]   ;;  %v3276_v10 = vld [vmem:[%s4983_s2 + $0x8] ss:$16 sps:$4 sm:$0xff]  }
  0x38   :  { %v80_v5 = vld [vmem:[%s4981_s0] sm:$0xff]  ;;  %134 = vmatpush1.bf16.msra.mxu1 %v3271_v3  ;;  %412 = vmatpush1.bf16.msra.mxu0 %v3955_v4  ;;  %v3278_v11 = vld [vmem:[%s4983_s2 + $0xc] ss:$16 sps:$4 sm:$0xff]   ;;  %v3989_v16 = vld [vmem:[#allocation2 + $0x8] ss:$16 sps:$4 sm:$0xff]   ;;  %v4103_v41 = vshrl.u32 %v89_v40, 7 }
  0x39   :  { %v82_v7 = vpack.c.bf16 %v81_v6, %v80_v5  ;;  %v3967_v9 = vld [vmem:[#allocation2 + $0x20] ss:$16 sps:$4 sm:$0xff]   ;;  %413 = vmatprep.subr.bf16.mxu0 %v3965_v8  ;;  %v3976_v12 = vld [vmem:[#allocation2 + $0x44] ss:$16 sps:$4 sm:$0xff]   ;;  %176 = vmatprep.subr.bf16.mxu1 %v3278_v11  ;;  %v3982_v14 = vld [vmem:[#allocation2 + $0xc] ss:$16 sps:$4 sm:$0xff]  }
  0x3a   :  { %v3979_v13 = vld [vmem:[#allocation2 + $0x40] ss:$16 sps:$4 sm:$0xff]   ;;  %v3986_v15 = vld [vmem:[#allocation2 + $0x64] ss:$16 sps:$4 sm:$0xff]   ;;  %v3994_v18 = vld [vmem:[#allocation2 + $0x2c] ss:$16 sps:$4 sm:$0xff]  }
  0x3b   :  { %3074 = vmatmul.mubr.msk.bf16.vlgmr.msra.gmra.mrb[0].mxu1 %vm129_vm0, %v82_v7  ;;  %v3992_v17 = vld [vmem:[#allocation2 + $0x60] ss:$16 sps:$4 sm:$0xff]   ;;  %v3997_v19 = vld [vmem:[#allocation2 + $0x84] ss:$16 sps:$4 sm:$0xff]   ;;  %v4000_v20 = vld [vmem:[#allocation2 + $0x28] ss:$16 sps:$4 sm:$0xff]  }
  0x3c   :  { %414 = vmatpush1.bf16.msra.mxu0 %v3967_v9  ;;  %177 = vmatpush1.bf16.msra.mxu1 %v3276_v10  ;;  %v4004_v21 = vld [vmem:[#allocation2 + $0x80] ss:$16 sps:$4 sm:$0xff]   ;;  %v4008_v22 = vld [vmem:[#allocation2 + $0x4c] ss:$16 sps:$4 sm:$0xff]   ;;  %v4010_v23 = vld [vmem:[#allocation2 + $0xa4] ss:$16 sps:$4 sm:$0xff]  }
  0x3d   :  { %415 = vmatprep.subr.bf16.mxu0 %v3976_v12  ;;  %208 = vmatprep.mubr.bf16.mxu1 %v3824_v0  ;;  %v4015_v24 = vld [vmem:[#allocation2 + $0x48] ss:$16 sps:$4 sm:$0xff]   ;;  %v4017_v25 = vld [vmem:[#allocation2 + $0xa0] ss:$16 sps:$4 sm:$0xff]   ;;  %v4021_v26 = vld [vmem:[#allocation2 + $0x6c] ss:$16 sps:$4 sm:$0xff]  }
  0x3e   :  { %452 = vmatprep.subr.bf16.mxu1 %v3982_v14  ;;  %v4023_v27 = vld [vmem:[#allocation2 + $0xc4] ss:$16 sps:$4 sm:$0xff]   ;;  %v4025_v28 = vld [vmem:[#allocation2 + $0x68] ss:$16 sps:$4 sm:$0xff]   ;;  %v4029_v29 = vld [vmem:[#allocation2 + $0xc0] ss:$16 sps:$4 sm:$0xff]  }
  0x3f   :  { %v4031_v30 = vld [vmem:[#allocation2 + $0x8c] ss:$16 sps:$4 sm:$0xff]   ;;  %v4033_v31 = vld [vmem:[#allocation2 + $0xe4] ss:$16 sps:$4 sm:$0xff]   ;;  %v4037_v32 = vld [vmem:[#allocation2 + $0x88] ss:$16 sps:$4 sm:$0xff]  }
  0x40   :  { %416 = vmatpush1.bf16.msra.mxu0 %v3979_v13  ;;  %v4039_v33 = vld [vmem:[#allocation2 + $0xe0] ss:$16 sps:$4 sm:$0xff]   ;;  %v4041_v34 = vld [vmem:[#allocation2 + $0xac] ss:$16 sps:$4 sm:$0xff]   ;;  %v4047_v35 = vld [vmem:[#allocation2 + $0xa8] ss:$16 sps:$4 sm:$0xff]  }
  0x41   :  { %417 = vmatprep.subr.bf16.mxu0 %v3986_v15  ;;  %v4049_v36 = vld [vmem:[#allocation2 + $0xcc] ss:$16 sps:$4 sm:$0xff]   ;;  %v4055_v37 = vld [vmem:[#allocation2 + $0xc8] ss:$16 sps:$4 sm:$0xff]   ;;  %v91_v42 = vsub.s32 0, %v4103_v41  ;;  %v4995_v44 = vsub.s32 1, %v4103_v41 }
  0x42   :  { %v4058_v38 = vld [vmem:[#allocation2 + $0xec] ss:$16 sps:$4 sm:$0xff]   ;;  %v4064_v39 = vld [vmem:[#allocation2 + $0xe8] ss:$16 sps:$4 sm:$0xff]   ;;  %v87_v43 = vld [vmem:[%s4984_s3] sm:$0xf] }
  0x43   :  { %3075 = vmatmul.mubr.msk.bf16.vlgmr.msra.gmra.mrb[4].mxu1 %vm129_vm0, %v82_v7  ;;  %v92_v45 = vrot.slane %v87_v43, %v91_v42  ;;  %v96_v47 = vrot.slane %v87_v43, %v4995_v44  ;;  %v4996_v52 = vsub.s32 2, %v4103_v41  ;;  %v4994_v54 = vsub.s32 3, %v4103_v41  ;;  %s3827_s30 = smov 112  }
  0x44   :  { %453 = vmatpush1.bf16.msra.mxu1 %v3989_v16  ;;  %418 = vmatpush1.bf16.msra.mxu0 %v3992_v17  ;;  %vm1408_vm2 = vcmask 1043456   ;;  %vm1410_vm3 = vcmask 1045504   ;;  %vm3826_vm4 = vmmov 0  }
  0x45   :  { %454 = vmatprep.subr.bf16.mxu1 %v3994_v18  ;;  %419 = vmatprep.subr.bf16.mxu0 %v3997_v19  ;;  %v100_v55 = vrot.slane %v87_v43, %v4996_v52  ;;  %v104_v57 = vrot.slane %v87_v43, %v4994_v54 }
  0x46   :  { %484 = vmatprep.mubr.bf16.mxu1 %v3824_v0 }
  0x48   :  { %455 = vmatpush1.bf16.msra.mxu1 %v4000_v20  ;;  %420 = vmatpush1.bf16.msra.mxu0 %v4004_v21 }
  0x49   :  { %456 = vmatprep.subr.bf16.mxu1 %v4008_v22  ;;  %421 = vmatprep.subr.bf16.mxu0 %v4010_v23 }
  0x4c   :  { %457 = vmatpush1.bf16.msra.mxu1 %v4015_v24  ;;  %422 = vmatpush1.bf16.msra.mxu0 %v4017_v25 }
  0x4d   :  { %458 = vmatprep.subr.bf16.mxu1 %v4021_v26  ;;  %423 = vmatprep.subr.bf16.mxu0 %v4023_v27 }
  0x50   :  { %459 = vmatpush1.bf16.msra.mxu1 %v4025_v28  ;;  %424 = vmatpush1.bf16.msra.mxu0 %v4029_v29 }
  0x51   :  { %460 = vmatprep.subr.bf16.mxu1 %v4031_v30  ;;  %425 = vmatprep.subr.bf16.mxu0 %v4033_v31 }
  0x54   :  { %461 = vmatpush1.bf16.msra.mxu1 %v4037_v32  ;;  %426 = vmatpush1.bf16.msra.mxu0 %v4039_v33 }
  0x55   :  { %462 = vmatprep.subr.bf16.mxu1 %v4041_v34  ;;  %522 = vmatprep.subr.bf16.mxu0 %v3950_v2 }
  0x57   :  { %444 = vmatmul.mubr.bf16.vlgmr.msra.gmra.mrb[0].mxu0 %v3824_v0 }
  0x58   :  { %463 = vmatpush1.bf16.msra.mxu1 %v4047_v35  ;;  %523 = vmatpush1.bf16.msra.mxu0 %v3955_v4 }
  0x59   :  { %464 = vmatprep.subr.bf16.mxu1 %v4049_v36  ;;  %524 = vmatprep.subr.bf16.mxu0 %v3965_v8 }
  0x5a   :  { %554 = vmatprep.mubr.bf16.mxu0 %v3824_v0 }
  0x5c   :  { %465 = vmatpush1.bf16.msra.mxu1 %v4055_v37  ;;  %525 = vmatpush1.bf16.msra.mxu0 %v3967_v9 }
  0x5d   :  { %466 = vmatprep.subr.bf16.mxu1 %v4058_v38  ;;  %526 = vmatprep.subr.bf16.mxu0 %v3976_v12 }
  0x60   :  { %467 = vmatpush1.bf16.msra.mxu1 %v4064_v39  ;;  %527 = vmatpush1.bf16.msra.mxu0 %v3979_v13 }
  0x61   :  { %563 = vmatprep.subr.bf16.mxu1 %v3982_v14  ;;  %528 = vmatprep.subr.bf16.mxu0 %v3986_v15 }
  0x63   :  { %485 = vmatmul.mubr.bf16.vlgmr.msra.gmra.mrb[8].mxu1 %v3824_v0 }
  0x64   :  { %564 = vmatpush1.bf16.msra.mxu1 %v3989_v16  ;;  %529 = vmatpush1.bf16.msra.mxu0 %v3992_v17 }
  0x65   :  { %565 = vmatprep.subr.bf16.mxu1 %v3994_v18  ;;  %530 = vmatprep.subr.bf16.mxu0 %v3997_v19 }
  0x66   :  { %595 = vmatprep.mubr.bf16.mxu1 %v3824_v0 }
  0x68   :  { %566 = vmatpush1.bf16.msra.mxu1 %v4000_v20  ;;  %531 = vmatpush1.bf16.msra.mxu0 %v4004_v21 }
  0x69   :  { %567 = vmatprep.subr.bf16.mxu1 %v4008_v22  ;;  %532 = vmatprep.subr.bf16.mxu0 %v4010_v23 }
  0x6c   :  { %568 = vmatpush1.bf16.msra.mxu1 %v4015_v24  ;;  %533 = vmatpush1.bf16.msra.mxu0 %v4017_v25 }
  0x6d   :  { %569 = vmatprep.subr.bf16.mxu1 %v4021_v26  ;;  %534 = vmatprep.subr.bf16.mxu0 %v4023_v27 }
  0x70   :  { %570 = vmatpush1.bf16.msra.mxu1 %v4025_v28  ;;  %535 = vmatpush1.bf16.msra.mxu0 %v4029_v29 }
  0x71   :  { %571 = vmatprep.subr.bf16.mxu1 %v4031_v30  ;;  %536 = vmatprep.subr.bf16.mxu0 %v4033_v31 }
  0x74   :  { %572 = vmatpush1.bf16.msra.mxu1 %v4037_v32  ;;  %537 = vmatpush1.bf16.msra.mxu0 %v4039_v33 }
  0x75   :  { %573 = vmatprep.subr.bf16.mxu1 %v4041_v34  ;;  %651 = vmatprep.subr.bf16.mxu0 %v3950_v2 }
  0x78   :  { %574 = vmatpush1.bf16.msra.mxu1 %v4047_v35 }
  0x79   :  { %575 = vmatprep.subr.bf16.mxu1 %v4049_v36 }
  0x7c   :  { %576 = vmatpush1.bf16.msra.mxu1 %v4055_v37 }
  0x7d   :  { %577 = vmatprep.subr.bf16.mxu1 %v4058_v38 }
  0x80   :  { %578 = vmatpush1.bf16.msra.mxu1 %v4064_v39 }
  0x81   :  { %692 = vmatprep.subr.bf16.mxu1 %v3982_v14 }
 0x10e   :  { %v167_v46 = vpop.f32.mrb[0].mxu1 }
 0x10f   :  { %v169_v48 = vpop.f32.mrb[1].mxu1  ;;  %v4128_v63 = vadd.f32 %v167_v46, %v92_v45 }
 0x110   :  { %v171_v49 = vpop.f32.mrb[2].mxu1  ;;  %v4130_v1 = vadd.f32 %v169_v48, %v96_v47 }
 0x111   :  { %v4114_v50 = vadd.f32 %v171_v49, %v92_v45  ;;  %v173_v51 = vpop.f32.mrb[3].mxu1 }
 0x112   :  { %v4117_v53 = vadd.f32 %v173_v51, %v96_v47 }
 0x116   :  { %v210_v56 = vpop.f32.mrb[4].mxu1 }
 0x117   :  { %v212_v58 = vpop.f32.mrb[5].mxu1  ;;  %v4134_v49 = vadd.f32 %v210_v56, %v100_v55 }
 0x118   :  { %v214_v59 = vpop.f32.mrb[6].mxu1  ;;  %v4136_v51 = vadd.f32 %v212_v58, %v104_v57 }
 0x119   :  { %v4124_v60 = vadd.f32 %v214_v59, %v100_v55  ;;  %v216_v61 = vpop.f32.mrb[7].mxu1 }
 0x11a   :  { %v4126_v62 = vadd.f32 %v216_v61, %v104_v57 }
 0x12a   :  { %v445_v3 = vpop.f32.mrb[0].mxu0 }
 0x12b   :  { %v493_v5 = vadd.f32 %v445_v3, %v4128_v63  ;;  %v447_v6 = vpop.f32.mrb[1].mxu0 }
 0x12c   :  { %v494_v7 = vadd.f32 %v447_v6, %v4130_v1  ;;  %v449_v10 = vpop.f32.mrb[2].mxu0 }
 0x12d   :  { %v3108_v11 = vmul.f32 -1.442695, %v493_v5  ;;  %v450_v40 = vpop.f32.mrb[3].mxu0 }
 0x12e   :  { %v3109_v43 = vmul.f32 -1.442695, %v494_v7 }
 0x12f   :  { %3425 = vpow2.f32 %v3108_v11 }
 0x130   :  { %3427 = vpow2.f32 %v3109_v43 }
 0x136   :  { %v486_v45 = vpop.f32.mrb[8].mxu1 }
 0x137   :  { %v495_v46 = vadd.f32 %v486_v45, %v4134_v49  ;;  %v488_v47 = vpop.f32.mrb[9].mxu1 }
 0x138   :  { %v496_v48 = vadd.f32 %v488_v47, %v4136_v51  ;;  %v490_v59 = vpop.f32.mrb[10].mxu1 }
 0x139   :  { %v3426_v61 = vpop.eup %3425  ;;  %v491_v3 = vpop.f32.mrb[11].mxu1  ;;  %3429 = vtanh.f32 %v495_v46 }
 0x13a   :  { %v3428_v6 = vpop.eup %3427  ;;  %v500_v10 = vadd.f32 1.0, %v3426_v61  ;;  %v3110_v5 = vmul.f32 -1.442695, %v496_v48 }
 0x13b   :  { %v506_v40 = vadd.f32 1.0, %v3428_v6 }
 0x13c   :  { %3431 = vrcp.f32 %v500_v10 }
 0x13d   :  { %3433 = vrcp.f32 %v506_v40 }
 0x13e   :  { %3435 = vpow2.f32 %v3110_v5 }
 0x143   :  { %v3430_v55 = vpop.eup %3429 }
 0x146   :  { %v3432_v56 = vpop.eup %3431 }
 0x147   :  { %v3434_v57 = vpop.eup %3433  ;;  %v517_v58 = vmul.f32 %v3432_v56, %v3430_v55 }
 0x148   :  { %v3436_v7 = vpop.eup %3435  ;;  %v516_v11 = vmul.f32 0.0, %v3434_v57 }
 0x149   :  { %v513_v43 = vadd.f32 1.0, %v3436_v7 }
 0x14a   :  { %v4140_v45 = vadd.f32 %v517_v58, %v516_v11 }
 0x14b   :  { %3437 = vrcp.f32 %v513_v43 }
 0x14c   :  { %3439 = vtanh.f32 %v4140_v45 }
 0x155   :  { %v3438_v47 = vpop.eup %3437 }
 0x156   :  { %v3440_v59 = vpop.eup %3439 }
 0x157   :  { %v4143_v48 = vmul.f32 %v3440_v59, %v3438_v47 }
 0x159   :  { %v521_v46 = vpack.c.bf16 %v4143_v48, %v4143_v48 }
 0x15b   :  { %555 = vmatmul.mubr.bf16.vlgmr.msra.gmra.mrb[4].mxu0 %v521_v46  ;;  %596 = vmatmul.mubr.bf16.vlgmr.msra.gmra.mrb[12].mxu1 %v521_v46 }
 0x15c   :  { %652 = vmatpush1.bf16.msra.mxu0 %v3955_v4  ;;  %693 = vmatpush1.bf16.msra.mxu1 %v3989_v16 }
 0x15d   :  { %653 = vmatprep.subr.bf16.mxu0 %v3965_v8  ;;  %694 = vmatprep.subr.bf16.mxu1 %v3994_v18 }
 0x15e   :  { %683 = vmatprep.mubr.bf16.mxu0 %v3824_v0  ;;  %724 = vmatprep.mubr.bf16.mxu1 %v3824_v0 }
 0x160   :  { %654 = vmatpush1.bf16.msra.mxu0 %v3967_v9  ;;  %695 = vmatpush1.bf16.msra.mxu1 %v4000_v20 }
 0x161   :  { %655 = vmatprep.subr.bf16.mxu0 %v3976_v12  ;;  %696 = vmatprep.subr.bf16.mxu1 %v4008_v22 }
 0x164   :  { %656 = vmatpush1.bf16.msra.mxu0 %v3979_v13  ;;  %697 = vmatpush1.bf16.msra.mxu1 %v4015_v24 }
 0x165   :  { %657 = vmatprep.subr.bf16.mxu0 %v3986_v15  ;;  %698 = vmatprep.subr.bf16.mxu1 %v4021_v26 }
 0x168   :  { %658 = vmatpush1.bf16.msra.mxu0 %v3992_v17  ;;  %699 = vmatpush1.bf16.msra.mxu1 %v4025_v28 }
 0x169   :  { %659 = vmatprep.subr.bf16.mxu0 %v3997_v19  ;;  %700 = vmatprep.subr.bf16.mxu1 %v4031_v30 }
 0x16c   :  { %660 = vmatpush1.bf16.msra.mxu0 %v4004_v21  ;;  %701 = vmatpush1.bf16.msra.mxu1 %v4037_v32 }
 0x16d   :  { %661 = vmatprep.subr.bf16.mxu0 %v4010_v23  ;;  %702 = vmatprep.subr.bf16.mxu1 %v4041_v34 }
 0x170   :  { %662 = vmatpush1.bf16.msra.mxu0 %v4017_v25  ;;  %703 = vmatpush1.bf16.msra.mxu1 %v4047_v35 }
 0x171   :  { %663 = vmatprep.subr.bf16.mxu0 %v4023_v27  ;;  %704 = vmatprep.subr.bf16.mxu1 %v4049_v36 }
 0x174   :  { %664 = vmatpush1.bf16.msra.mxu0 %v4029_v29  ;;  %705 = vmatpush1.bf16.msra.mxu1 %v4055_v37 }
 0x175   :  { %665 = vmatprep.subr.bf16.mxu0 %v4033_v31  ;;  %706 = vmatprep.subr.bf16.mxu1 %v4058_v38 }
 0x178   :  { %666 = vmatpush1.bf16.msra.mxu0 %v4039_v33  ;;  %707 = vmatpush1.bf16.msra.mxu1 %v4064_v39 }
 0x179   :  { %780 = vmatprep.subr.bf16.mxu0 %v3950_v2  ;;  %821 = vmatprep.subr.bf16.mxu1 %v3982_v14 }
 0x22e   :  { %v556_v61 = vpop.f32.mrb[4].mxu0  ;;  %v597_v3 = vpop.f32.mrb[12].mxu1 }
 0x22f   :  { %v608_v6 = vrot.slane %v556_v61, 6  ;;  %v558_v10 = vpop.f32.mrb[5].mxu0  ;;  %v599_v5 = vpop.f32.mrb[13].mxu1  ;;  %v610_v54 = vrot.slane %v597_v3, 6 }
 0x230   :  { %v609_v40 = vrot.slane %v558_v10, 6  ;;  %v560_v55 = vpop.f32.mrb[6].mxu0  ;;  %v601_v56 = vpop.f32.mrb[14].mxu1  ;;  %v611_v59 = vrot.slane %v599_v5, 6  ;;  %v640_v5 = vrot.slane %v4140_v45, 6 }
 0x231   :  { %v616_v57 = vadd.f32 %v608_v6, %v4128_v63  ;;  %v561_v58 = vpop.f32.mrb[7].mxu0  ;;  %v602_v7 = vpop.f32.mrb[15].mxu1  ;;  %v618_v44 = vadd.f32 %v610_v54, %v4134_v49 }
 0x232   :  { %v617_v11 = vadd.f32 %v609_v40, %v4130_v1  ;;  %v619_v46 = vadd.f32 %v611_v59, %v4136_v51 }
 0x233   :  { %v3111_v43 = vmul.f32 -1.442695, %v616_v57 }
 0x234   :  { %v3112_v47 = vmul.f32 -1.442695, %v617_v11  ;;  %v3113_v61 = vmul.f32 -1.442695, %v619_v46 }
 0x235   :  { %3441 = vpow2.f32 %v3111_v43 }
 0x236   :  { %3443 = vpow2.f32 %v3112_v47 }
 0x237   :  { %3445 = vpow2.f32 %v3113_v61 }
 0x238   :  { %3447 = vtanh.f32 %v618_v44 }
 0x23f   :  { %v3442_v10 = vpop.eup %3441 }
 0x240   :  { %v3444_v55 = vpop.eup %3443  ;;  %v623_v56 = vadd.f32 1.0, %v3442_v10 }
 0x241   :  { %v629_v6 = vadd.f32 1.0, %v3444_v55  ;;  %v3446_v40 = vpop.eup %3445 }
 0x242   :  { %3449 = vrcp.f32 %v623_v56  ;;  %v3448_v57 = vpop.eup %3447  ;;  %v636_v43 = vadd.f32 1.0, %v3446_v40 }
 0x243   :  { %3451 = vrcp.f32 %v629_v6 }
 0x244   :  { %3453 = vrcp.f32 %v636_v43 }
 0x24c   :  { %v3450_v58 = vpop.eup %3449 }
 0x24d   :  { %v3452_v7 = vpop.eup %3451  ;;  %v643_v11 = vmul.f32 %v3450_v58, %v3448_v57 }
 0x24e   :  { %v642_v3 = vmul.f32 %v3452_v7, %v640_v5  ;;  %v3454_v54 = vpop.eup %3453 }
 0x250   :  { %v4186_v47 = vadd.f32 %v643_v11, %v642_v3 }
 0x252   :  { %3455 = vtanh.f32 %v4186_v47 }
 0x25c   :  { %v3456_v59 = vpop.eup %3455 }
 0x25d   :  { %v4189_v44 = vmul.f32 %v3456_v59, %v3454_v54 }
 0x25f   :  { %v647_v46 = vpack.c.bf16 %v4189_v44, %v4189_v44 }
 0x261   :  { %v649_v61 = vrot.slane %v647_v46, 1 }
 0x263   :  { %684 = vmatmul.mubr.bf16.vlgmr.msra.gmra.mrb[8].mxu0 %v649_v61  ;;  %725 = vmatmul.mubr.bf16.vlgmr.msra.gmra.mrb[16].mxu1 %v649_v61 }
 0x264   :  { %781 = vmatpush1.bf16.msra.mxu0 %v3955_v4  ;;  %822 = vmatpush1.bf16.msra.mxu1 %v3989_v16 }
 0x265   :  { %782 = vmatprep.subr.bf16.mxu0 %v3965_v8  ;;  %823 = vmatprep.subr.bf16.mxu1 %v3994_v18 }
 0x266   :  { %812 = vmatprep.mubr.bf16.mxu0 %v3824_v0  ;;  %853 = vmatprep.mubr.bf16.mxu1 %v3824_v0 }
 0x268   :  { %783 = vmatpush1.bf16.msra.mxu0 %v3967_v9  ;;  %824 = vmatpush1.bf16.msra.mxu1 %v4000_v20 }
 0x269   :  { %784 = vmatprep.subr.bf16.mxu0 %v3976_v12  ;;  %825 = vmatprep.subr.bf16.mxu1 %v4008_v22 }
 0x26c   :  { %785 = vmatpush1.bf16.msra.mxu0 %v3979_v13  ;;  %826 = vmatpush1.bf16.msra.mxu1 %v4015_v24 }
 0x26d   :  { %786 = vmatprep.subr.bf16.mxu0 %v3986_v15  ;;  %827 = vmatprep.subr.bf16.mxu1 %v4021_v26 }
 0x270   :  { %787 = vmatpush1.bf16.msra.mxu0 %v3992_v17  ;;  %828 = vmatpush1.bf16.msra.mxu1 %v4025_v28 }
 0x271   :  { %788 = vmatprep.subr.bf16.mxu0 %v3997_v19  ;;  %829 = vmatprep.subr.bf16.mxu1 %v4031_v30 }
 0x274   :  { %789 = vmatpush1.bf16.msra.mxu0 %v4004_v21  ;;  %830 = vmatpush1.bf16.msra.mxu1 %v4037_v32 }
 0x275   :  { %790 = vmatprep.subr.bf16.mxu0 %v4010_v23  ;;  %831 = vmatprep.subr.bf16.mxu1 %v4041_v34 }
 0x278   :  { %791 = vmatpush1.bf16.msra.mxu0 %v4017_v25  ;;  %832 = vmatpush1.bf16.msra.mxu1 %v4047_v35 }
 0x279   :  { %792 = vmatprep.subr.bf16.mxu0 %v4023_v27  ;;  %833 = vmatprep.subr.bf16.mxu1 %v4049_v36 }
 0x27c   :  { %793 = vmatpush1.bf16.msra.mxu0 %v4029_v29  ;;  %834 = vmatpush1.bf16.msra.mxu1 %v4055_v37 }
 0x27d   :  { %794 = vmatprep.subr.bf16.mxu0 %v4033_v31  ;;  %835 = vmatprep.subr.bf16.mxu1 %v4058_v38 }
 0x280   :  { %795 = vmatpush1.bf16.msra.mxu0 %v4039_v33  ;;  %836 = vmatpush1.bf16.msra.mxu1 %v4064_v39 }
 0x281   :  { %909 = vmatprep.subr.bf16.mxu0 %v3950_v2  ;;  %950 = vmatprep.subr.bf16.mxu1 %v3982_v14 }
 0x336   :  { %v685_v45 = vpop.f32.mrb[8].mxu0  ;;  %v726_v10 = vpop.f32.mrb[16].mxu1 }
 0x337   :  { %v737_v55 = vrot.slane %v685_v45, 4  ;;  %v687_v56 = vpop.f32.mrb[9].mxu0  ;;  %v728_v6 = vpop.f32.mrb[17].mxu1  ;;  %v739_v61 = vrot.slane %v726_v10, 4 }
 0x338   :  { %v738_v40 = vrot.slane %v687_v56, 4  ;;  %v689_v57 = vpop.f32.mrb[10].mxu0  ;;  %v730_v58 = vpop.f32.mrb[18].mxu1  ;;  %v740_v59 = vrot.slane %v728_v6, 4  ;;  %v769_v6 = vrot.slane %v4186_v47, 6 }
 0x339   :  { %v745_v5 = vadd.f32 %v737_v55, %v4128_v63  ;;  %v690_v7 = vpop.f32.mrb[11].mxu0  ;;  %v731_v11 = vpop.f32.mrb[19].mxu1  ;;  %v747_v52 = vadd.f32 %v739_v61, %v4134_v49  ;;  %v1407_v61 = vsel %vm1406_vm1, %v4143_v48, %v4189_v44 }
 0x33a   :  { %v746_v43 = vadd.f32 %v738_v40, %v4130_v1  ;;  %v748_v46 = vadd.f32 %v740_v59, %v4136_v51 }
 0x33b   :  { %v3114_v3 = vmul.f32 -1.442695, %v745_v5 }
 0x33c   :  { %v3115_v54 = vmul.f32 -1.442695, %v746_v43  ;;  %v3116_v45 = vmul.f32 -1.442695, %v748_v46 }
 0x33d   :  { %3457 = vpow2.f32 %v3114_v3 }
 0x33e   :  { %3459 = vpow2.f32 %v3115_v54 }
 0x33f   :  { %3461 = vpow2.f32 %v3116_v45 }
 0x340   :  { %3463 = vtanh.f32 %v747_v52 }
 0x347   :  { %v3458_v56 = vpop.eup %3457 }
 0x348   :  { %v3460_v57 = vpop.eup %3459  ;;  %v752_v58 = vadd.f32 1.0, %v3458_v56 }
 0x349   :  { %v758_v55 = vadd.f32 1.0, %v3460_v57  ;;  %v3462_v40 = vpop.eup %3461 }
 0x34a   :  { %3465 = vrcp.f32 %v752_v58  ;;  %v3464_v5 = vpop.eup %3463  ;;  %v765_v3 = vadd.f32 1.0, %v3462_v40 }
 0x34b   :  { %3467 = vrcp.f32 %v758_v55 }
 0x34c   :  { %3469 = vrcp.f32 %v765_v3 }
 0x354   :  { %v3466_v7 = vpop.eup %3465 }
 0x355   :  { %v3468_v11 = vpop.eup %3467  ;;  %v772_v43 = vmul.f32 %v3466_v7, %v3464_v5 }
 0x356   :  { %v771_v10 = vmul.f32 %v3468_v11, %v769_v6  ;;  %v3470_v59 = vpop.eup %3469 }
 0x358   :  { %v4232_v54 = vadd.f32 %v772_v43, %v771_v10 }
 0x35a   :  { %3471 = vtanh.f32 %v4232_v54 }
 0x364   :  { %v3472_v52 = vpop.eup %3471 }
 0x365   :  { %v775_v46 = vmul.f32 %v3472_v52, %v3470_v59  ;;  %v898_v52 = vrot.slane %v4232_v54, 6  ;;  %v4287_v54 = vld [vmem:[#allocation2] ss:$16 sps:$4 sm:$0xff]  }
 0x367   :  { %v776_v45 = vpack.c.bf16 %v775_v46, %v775_v46  ;;  %v4239_v47 = vsel %vm1408_vm2, %v1407_v61, %v775_v46 }
 0x369   :  { %v778_v56 = vrot.slane %v776_v45, 2 }
 0x36b   :  { %813 = vmatmul.mubr.bf16.vlgmr.msra.gmra.mrb[12].mxu0 %v778_v56  ;;  %854 = vmatmul.mubr.bf16.vlgmr.msra.gmra.mrb[20].mxu1 %v778_v56 }
 0x36c   :  { %910 = vmatpush1.bf16.msra.mxu0 %v3955_v4  ;;  %951 = vmatpush1.bf16.msra.mxu1 %v3989_v16 }
 0x36d   :  { %911 = vmatprep.subr.bf16.mxu0 %v3965_v8  ;;  %952 = vmatprep.subr.bf16.mxu1 %v3994_v18 }
 0x36e   :  { %941 = vmatprep.mubr.bf16.mxu0 %v3824_v0  ;;  %982 = vmatprep.mubr.bf16.mxu1 %v3824_v0 }
 0x370   :  { %912 = vmatpush1.bf16.msra.mxu0 %v3967_v9  ;;  %953 = vmatpush1.bf16.msra.mxu1 %v4000_v20 }
 0x371   :  { %913 = vmatprep.subr.bf16.mxu0 %v3976_v12  ;;  %954 = vmatprep.subr.bf16.mxu1 %v4008_v22 }
 0x374   :  { %914 = vmatpush1.bf16.msra.mxu0 %v3979_v13  ;;  %955 = vmatpush1.bf16.msra.mxu1 %v4015_v24 }
 0x375   :  { %915 = vmatprep.subr.bf16.mxu0 %v3986_v15  ;;  %956 = vmatprep.subr.bf16.mxu1 %v4021_v26 }
 0x378   :  { %916 = vmatpush1.bf16.msra.mxu0 %v3992_v17  ;;  %957 = vmatpush1.bf16.msra.mxu1 %v4025_v28 }
 0x379   :  { %917 = vmatprep.subr.bf16.mxu0 %v3997_v19  ;;  %958 = vmatprep.subr.bf16.mxu1 %v4031_v30 }
 0x37c   :  { %918 = vmatpush1.bf16.msra.mxu0 %v4004_v21  ;;  %959 = vmatpush1.bf16.msra.mxu1 %v4037_v32 }
 0x37d   :  { %919 = vmatprep.subr.bf16.mxu0 %v4010_v23  ;;  %960 = vmatprep.subr.bf16.mxu1 %v4041_v34 }
 0x380   :  { %920 = vmatpush1.bf16.msra.mxu0 %v4017_v25  ;;  %961 = vmatpush1.bf16.msra.mxu1 %v4047_v35 }
 0x381   :  { %921 = vmatprep.subr.bf16.mxu0 %v4023_v27  ;;  %962 = vmatprep.subr.bf16.mxu1 %v4049_v36 }
 0x384   :  { %922 = vmatpush1.bf16.msra.mxu0 %v4029_v29  ;;  %963 = vmatpush1.bf16.msra.mxu1 %v4055_v37 }
 0x385   :  { %923 = vmatprep.subr.bf16.mxu0 %v4033_v31  ;;  %964 = vmatprep.subr.bf16.mxu1 %v4058_v38 }
 0x388   :  { %924 = vmatpush1.bf16.msra.mxu0 %v4039_v33  ;;  %965 = vmatpush1.bf16.msra.mxu1 %v4064_v39 }
 0x389   :  { %1023 = vmatprep.subr.bf16.mxu0 %v3950_v2  ;;  %1064 = vmatprep.subr.bf16.mxu1 %v3982_v14 }
 0x43e   :  { %v814_v4 = vpop.f32.mrb[12].mxu0  ;;  %v855_v8 = vpop.f32.mrb[20].mxu1 }
 0x43f   :  { %v866_v9 = vrot.slane %v814_v4, 2  ;;  %v816_v12 = vpop.f32.mrb[13].mxu0  ;;  %v857_v13 = vpop.f32.mrb[21].mxu1  ;;  %v868_v14 = vrot.slane %v855_v8, 2 }
 0x440   :  { %v867_v15 = vrot.slane %v816_v12, 2  ;;  %v818_v17 = vpop.f32.mrb[14].mxu0  ;;  %v859_v19 = vpop.f32.mrb[22].mxu1  ;;  %v869_v5 = vrot.slane %v857_v13, 2 }
 0x441   :  { %v874_v48 = vadd.f32 %v866_v9, %v4128_v63  ;;  %v819_v44 = vpop.f32.mrb[15].mxu0  ;;  %v860_v57 = vpop.f32.mrb[23].mxu1  ;;  %v876_v6 = vadd.f32 %v868_v14, %v4134_v49  ;;  %v4301_v17 = vld [vmem:[#allocation2 + $0x44] ss:$16 sps:$4 sm:$0xff]   ;;  %v4313_v19 = vld [vmem:[#allocation2 + $0x60] ss:$16 sps:$4 sm:$0xff]  }
 0x442   :  { %v875_v58 = vadd.f32 %v867_v15, %v4130_v1  ;;  %v877_v2 = vadd.f32 %v869_v5, %v4136_v51  ;;  %v4291_v15 = vld [vmem:[#allocation2 + $0x24] ss:$16 sps:$4 sm:$0xff]  }
 0x443   :  { %v3117_v55 = vmul.f32 -1.442695, %v874_v48 }
 0x444   :  { %v3118_v40 = vmul.f32 -1.442695, %v875_v58  ;;  %v3119_v7 = vmul.f32 -1.442695, %v877_v2 }
 0x445   :  { %3473 = vpow2.f32 %v3117_v55 }
 0x446   :  { %3475 = vpow2.f32 %v3118_v40 }
 0x447   :  { %3477 = vpow2.f32 %v3119_v7 }
 0x448   :  { %3479 = vtanh.f32 %v876_v6 }
 0x44f   :  { %v3474_v11 = vpop.eup %3473 }
 0x450   :  { %v3476_v43 = vpop.eup %3475  ;;  %v881_v3 = vadd.f32 1.0, %v3474_v11 }
 0x451   :  { %v887_v63 = vadd.f32 1.0, %v3476_v43  ;;  %v3478_v1 = vpop.eup %3477 }
 0x452   :  { %3481 = vrcp.f32 %v881_v3  ;;  %v3480_v10 = vpop.eup %3479  ;;  %v894_v51 = vadd.f32 1.0, %v3478_v1 }
 0x453   :  { %3483 = vrcp.f32 %v887_v63 }
 0x454   :  { %3485 = vrcp.f32 %v894_v51  ;;  %v4376_v51 = vld [vmem:[#allocation2 + $0x6c] ss:$16 sps:$4 sm:$0xff]  }
 0x45c   :  { %v3482_v59 = vpop.eup %3481 }
 0x45d   :  { %v3484_v46 = vpop.eup %3483  ;;  %v901_v61 = vmul.f32 %v3482_v59, %v3480_v10  ;;  %v4354_v10 = vld [vmem:[#allocation2 + $0x8] ss:$16 sps:$4 sm:$0xff]   ;;  %v4358_v59 = vld [vmem:[#allocation2 + $0x2c] ss:$16 sps:$4 sm:$0xff]  }
 0x45e   :  { %v900_v45 = vmul.f32 %v3484_v46, %v898_v52  ;;  %v3486_v49 = vpop.eup %3485  ;;  %v4364_v52 = vld [vmem:[#allocation2 + $0x28] ss:$16 sps:$4 sm:$0xff]   ;;  %v4368_v46 = vld [vmem:[#allocation2 + $0x4c] ss:$16 sps:$4 sm:$0xff]  }
 0x460   :  { %v4280_v56 = vadd.f32 %v901_v61, %v900_v45  ;;  %v4372_v61 = vld [vmem:[#allocation2 + $0x48] ss:$16 sps:$4 sm:$0xff]  }
 0x461   :  { %v4380_v45 = vld [vmem:[#allocation2 + $0x68] ss:$16 sps:$4 sm:$0xff]  }
 0x462   :  { %3487 = vtanh.f32 %v4280_v56  ;;  %v1015_v5 = vrot.slane %v4280_v56, 6  ;;  %v4384_v56 = vld [vmem:[#allocation2 + $0x8c] ss:$16 sps:$4 sm:$0xff]  }
 0x46c   :  { %v3488_v4 = vpop.eup %3487 }
 0x46d   :  { %v904_v8 = vmul.f32 %v3488_v4, %v3486_v49  ;;  %v4387_v49 = vld [vmem:[#allocation2 + $0x80] ss:$16 sps:$4 sm:$0xff]   ;;  %v4390_v4 = vld [vmem:[#allocation2 + $0x88] ss:$16 sps:$4 sm:$0xff]  }
 0x46f   :  { %v905_v9 = vpack.c.bf16 %v904_v8, %v904_v8  ;;  %v4285_v12 = vsel %vm1410_vm3, %v4239_v47, %v904_v8  ;;  %v4297_v47 = vld [vmem:[#allocation2 + $0x20] ss:$16 sps:$4 sm:$0xff]   ;;  %v4393_v8 = vld [vmem:[#allocation2 + $0xa4] ss:$16 sps:$4 sm:$0xff]  }
 0x471   :  { %v907_v13 = vrot.slane %v905_v9, 3  ;;  %v4396_v9 = vld [vmem:[#allocation2 + $0xac] ss:$16 sps:$4 sm:$0xff]  }
 0x473   :  { %942 = vmatmul.mubr.bf16.vlgmr.msra.gmra.mrb[16].mxu0 %v907_v13  ;;  %983 = vmatmul.mubr.bf16.vlgmr.msra.gmra.mrb[24].mxu1 %v907_v13  ;;  %v4399_v13 = vld [vmem:[#allocation2 + $0xa0] ss:$16 sps:$4 sm:$0xff]  }
 0x474   :  { %1024 = vmatpush1.bf16.msra.mxu0 %v4287_v54  ;;  %1065 = vmatpush1.bf16.msra.mxu1 %v3989_v16  ;;  %v4305_v16 = vld [vmem:[#allocation2 + $0x40] ss:$16 sps:$4 sm:$0xff]  }
 0x475   :  { %1025 = vmatprep.subr.bf16.mxu0 %v4291_v15  ;;  %1066 = vmatprep.subr.bf16.mxu1 %v3994_v18  ;;  %v4309_v18 = vld [vmem:[#allocation2 + $0x64] ss:$16 sps:$4 sm:$0xff]  }
 0x476   :  { %1055 = vmatprep.mubr.bf16.mxu0 %v3824_v0  ;;  %1096 = vmatprep.mubr.bf16.mxu1 %v3824_v0 }
 0x478   :  { %1026 = vmatpush1.bf16.msra.mxu0 %v4297_v47  ;;  %1067 = vmatpush1.bf16.msra.mxu1 %v4000_v20  ;;  %v4317_v20 = vld [vmem:[#allocation2 + $0x84] ss:$16 sps:$4 sm:$0xff]  }
 0x479   :  { %1027 = vmatprep.subr.bf16.mxu0 %v4301_v17  ;;  %1068 = vmatprep.subr.bf16.mxu1 %v4008_v22  ;;  %v4338_v22 = vld [vmem:[#allocation2 + $0xc] ss:$16 sps:$4 sm:$0xff]  }
 0x47c   :  { %1028 = vmatpush1.bf16.msra.mxu0 %v4305_v16  ;;  %1069 = vmatpush1.bf16.msra.mxu1 %v4015_v24 }
 0x47d   :  { %1029 = vmatprep.subr.bf16.mxu0 %v4309_v18  ;;  %1070 = vmatprep.subr.bf16.mxu1 %v4021_v26 }
 0x480   :  { %1030 = vmatpush1.bf16.msra.mxu0 %v4313_v19  ;;  %1071 = vmatpush1.bf16.msra.mxu1 %v4025_v28 }
 0x481   :  { %1031 = vmatprep.subr.bf16.mxu0 %v4317_v20  ;;  %1072 = vmatprep.subr.bf16.mxu1 %v4031_v30 }
 0x484   :  { %1032 = vmatpush1.bf16.msra.mxu0 %v4004_v21  ;;  %1073 = vmatpush1.bf16.msra.mxu1 %v4037_v32  ;;  %v4335_v21 = vld [vmem:[#allocation2 + $0x4] ss:$16 sps:$4 sm:$0xff]  }
 0x485   :  { %1033 = vmatprep.subr.bf16.mxu0 %v4010_v23  ;;  %1074 = vmatprep.subr.bf16.mxu1 %v4041_v34 }
 0x488   :  { %1034 = vmatpush1.bf16.msra.mxu0 %v4017_v25  ;;  %1075 = vmatpush1.bf16.msra.mxu1 %v4047_v35 }
 0x489   :  { %1035 = vmatprep.subr.bf16.mxu0 %v4023_v27  ;;  %1076 = vmatprep.subr.bf16.mxu1 %v4049_v36 }
 0x48c   :  { %1036 = vmatpush1.bf16.msra.mxu0 %v4029_v29  ;;  %1077 = vmatpush1.bf16.msra.mxu1 %v4055_v37 }
 0x48d   :  { %1037 = vmatprep.subr.bf16.mxu0 %v4033_v31  ;;  %1078 = vmatprep.subr.bf16.mxu1 %v4058_v38 }
 0x490   :  { %1038 = vmatpush1.bf16.msra.mxu0 %v4039_v33  ;;  %1079 = vmatpush1.bf16.msra.mxu1 %v4064_v39 }
 0x491   :  { %1152 = vmatprep.subr.bf16.mxu0 %v4335_v21  ;;  %1193 = vmatprep.subr.bf16.mxu1 %v4338_v22 }
 0x546   :  { %v943_v23 = vpop.f32.mrb[16].mxu0  ;;  %v984_v24 = vpop.f32.mrb[24].mxu1 }
 0x547   :  { %v991_v25 = vadd.f32 %v943_v23, %v4114_v50  ;;  %v945_v26 = vpop.f32.mrb[17].mxu0  ;;  %v986_v27 = vpop.f32.mrb[25].mxu1  ;;  %v993_v37 = vadd.f32 %v984_v24, %v4124_v60  ;;  %v4402_v23 = vld [vmem:[#allocation2 + $0xa8] ss:$16 sps:$4 sm:$0xff]   ;;  %v4405_v24 = vld [vmem:[#allocation2 + $0xc4] ss:$16 sps:$4 sm:$0xff]  }
 0x548   :  { %v992_v28 = vadd.f32 %v945_v26, %v4117_v53  ;;  %v947_v29 = vpop.f32.mrb[18].mxu0  ;;  %v988_v30 = vpop.f32.mrb[26].mxu1  ;;  %v994_v35 = vadd.f32 %v986_v27, %v4126_v62  ;;  %v4411_v26 = vld [vmem:[#allocation2 + $0xc0] ss:$16 sps:$4 sm:$0xff]   ;;  %v4414_v27 = vld [vmem:[#allocation2 + $0xc8] ss:$16 sps:$4 sm:$0xff]  }
 0x549   :  { %v3120_v31 = vmul.f32 -1.442695, %v991_v25  ;;  %v948_v32 = vpop.f32.mrb[19].mxu0  ;;  %v989_v33 = vpop.f32.mrb[27].mxu1  ;;  %v4408_v25 = vld [vmem:[#allocation2 + $0xcc] ss:$16 sps:$4 sm:$0xff]  }
 0x54a   :  { %v3121_v34 = vmul.f32 -1.442695, %v992_v28  ;;  %v3122_v36 = vmul.f32 -1.442695, %v994_v35  ;;  %v4417_v28 = vld [vmem:[#allocation2 + $0xe4] ss:$16 sps:$4 sm:$0xff]  }
 0x54b   :  { %3489 = vpow2.f32 %v3120_v31  ;;  %v4420_v29 = vld [vmem:[#allocation2 + $0xec] ss:$16 sps:$4 sm:$0xff]   ;;  %v4423_v30 = vld [vmem:[#allocation2 + $0xe0] ss:$16 sps:$4 sm:$0xff]  }
 0x54c   :  { %3491 = vpow2.f32 %v3121_v34 }
 0x54d   :  { %3493 = vpow2.f32 %v3122_v36 }
 0x54e   :  { %3495 = vtanh.f32 %v993_v37 }
 0x555   :  { %v3490_v38 = vpop.eup %3489 }
 0x556   :  { %v3492_v48 = vpop.eup %3491  ;;  %v998_v44 = vadd.f32 1.0, %v3490_v38 }
 0x557   :  { %v1004_v57 = vadd.f32 1.0, %v3492_v48  ;;  %v3494_v58 = vpop.eup %3493 }
 0x558   :  { %3497 = vrcp.f32 %v998_v44  ;;  %v3496_v55 = vpop.eup %3495  ;;  %v1011_v7 = vadd.f32 1.0, %v3494_v58 }
 0x559   :  { %3499 = vrcp.f32 %v1004_v57 }
 0x55a   :  { %3501 = vrcp.f32 %v1011_v7 }
 0x562   :  { %v3498_v40 = vpop.eup %3497 }
 0x563   :  { %v3500_v2 = vpop.eup %3499  ;;  %v1018_v14 = vmul.f32 %v3498_v40, %v3496_v55 }
 0x564   :  { %v1017_v6 = vmul.f32 %v3500_v2, %v1015_v5  ;;  %v3502_v43 = vpop.eup %3501 }
 0x566   :  { %v4346_v11 = vadd.f32 %v1018_v14, %v1017_v6 }
 0x568   :  { %3503 = vtanh.f32 %v4346_v11 }
 0x572   :  { %v3504_v3 = vpop.eup %3503 }
 0x573   :  { %v4349_v63 = vmul.f32 %v3504_v3, %v3502_v43 }
 0x575   :  { %v1022_v1 = vpack.c.bf16 %v4349_v63, %v4349_v63 }
 0x577   :  { %1056 = vmatmul.mubr.bf16.vlgmr.msra.gmra.mrb[20].mxu0 %v1022_v1  ;;  %1097 = vmatmul.mubr.bf16.vlgmr.msra.gmra.mrb[28].mxu1 %v1022_v1 }
 0x578   :  { %1153 = vmatpush1.bf16.msra.mxu0 %v4287_v54  ;;  %1194 = vmatpush1.bf16.msra.mxu1 %v4354_v10 }
 0x579   :  { %1154 = vmatprep.subr.bf16.mxu0 %v4291_v15  ;;  %1195 = vmatprep.subr.bf16.mxu1 %v4358_v59 }
 0x57a   :  { %1184 = vmatprep.mubr.bf16.mxu0 %v3824_v0  ;;  %1225 = vmatprep.mubr.bf16.mxu1 %v3824_v0 }
 0x57c   :  { %1155 = vmatpush1.bf16.msra.mxu0 %v4297_v47  ;;  %1196 = vmatpush1.bf16.msra.mxu1 %v4364_v52 }
 0x57d   :  { %1156 = vmatprep.subr.bf16.mxu0 %v4301_v17  ;;  %1197 = vmatprep.subr.bf16.mxu1 %v4368_v46 }
 0x580   :  { %1157 = vmatpush1.bf16.msra.mxu0 %v4305_v16  ;;  %1198 = vmatpush1.bf16.msra.mxu1 %v4372_v61 }
 0x581   :  { %1158 = vmatprep.subr.bf16.mxu0 %v4309_v18  ;;  %1199 = vmatprep.subr.bf16.mxu1 %v4376_v51 }
 0x584   :  { %1159 = vmatpush1.bf16.msra.mxu0 %v4313_v19  ;;  %1200 = vmatpush1.bf16.msra.mxu1 %v4380_v45 }
 0x585   :  { %1160 = vmatprep.subr.bf16.mxu0 %v4317_v20  ;;  %1201 = vmatprep.subr.bf16.mxu1 %v4384_v56 }
 0x588   :  { %1161 = vmatpush1.bf16.msra.mxu0 %v4387_v49  ;;  %1202 = vmatpush1.bf16.msra.mxu1 %v4390_v4 }
 0x589   :  { %1162 = vmatprep.subr.bf16.mxu0 %v4393_v8  ;;  %1203 = vmatprep.subr.bf16.mxu1 %v4396_v9 }
 0x58c   :  { %1163 = vmatpush1.bf16.msra.mxu0 %v4399_v13  ;;  %1204 = vmatpush1.bf16.msra.mxu1 %v4402_v23 }
 0x58d   :  { %1164 = vmatprep.subr.bf16.mxu0 %v4405_v24  ;;  %1205 = vmatprep.subr.bf16.mxu1 %v4408_v25 }
 0x590   :  { %1165 = vmatpush1.bf16.msra.mxu0 %v4411_v26  ;;  %1206 = vmatpush1.bf16.msra.mxu1 %v4414_v27 }
 0x591   :  { %1166 = vmatprep.subr.bf16.mxu0 %v4417_v28  ;;  %1207 = vmatprep.subr.bf16.mxu1 %v4420_v29 }
 0x594   :  { %1167 = vmatpush1.bf16.msra.mxu0 %v4423_v30  ;;  %1208 = vmatpush1.bf16.msra.mxu1 %v4064_v39 }
 0x595   :  { %1281 = vmatprep.subr.bf16.mxu0 %v4335_v21  ;;  %1322 = vmatprep.subr.bf16.mxu1 %v4338_v22 }
 0x64a   :  { %v1057_v31 = vpop.f32.mrb[20].mxu0  ;;  %v1098_v32 = vpop.f32.mrb[28].mxu1 }
 0x64b   :  { %v1109_v33 = vrot.slane %v1057_v31, 6  ;;  %v1059_v34 = vpop.f32.mrb[21].mxu0  ;;  %v1100_v35 = vpop.f32.mrb[29].mxu1  ;;  %v1111_v22 = vrot.slane %v1098_v32, 6 }
 0x64c   :  { %v1110_v36 = vrot.slane %v1059_v34, 6  ;;  %v1061_v37 = vpop.f32.mrb[22].mxu0  ;;  %v1102_v38 = vpop.f32.mrb[30].mxu1  ;;  %v1112_v40 = vrot.slane %v1100_v35, 6 }
 0x64d   :  { %v1117_v48 = vadd.f32 %v1109_v33, %v4114_v50  ;;  %v1062_v44 = vpop.f32.mrb[23].mxu0  ;;  %v1103_v57 = vpop.f32.mrb[31].mxu1  ;;  %v1119_v2 = vadd.f32 %v1111_v22, %v4124_v60  ;;  %v1141_v33 = vrot.slane %v4346_v11, 6 }
 0x64e   :  { %v1118_v58 = vadd.f32 %v1110_v36, %v4117_v53  ;;  %v1120_v21 = vadd.f32 %v1112_v40, %v4126_v62 }
 0x64f   :  { %v3123_v55 = vmul.f32 -1.442695, %v1117_v48 }
 0x650   :  { %v3124_v39 = vmul.f32 -1.442695, %v1118_v58  ;;  %v3125_v5 = vmul.f32 -1.442695, %v1120_v21 }
 0x651   :  { %3505 = vpow2.f32 %v3123_v55 }
 0x652   :  { %3507 = vpow2.f32 %v3124_v39 }
 0x653   :  { %3509 = vpow2.f32 %v3125_v5 }
 0x654   :  { %3511 = vtanh.f32 %v1119_v2 }
 0x65b   :  { %v3506_v14 = vpop.eup %3505 }
 0x65c   :  { %v3508_v7 = vpop.eup %3507  ;;  %v1124_v6 = vadd.f32 1.0, %v3506_v14 }
 0x65d   :  { %v1130_v43 = vadd.f32 1.0, %v3508_v7  ;;  %v3510_v3 = vpop.eup %3509 }
 0x65e   :  { %3513 = vrcp.f32 %v1124_v6  ;;  %v3512_v1 = vpop.eup %3511  ;;  %v1137_v36 = vadd.f32 1.0, %v3510_v3  ;;  %v3326_v3 = vld [vmem:[#allocation4 + $0xc] ss:$16 sps:$4 sm:$0xff]  }
 0x65f   :  { %3515 = vrcp.f32 %v1130_v43  ;;  %v3323_v43 = vld [vmem:[#allocation4 + $0x4] ss:$16 sps:$4 sm:$0xff]  }
 0x660   :  { %3517 = vrcp.f32 %v1137_v36  ;;  %v3335_v36 = vld [vmem:[#allocation4 + $0x44] ss:$16 sps:$4 sm:$0xff]  }
 0x668   :  { %v3514_v31 = vpop.eup %3513 }
 0x669   :  { %v3516_v34 = vpop.eup %3515  ;;  %v1144_v35 = vmul.f32 %v3514_v31, %v3512_v1  ;;  %v3321_v1 = vld [vmem:[#allocation4] ss:$16 sps:$4 sm:$0xff]   ;;  %v3324_v31 = vld [vmem:[#allocation4 + $0x8] ss:$16 sps:$4 sm:$0xff]  }
 0x66a   :  { %v1143_v32 = vmul.f32 %v3516_v34, %v1141_v33  ;;  %v3518_v38 = vpop.eup %3517  ;;  %v3332_v33 = vld [vmem:[#allocation4 + $0x2c] ss:$16 sps:$4 sm:$0xff]   ;;  %v3327_v34 = vld [vmem:[#allocation4 + $0x20] ss:$16 sps:$4 sm:$0xff]  }
 0x66c   :  { %v4434_v37 = vadd.f32 %v1144_v35, %v1143_v32  ;;  %v3330_v35 = vld [vmem:[#allocation4 + $0x28] ss:$16 sps:$4 sm:$0xff]   ;;  %v3338_v32 = vld [vmem:[#allocation4 + $0x4c] ss:$16 sps:$4 sm:$0xff]  }
 0x66e   :  { %3519 = vtanh.f32 %v4434_v37 }
 0x678   :  { %v3520_v48 = vpop.eup %3519 }
 0x679   :  { %v4437_v44 = vmul.f32 %v3520_v48, %v3518_v38  ;;  %v3336_v38 = vld [vmem:[#allocation4 + $0x48] ss:$16 sps:$4 sm:$0xff]   ;;  %v3341_v48 = vld [vmem:[#allocation4 + $0x64] ss:$16 sps:$4 sm:$0xff]  }
 0x67b   :  { %v1148_v57 = vpack.c.bf16 %v4437_v44, %v4437_v44  ;;  %v1412_v2 = vsel %vm1406_vm1, %v4349_v63, %v4437_v44  ;;  %v3329_v63 = vld [vmem:[#allocation4 + $0x24] ss:$16 sps:$4 sm:$0xff]   ;;  %v3344_v44 = vld [vmem:[#allocation4 + $0x6c] ss:$16 sps:$4 sm:$0xff]  }
 0x67d   :  { %v1150_v58 = vrot.slane %v1148_v57, 1  ;;  %v3339_v57 = vld [vmem:[#allocation4 + $0x60] ss:$16 sps:$4 sm:$0xff]  }
 0x67f   :  { %1185 = vmatmul.mubr.bf16.vlgmr.msra.gmra.mrb[24].mxu0 %v1150_v58  ;;  %1226 = vmatmul.mubr.bf16.vlgmr.msra.gmra.mrb[32].mxu1 %v1150_v58  ;;  %v3342_v58 = vld [vmem:[#allocation4 + $0x68] ss:$16 sps:$4 sm:$0xff]  }
 0x680   :  { %1282 = vmatpush1.bf16.msra.mxu0 %v4287_v54  ;;  %1323 = vmatpush1.bf16.msra.mxu1 %v4354_v10  ;;  %v3716_v54 = vld [vmem:[#allocation2 + $0xe8] ss:$16 sps:$4 sm:$0xff]  }
 0x681   :  { %1283 = vmatprep.subr.bf16.mxu0 %v4291_v15  ;;  %1324 = vmatprep.subr.bf16.mxu1 %v4358_v59 }
 0x682   :  { %1313 = vmatprep.mubr.bf16.mxu0 %v3824_v0  ;;  %1354 = vmatprep.mubr.bf16.mxu1 %v3824_v0 }
 0x684   :  { %1284 = vmatpush1.bf16.msra.mxu0 %v4297_v47  ;;  %1325 = vmatpush1.bf16.msra.mxu1 %v4364_v52 }
 0x685   :  { %1285 = vmatprep.subr.bf16.mxu0 %v4301_v17  ;;  %1326 = vmatprep.subr.bf16.mxu1 %v4368_v46 }
 0x688   :  { %1286 = vmatpush1.bf16.msra.mxu0 %v4305_v16  ;;  %1327 = vmatpush1.bf16.msra.mxu1 %v4372_v61 }
 0x689   :  { %1287 = vmatprep.subr.bf16.mxu0 %v4309_v18  ;;  %1328 = vmatprep.subr.bf16.mxu1 %v4376_v51 }
 0x68c   :  { %1288 = vmatpush1.bf16.msra.mxu0 %v4313_v19  ;;  %1329 = vmatpush1.bf16.msra.mxu1 %v4380_v45 }
 0x68d   :  { %1289 = vmatprep.subr.bf16.mxu0 %v4317_v20  ;;  %1330 = vmatprep.subr.bf16.mxu1 %v4384_v56 }
 0x690   :  { %1290 = vmatpush1.bf16.msra.mxu0 %v4387_v49  ;;  %1331 = vmatpush1.bf16.msra.mxu1 %v4390_v4 }
 0x691   :  { %1291 = vmatprep.subr.bf16.mxu0 %v4393_v8  ;;  %1332 = vmatprep.subr.bf16.mxu1 %v4396_v9 }
 0x694   :  { %1292 = vmatpush1.bf16.msra.mxu0 %v4399_v13  ;;  %1333 = vmatpush1.bf16.msra.mxu1 %v4402_v23 }
 0x695   :  { %1293 = vmatprep.subr.bf16.mxu0 %v4405_v24  ;;  %1334 = vmatprep.subr.bf16.mxu1 %v4408_v25 }
 0x698   :  { %1294 = vmatpush1.bf16.msra.mxu0 %v4411_v26  ;;  %1335 = vmatpush1.bf16.msra.mxu1 %v4414_v27 }
 0x699   :  { %1295 = vmatprep.subr.bf16.mxu0 %v4417_v28  ;;  %1336 = vmatprep.subr.bf16.mxu1 %v4420_v29  ;;  %v1270_v28 = vrot.slane %v4434_v37, 6  ;;  %v3333_v37 = vld [vmem:[#allocation4 + $0x40] ss:$16 sps:$4 sm:$0xff]  }
 0x69c   :  { %1296 = vmatpush1.bf16.msra.mxu0 %v4423_v30  ;;  %1337 = vmatpush1.bf16.msra.mxu1 %v3716_v54  ;;  %v3345_v54 = vld [vmem:[#allocation4 + $0x80] ss:$16 sps:$4 sm:$0xff]  }
 0x69d   :  { %1630 = vmatprep.subr.bf16.mxu0 %v3323_v43  ;;  %1673 = vmatprep.subr.bf16.mxu1 %v3326_v3 }
 0x752   :  { %v1186_v15 = vpop.f32.mrb[24].mxu0  ;;  %v1227_v47 = vpop.f32.mrb[32].mxu1 }
 0x753   :  { %v1238_v17 = vrot.slane %v1186_v15, 4  ;;  %v1188_v16 = vpop.f32.mrb[25].mxu0  ;;  %v1229_v18 = vpop.f32.mrb[33].mxu1  ;;  %v1240_v49 = vrot.slane %v1227_v47, 4  ;;  %v3347_v15 = vld [vmem:[#allocation4 + $0x84] ss:$16 sps:$4 sm:$0xff]  }
 0x754   :  { %v1239_v19 = vrot.slane %v1188_v16, 4  ;;  %v1190_v20 = vpop.f32.mrb[26].mxu0  ;;  %v1231_v11 = vpop.f32.mrb[34].mxu1  ;;  %v1241_v45 = vrot.slane %v1229_v18, 4  ;;  %v3348_v47 = vld [vmem:[#allocation4 + $0x88] ss:$16 sps:$4 sm:$0xff]  }
 0x755   :  { %v1246_v10 = vadd.f32 %v1238_v17, %v4114_v50  ;;  %v1191_v59 = vpop.f32.mrb[27].mxu0  ;;  %v1232_v52 = vpop.f32.mrb[35].mxu1  ;;  %v1248_v8 = vadd.f32 %v1240_v49, %v4124_v60  ;;  %v3350_v17 = vld [vmem:[#allocation4 + $0x8c] ss:$16 sps:$4 sm:$0xff]   ;;  %v3353_v16 = vld [vmem:[#allocation4 + $0xa4] ss:$16 sps:$4 sm:$0xff]  }
 0x756   :  { %v1247_v46 = vadd.f32 %v1239_v19, %v4117_v53  ;;  %v1249_v56 = vadd.f32 %v1241_v45, %v4126_v62  ;;  %v3356_v18 = vld [vmem:[#allocation4 + $0xac] ss:$16 sps:$4 sm:$0xff]   ;;  %v3351_v19 = vld [vmem:[#allocation4 + $0xa0] ss:$16 sps:$4 sm:$0xff]   ;;  %v3354_v20 = vld [vmem:[#allocation4 + $0xa8] ss:$16 sps:$4 sm:$0xff]  }
 0x757   :  { %v3126_v61 = vmul.f32 -1.442695, %v1246_v10  ;;  %v3359_v11 = vld [vmem:[#allocation4 + $0xc4] ss:$16 sps:$4 sm:$0xff]   ;;  %v3362_v10 = vld [vmem:[#allocation4 + $0xcc] ss:$16 sps:$4 sm:$0xff]  }
 0x758   :  { %v3127_v51 = vmul.f32 -1.442695, %v1247_v46  ;;  %v3128_v4 = vmul.f32 -1.442695, %v1249_v56  ;;  %v3357_v59 = vld [vmem:[#allocation4 + $0xc0] ss:$16 sps:$4 sm:$0xff]  }
 0x759   :  { %3521 = vpow2.f32 %v3126_v61  ;;  %v3360_v52 = vld [vmem:[#allocation4 + $0xc8] ss:$16 sps:$4 sm:$0xff]   ;;  %v3365_v46 = vld [vmem:[#allocation4 + $0xe4] ss:$16 sps:$4 sm:$0xff]   ;;  %v3368_v61 = vld [vmem:[#allocation4 + $0xec] ss:$16 sps:$4 sm:$0xff]  }
 0x75a   :  { %3523 = vpow2.f32 %v3127_v51  ;;  %v3363_v51 = vld [vmem:[#allocation4 + $0xe0] ss:$16 sps:$4 sm:$0xff]   ;;  %v3366_v45 = vld [vmem:[#allocation4 + $0xe8] ss:$16 sps:$4 sm:$0xff]   ;;  %v4488_v56 = vld [vmem:[#allocation6 + $0x4] ss:$16 sps:$4 sm:$0xff]  }
 0x75b   :  { %3525 = vpow2.f32 %v3128_v4  ;;  %v4490_v49 = vld [vmem:[#allocation6 + $0xc] ss:$16 sps:$4 sm:$0xff]  }
 0x75c   :  { %3527 = vtanh.f32 %v1248_v8 }
 0x763   :  { %v3522_v9 = vpop.eup %3521 }
 0x764   :  { %v3524_v13 = vpop.eup %3523  ;;  %v1253_v23 = vadd.f32 1.0, %v3522_v9 }
 0x765   :  { %v1259_v24 = vadd.f32 1.0, %v3524_v13  ;;  %v3526_v25 = vpop.eup %3525 }
 0x766   :  { %3529 = vrcp.f32 %v1253_v23  ;;  %v3528_v26 = vpop.eup %3527  ;;  %v1266_v55 = vadd.f32 1.0, %v3526_v25 }
 0x767   :  { %3531 = vrcp.f32 %v1259_v24 }
 0x768   :  { %3533 = vrcp.f32 %v1266_v55 }
 0x770   :  { %v3530_v27 = vpop.eup %3529 }
 0x771   :  { %v3532_v29 = vpop.eup %3531  ;;  %v1273_v30 = vmul.f32 %v3530_v27, %v3528_v26 }
 0x772   :  { %v1272_v39 = vmul.f32 %v3532_v29, %v1270_v28  ;;  %v3534_v21 = vpop.eup %3533 }
 0x774   :  { %v4477_v40 = vadd.f32 %v1273_v30, %v1272_v39 }
 0x776   :  { %3535 = vtanh.f32 %v4477_v40 }
 0x780   :  { %v3536_v22 = vpop.eup %3535 }
 0x781   :  { %v1276_v5 = vmul.f32 %v3536_v22, %v3534_v21 }
 0x783   :  { %v1277_v14 = vpack.c.bf16 %v1276_v5, %v1276_v5  ;;  %v4484_v7 = vsel %vm1408_vm2, %v1412_v2, %v1276_v5 }
 0x785   :  { %v1279_v6 = vrot.slane %v1277_v14, 2 }
 0x787   :  { %1314 = vmatmul.mubr.bf16.vlgmr.msra.gmra.mrb[28].mxu0 %v1279_v6  ;;  %1355 = vmatmul.mubr.bf16.vlgmr.msra.gmra.mrb[36].mxu1 %v1279_v6 }
 0x788   :  { %1662 = vmatprep.mubr.bf16.mxu0 %v3824_v0  ;;  %1705 = vmatprep.mubr.bf16.mxu1 %v3824_v0 }
 0x789   :  { %1631 = vmatpush1.bf16.msra.mxu0 %v3321_v1  ;;  %1674 = vmatpush1.bf16.msra.mxu1 %v3324_v31 }
 0x78a   :  { %1632 = vmatprep.subr.bf16.mxu0 %v3329_v63  ;;  %1675 = vmatprep.subr.bf16.mxu1 %v3332_v33  ;;  %v1399_v63 = vrot.slane %v4477_v40, 6  ;;  %v4506_v40 = vld [vmem:[#allocation6 + $0x24] ss:$16 sps:$4 sm:$0xff]  }
 0x78d   :  { %1633 = vmatpush1.bf16.msra.mxu0 %v3327_v34  ;;  %1676 = vmatpush1.bf16.msra.mxu1 %v3330_v35 }
 0x78e   :  { %1634 = vmatprep.subr.bf16.mxu0 %v3335_v36  ;;  %1677 = vmatprep.subr.bf16.mxu1 %v3338_v32 }
 0x791   :  { %1635 = vmatpush1.bf16.msra.mxu0 %v3333_v37  ;;  %1678 = vmatpush1.bf16.msra.mxu1 %v3336_v38 }
 0x792   :  { %1636 = vmatprep.subr.bf16.mxu0 %v3341_v48  ;;  %1679 = vmatprep.subr.bf16.mxu1 %v3344_v44  ;;  %v4501_v48 = vld [vmem:[#allocation6] ss:$16 sps:$4 sm:$0xff]   ;;  %v4503_v44 = vld [vmem:[#allocation6 + $0x8] ss:$16 sps:$4 sm:$0xff]  }
 0x795   :  { %1637 = vmatpush1.bf16.msra.mxu0 %v3339_v57  ;;  %1680 = vmatpush1.bf16.msra.mxu1 %v3342_v58  ;;  %v4508_v58 = vld [vmem:[#allocation6 + $0x2c] ss:$16 sps:$4 sm:$0xff]  }
 0x796   :  { %1638 = vmatprep.subr.bf16.mxu0 %v3347_v15  ;;  %1681 = vmatprep.subr.bf16.mxu1 %v3350_v17  ;;  %v4514_v15 = vld [vmem:[#allocation6 + $0x28] ss:$16 sps:$4 sm:$0xff]  }
 0x797   :  { %v4528_v17 = vld [vmem:[#allocation6 + $0x48] ss:$16 sps:$4 sm:$0xff]  }
 0x799   :  { %1639 = vmatpush1.bf16.msra.mxu0 %v3345_v54  ;;  %1682 = vmatpush1.bf16.msra.mxu1 %v3348_v47  ;;  %v4512_v54 = vld [vmem:[#allocation6 + $0x20] ss:$16 sps:$4 sm:$0xff]  }
 0x79a   :  { %1640 = vmatprep.subr.bf16.mxu0 %v3353_v16  ;;  %1683 = vmatprep.subr.bf16.mxu1 %v3356_v18  ;;  %v4526_v47 = vld [vmem:[#allocation6 + $0x40] ss:$16 sps:$4 sm:$0xff]   ;;  %v4532_v16 = vld [vmem:[#allocation6 + $0x64] ss:$16 sps:$4 sm:$0xff]   ;;  %v4534_v18 = vld [vmem:[#allocation6 + $0x6c] ss:$16 sps:$4 sm:$0xff]  }
 0x79d   :  { %1641 = vmatpush1.bf16.msra.mxu0 %v3351_v19  ;;  %1684 = vmatpush1.bf16.msra.mxu1 %v3354_v20  ;;  %v4538_v19 = vld [vmem:[#allocation6 + $0x60] ss:$16 sps:$4 sm:$0xff]   ;;  %v4540_v20 = vld [vmem:[#allocation6 + $0x68] ss:$16 sps:$4 sm:$0xff]  }
 0x79e   :  { %1642 = vmatprep.subr.bf16.mxu0 %v3359_v11  ;;  %1685 = vmatprep.subr.bf16.mxu1 %v3362_v10  ;;  %v4544_v11 = vld [vmem:[#allocation6 + $0x84] ss:$16 sps:$4 sm:$0xff]   ;;  %v4546_v10 = vld [vmem:[#allocation6 + $0x8c] ss:$16 sps:$4 sm:$0xff]  }
 0x7a1   :  { %1643 = vmatpush1.bf16.msra.mxu0 %v3357_v59  ;;  %1686 = vmatpush1.bf16.msra.mxu1 %v3360_v52  ;;  %v4550_v59 = vld [vmem:[#allocation6 + $0x80] ss:$16 sps:$4 sm:$0xff]   ;;  %v4552_v52 = vld [vmem:[#allocation6 + $0x88] ss:$16 sps:$4 sm:$0xff]  }
 0x7a2   :  { %1644 = vmatprep.subr.bf16.mxu0 %v3365_v46  ;;  %1687 = vmatprep.subr.bf16.mxu1 %v3368_v61  ;;  %v4556_v46 = vld [vmem:[#allocation6 + $0xa4] ss:$16 sps:$4 sm:$0xff]   ;;  %v4558_v61 = vld [vmem:[#allocation6 + $0xac] ss:$16 sps:$4 sm:$0xff]  }
 0x7a5   :  { %1645 = vmatpush1.bf16.msra.mxu0 %v3363_v51  ;;  %1688 = vmatpush1.bf16.msra.mxu1 %v3366_v45  ;;  %v4562_v51 = vld [vmem:[#allocation6 + $0xa0] ss:$16 sps:$4 sm:$0xff]   ;;  %v4564_v45 = vld [vmem:[#allocation6 + $0xa8] ss:$16 sps:$4 sm:$0xff]  }
 0x7a6   :  { %1908 = vmatprep.subr.bf16.mxu0 %v4488_v56  ;;  %1949 = vmatprep.subr.bf16.mxu1 %v4490_v49 }
 0x85a   :  { %v1315_v4 = vpop.f32.mrb[28].mxu0  ;;  %v1356_v8 = vpop.f32.mrb[36].mxu1 }
 0x85b   :  { %v1367_v9 = vrot.slane %v1315_v4, 2  ;;  %v1317_v13 = vpop.f32.mrb[29].mxu0  ;;  %v1358_v23 = vpop.f32.mrb[37].mxu1  ;;  %v1369_v5 = vrot.slane %v1356_v8, 2  ;;  %v4568_v4 = vld [vmem:[#allocation6 + $0xc4] ss:$16 sps:$4 sm:$0xff]  }
 0x85c   :  { %v1368_v24 = vrot.slane %v1317_v13, 2  ;;  %v1319_v25 = vpop.f32.mrb[30].mxu0  ;;  %v1360_v26 = vpop.f32.mrb[38].mxu1  ;;  %v1370_v21 = vrot.slane %v1358_v23, 2  ;;  %v4570_v8 = vld [vmem:[#allocation6 + $0xcc] ss:$16 sps:$4 sm:$0xff]  }
 0x85d   :  { %v1375_v27 = vadd.f32 %v1367_v9, %v4114_v50  ;;  %v1320_v28 = vpop.f32.mrb[31].mxu0  ;;  %v1361_v29 = vpop.f32.mrb[39].mxu1  ;;  %v1377_v14 = vadd.f32 %v1369_v5, %v4124_v60  ;;  %v4574_v9 = vld [vmem:[#allocation6 + $0xc0] ss:$16 sps:$4 sm:$0xff]   ;;  %v4576_v13 = vld [vmem:[#allocation6 + $0xc8] ss:$16 sps:$4 sm:$0xff]  }
 0x85e   :  { %v1376_v30 = vadd.f32 %v1368_v24, %v4117_v53  ;;  %v1378_v22 = vadd.f32 %v1370_v21, %v4126_v62  ;;  %v4580_v23 = vld [vmem:[#allocation6 + $0xe4] ss:$16 sps:$4 sm:$0xff]   ;;  %v4582_v24 = vld [vmem:[#allocation6 + $0xec] ss:$16 sps:$4 sm:$0xff]   ;;  %v4586_v25 = vld [vmem:[#allocation6 + $0xe0] ss:$16 sps:$4 sm:$0xff]  }
 0x85f   :  { %v3129_v55 = vmul.f32 -1.442695, %v1375_v27  ;;  %v4588_v26 = vld [vmem:[#allocation6 + $0xe8] ss:$16 sps:$4 sm:$0xff]   ;;  %v1448_v27 = vld [vmem:[%s4987_s6] sm:$0xf] }
 0x860   :  { %v3130_v39 = vmul.f32 -1.442695, %v1376_v30  ;;  %v3131_v2 = vmul.f32 -1.442695, %v1378_v22  ;;  %v1453_v30 = vrot.slane %v1448_v27, %v91_v42  ;;  %v4998_v5 = vsub.s32 1, %v4103_v41 }
 0x861   :  { %3537 = vpow2.f32 %v3129_v55  ;;  %v4997_v55 = vsub.s32 2, %v4103_v41 }
 0x862   :  { %3539 = vpow2.f32 %v3130_v39 }
 0x863   :  { %3541 = vpow2.f32 %v3131_v2  ;;  %v1461_v39 = vrot.slane %v1448_v27, %v4997_v55  ;;  %v1457_v2 = vrot.slane %v1448_v27, %v4998_v5 }
 0x864   :  { %3543 = vtanh.f32 %v1377_v14  ;;  %v4999_v14 = vsub.s32 3, %v4103_v41 }
 0x86b   :  { %v3538_v6 = vpop.eup %3537 }
 0x86c   :  { %v3540_v43 = vpop.eup %3539  ;;  %v1382_v3 = vadd.f32 1.0, %v3538_v6  ;;  %v1465_v6 = vrot.slane %v1448_v27, %v4999_v14 }
 0x86d   :  { %v1388_v50 = vadd.f32 1.0, %v3540_v43  ;;  %v3542_v53 = vpop.eup %3541 }
 0x86e   :  { %3545 = vrcp.f32 %v1382_v3  ;;  %v3544_v1 = vpop.eup %3543  ;;  %v1395_v62 = vadd.f32 1.0, %v3542_v53 }
 0x86f   :  { %3547 = vrcp.f32 %v1388_v50 }
 0x870   :  { %3549 = vrcp.f32 %v1395_v62 }
 0x878   :  { %v3546_v31 = vpop.eup %3545 }
 0x879   :  { %v3548_v33 = vpop.eup %3547  ;;  %v1402_v34 = vmul.f32 %v3546_v31, %v3544_v1 }
 0x87a   :  { %v1401_v35 = vmul.f32 %v3548_v33, %v1399_v63  ;;  %v3550_v60 = vpop.eup %3549 }
 0x87c   :  { %v1403_v36 = vadd.f32 %v1402_v34, %v1401_v35 }
 0x87e   :  { %3551 = vtanh.f32 %v1403_v36 }
 0x888   :  { %v3552_v32 = vpop.eup %3551 }
 0x889   :  { %v1405_v37 = vmul.f32 %v3552_v32, %v3550_v60 }
 0x88b   :  { %v1414_v38 = vsel %vm1410_vm3, %v4484_v7, %v1405_v37  ;;  %v4518_v7 = vld [vmem:[#allocation6 + $0x44] ss:$16 sps:$4 sm:$0xff]  }
 0x88c   :  { %v1415_v57 = vpack.c.bf16 %v1414_v38, %v4285_v12  ;;  %v4520_v12 = vld [vmem:[#allocation6 + $0x4c] ss:$16 sps:$4 sm:$0xff]  }
 0x88e   :  { %1663 = vmatmul.mubr.bf16.vlgmr.msra.gmra.mrb[32].mxu0 %v1415_v57  ;;  %1706 = vmatmul.mubr.bf16.vlgmr.msra.gmra.mrb[40].mxu1 %v1415_v57 }
 0x88f   :  { %1909 = vmatpush1.bf16.msra.mxu0 %v4501_v48  ;;  %1950 = vmatpush1.bf16.msra.mxu1 %v4503_v44 }
 0x890   :  { %1910 = vmatprep.subr.bf16.mxu0 %v4506_v40  ;;  %1951 = vmatprep.subr.bf16.mxu1 %v4508_v58 }
 0x891   :  { %1940 = vmatprep.mubr.bf16.mxu0 %v3824_v0  ;;  %1981 = vmatprep.mubr.bf16.mxu1 %v3824_v0 }
 0x893   :  { %1911 = vmatpush1.bf16.msra.mxu0 %v4512_v54  ;;  %1952 = vmatpush1.bf16.msra.mxu1 %v4514_v15 }
 0x894   :  { %1912 = vmatprep.subr.bf16.mxu0 %v4518_v7  ;;  %1953 = vmatprep.subr.bf16.mxu1 %v4520_v12 }
 0x897   :  { %1913 = vmatpush1.bf16.msra.mxu0 %v4526_v47  ;;  %1954 = vmatpush1.bf16.msra.mxu1 %v4528_v17 }
 0x898   :  { %1914 = vmatprep.subr.bf16.mxu0 %v4532_v16  ;;  %1955 = vmatprep.subr.bf16.mxu1 %v4534_v18 }
 0x89b   :  { %1915 = vmatpush1.bf16.msra.mxu0 %v4538_v19  ;;  %1956 = vmatpush1.bf16.msra.mxu1 %v4540_v20 }
 0x89c   :  { %1916 = vmatprep.subr.bf16.mxu0 %v4544_v11  ;;  %1957 = vmatprep.subr.bf16.mxu1 %v4546_v10 }
 0x89f   :  { %1917 = vmatpush1.bf16.msra.mxu0 %v4550_v59  ;;  %1958 = vmatpush1.bf16.msra.mxu1 %v4552_v52 }
 0x8a0   :  { %1918 = vmatprep.subr.bf16.mxu0 %v4556_v46  ;;  %1959 = vmatprep.subr.bf16.mxu1 %v4558_v61 }
 0x8a3   :  { %1919 = vmatpush1.bf16.msra.mxu0 %v4562_v51  ;;  %1960 = vmatpush1.bf16.msra.mxu1 %v4564_v45 }
 0x8a4   :  { %1920 = vmatprep.subr.bf16.mxu0 %v4568_v4  ;;  %1961 = vmatprep.subr.bf16.mxu1 %v4570_v8 }
 0x8a7   :  { %1921 = vmatpush1.bf16.msra.mxu0 %v4574_v9  ;;  %1962 = vmatpush1.bf16.msra.mxu1 %v4576_v13 }
 0x8a8   :  { %1922 = vmatprep.subr.bf16.mxu0 %v4580_v23  ;;  %1963 = vmatprep.subr.bf16.mxu1 %v4582_v24 }
 0x8ab   :  { %1923 = vmatpush1.bf16.msra.mxu0 %v4586_v25  ;;  %1964 = vmatpush1.bf16.msra.mxu1 %v4588_v26 }
 0x8ac   :  { %2019 = vmatprep.subr.bf16.mxu0 %v4488_v56  ;;  %2060 = vmatprep.subr.bf16.mxu1 %v4490_v49 }
 0x8ae   :  { %1941 = vmatmul.mubr.bf16.vlgmr.msra.gmra.mrb[36].mxu0 %v3824_v0  ;;  %1982 = vmatmul.mubr.bf16.vlgmr.msra.gmra.mrb[44].mxu1 %v3824_v0 }
 0x8af   :  { %2020 = vmatpush1.bf16.msra.mxu0 %v4501_v48  ;;  %2061 = vmatpush1.bf16.msra.mxu1 %v4503_v44 }
 0x8b0   :  { %2021 = vmatprep.subr.bf16.mxu0 %v4506_v40  ;;  %2062 = vmatprep.subr.bf16.mxu1 %v4508_v58 }
 0x8b1   :  { %2051 = vmatprep.mubr.bf16.mxu0 %v3824_v0  ;;  %2092 = vmatprep.mubr.bf16.mxu1 %v3824_v0 }
 0x8b3   :  { %2022 = vmatpush1.bf16.msra.mxu0 %v4512_v54  ;;  %2063 = vmatpush1.bf16.msra.mxu1 %v4514_v15 }
 0x8b4   :  { %2023 = vmatprep.subr.bf16.mxu0 %v4518_v7  ;;  %2064 = vmatprep.subr.bf16.mxu1 %v4520_v12 }
 0x8b7   :  { %2024 = vmatpush1.bf16.msra.mxu0 %v4526_v47  ;;  %2065 = vmatpush1.bf16.msra.mxu1 %v4528_v17 }
 0x8b8   :  { %2025 = vmatprep.subr.bf16.mxu0 %v4532_v16  ;;  %2066 = vmatprep.subr.bf16.mxu1 %v4534_v18 }
 0x8bb   :  { %2026 = vmatpush1.bf16.msra.mxu0 %v4538_v19  ;;  %2067 = vmatpush1.bf16.msra.mxu1 %v4540_v20 }
 0x8bc   :  { %2027 = vmatprep.subr.bf16.mxu0 %v4544_v11  ;;  %2068 = vmatprep.subr.bf16.mxu1 %v4546_v10 }
 0x8bf   :  { %2028 = vmatpush1.bf16.msra.mxu0 %v4550_v59  ;;  %2069 = vmatpush1.bf16.msra.mxu1 %v4552_v52 }
 0x8c0   :  { %2029 = vmatprep.subr.bf16.mxu0 %v4556_v46  ;;  %2070 = vmatprep.subr.bf16.mxu1 %v4558_v61 }
 0x8c3   :  { %2030 = vmatpush1.bf16.msra.mxu0 %v4562_v51  ;;  %2071 = vmatpush1.bf16.msra.mxu1 %v4564_v45 }
 0x8c4   :  { %2031 = vmatprep.subr.bf16.mxu0 %v4568_v4  ;;  %2072 = vmatprep.subr.bf16.mxu1 %v4570_v8 }
 0x8c7   :  { %2032 = vmatpush1.bf16.msra.mxu0 %v4574_v9  ;;  %2073 = vmatpush1.bf16.msra.mxu1 %v4576_v13 }
 0x8c8   :  { %2033 = vmatprep.subr.bf16.mxu0 %v4580_v23  ;;  %2074 = vmatprep.subr.bf16.mxu1 %v4582_v24 }
 0x8cb   :  { %2034 = vmatpush1.bf16.msra.mxu0 %v4586_v25  ;;  %2075 = vmatpush1.bf16.msra.mxu1 %v4588_v26 }
 0x8cc   :  { %2148 = vmatprep.subr.bf16.mxu0 %v4488_v56  ;;  %2189 = vmatprep.subr.bf16.mxu1 %v4490_v49 }
 0x961   :  { %v1664_v28 = vpop.f32.mrb[32].mxu0  ;;  %v1707_v29 = vpop.f32.mrb[40].mxu1 }
 0x962   :  { %v1666_v21 = vpop.f32.mrb[33].mxu0  ;;  %v1709_v22 = vpop.f32.mrb[41].mxu1  ;;  %v4651_v33 = vadd.f32 %v1664_v28, %v1453_v30 }
 0x963   :  { %v1668_v43 = vpop.f32.mrb[34].mxu0  ;;  %v1711_v3 = vpop.f32.mrb[42].mxu1  ;;  %v4653_v34 = vadd.f32 %v1666_v21, %v1457_v2  ;;  %v4657_v14 = vadd.f32 %v1709_v22, %v1465_v6 }
 0x964   :  { %v4643_v50 = vadd.f32 %v1668_v43, %v1453_v30  ;;  %v4645_v53 = vadd.f32 %v1711_v3, %v1461_v39  ;;  %v1670_v1 = vpop.f32.mrb[35].mxu0  ;;  %v1713_v31 = vpop.f32.mrb[43].mxu1  ;;  %v4660_v30 = vadd.f32 %v1707_v29, %v1461_v39 }
 0x965   :  { %v4647_v42 = vadd.f32 %v1670_v1, %v1457_v2  ;;  %v4649_v63 = vadd.f32 %v1713_v31, %v1465_v6 }
 0x981   :  { %v1942_v62 = vpop.f32.mrb[36].mxu0  ;;  %v1983_v35 = vpop.f32.mrb[44].mxu1 }
 0x982   :  { %v1990_v41 = vadd.f32 %v1942_v62, %v4651_v33  ;;  %v1944_v36 = vpop.f32.mrb[37].mxu0  ;;  %v1985_v60 = vpop.f32.mrb[45].mxu1  ;;  %v1992_v2 = vadd.f32 %v1983_v35, %v4660_v30 }
 0x983   :  { %v1991_v32 = vadd.f32 %v1944_v36, %v4653_v34  ;;  %v1946_v37 = vpop.f32.mrb[38].mxu0  ;;  %v1987_v38 = vpop.f32.mrb[46].mxu1  ;;  %v1993_v28 = vadd.f32 %v1985_v60, %v4657_v14 }
 0x984   :  { %v3196_v57 = vmul.f32 -1.442695, %v1990_v41  ;;  %v1947_v27 = vpop.f32.mrb[39].mxu0  ;;  %v1988_v55 = vpop.f32.mrb[47].mxu1 }
 0x985   :  { %v3197_v5 = vmul.f32 -1.442695, %v1991_v32  ;;  %v3198_v21 = vmul.f32 -1.442695, %v1993_v28 }
 0x986   :  { %3553 = vpow2.f32 %v3196_v57 }
 0x987   :  { %3555 = vpow2.f32 %v3197_v5 }
 0x988   :  { %3557 = vpow2.f32 %v3198_v21 }
 0x989   :  { %3559 = vtanh.f32 %v1992_v2 }
 0x990   :  { %v3554_v43 = vpop.eup %3553 }
 0x991   :  { %v3556_v3 = vpop.eup %3555  ;;  %v1997_v1 = vadd.f32 1.0, %v3554_v43 }
 0x992   :  { %v2003_v31 = vadd.f32 1.0, %v3556_v3  ;;  %v3558_v62 = vpop.eup %3557 }
 0x993   :  { %3561 = vrcp.f32 %v1997_v1  ;;  %v3560_v41 = vpop.eup %3559  ;;  %v2010_v32 = vadd.f32 1.0, %v3558_v62 }
 0x994   :  { %3563 = vrcp.f32 %v2003_v31 }
 0x995   :  { %3565 = vrcp.f32 %v2010_v32 }
 0x99d   :  { %v3562_v22 = vpop.eup %3561 }
 0x99e   :  { %v3564_v6 = vpop.eup %3563  ;;  %v2014_v36 = vmul.f32 %v3562_v22, %v3560_v41 }
 0x99f   :  { %v2013_v60 = vmul.f32 0.0, %v3564_v6  ;;  %v3566_v39 = vpop.eup %3565 }
 0x9a1   :  { %v4663_v29 = vadd.f32 %v2014_v36, %v2013_v60 }
 0x9a3   :  { %3567 = vtanh.f32 %v4663_v29 }
 0x9ad   :  { %v3568_v35 = vpop.eup %3567 }
 0x9ae   :  { %v4666_v37 = vmul.f32 %v3568_v35, %v3566_v39 }
 0x9b0   :  { %v2018_v38 = vpack.c.bf16 %v4666_v37, %v4666_v37 }
 0x9b2   :  { %2052 = vmatmul.mubr.bf16.vlgmr.msra.gmra.mrb[40].mxu0 %v2018_v38  ;;  %2093 = vmatmul.mubr.bf16.vlgmr.msra.gmra.mrb[48].mxu1 %v2018_v38 }
 0x9b3   :  { %2149 = vmatpush1.bf16.msra.mxu0 %v4501_v48  ;;  %2190 = vmatpush1.bf16.msra.mxu1 %v4503_v44 }
 0x9b4   :  { %2150 = vmatprep.subr.bf16.mxu0 %v4506_v40  ;;  %2191 = vmatprep.subr.bf16.mxu1 %v4508_v58 }
 0x9b5   :  { %2180 = vmatprep.mubr.bf16.mxu0 %v3824_v0  ;;  %2221 = vmatprep.mubr.bf16.mxu1 %v3824_v0 }
 0x9b7   :  { %2151 = vmatpush1.bf16.msra.mxu0 %v4512_v54  ;;  %2192 = vmatpush1.bf16.msra.mxu1 %v4514_v15 }
 0x9b8   :  { %2152 = vmatprep.subr.bf16.mxu0 %v4518_v7  ;;  %2193 = vmatprep.subr.bf16.mxu1 %v4520_v12 }
 0x9bb   :  { %2153 = vmatpush1.bf16.msra.mxu0 %v4526_v47  ;;  %2194 = vmatpush1.bf16.msra.mxu1 %v4528_v17 }
 0x9bc   :  { %2154 = vmatprep.subr.bf16.mxu0 %v4532_v16  ;;  %2195 = vmatprep.subr.bf16.mxu1 %v4534_v18 }
 0x9bf   :  { %2155 = vmatpush1.bf16.msra.mxu0 %v4538_v19  ;;  %2196 = vmatpush1.bf16.msra.mxu1 %v4540_v20 }
 0x9c0   :  { %2156 = vmatprep.subr.bf16.mxu0 %v4544_v11  ;;  %2197 = vmatprep.subr.bf16.mxu1 %v4546_v10 }
 0x9c3   :  { %2157 = vmatpush1.bf16.msra.mxu0 %v4550_v59  ;;  %2198 = vmatpush1.bf16.msra.mxu1 %v4552_v52 }
 0x9c4   :  { %2158 = vmatprep.subr.bf16.mxu0 %v4556_v46  ;;  %2199 = vmatprep.subr.bf16.mxu1 %v4558_v61 }
 0x9c7   :  { %2159 = vmatpush1.bf16.msra.mxu0 %v4562_v51  ;;  %2200 = vmatpush1.bf16.msra.mxu1 %v4564_v45 }
 0x9c8   :  { %2160 = vmatprep.subr.bf16.mxu0 %v4568_v4  ;;  %2201 = vmatprep.subr.bf16.mxu1 %v4570_v8 }
 0x9cb   :  { %2161 = vmatpush1.bf16.msra.mxu0 %v4574_v9  ;;  %2202 = vmatpush1.bf16.msra.mxu1 %v4576_v13 }
 0x9cc   :  { %2162 = vmatprep.subr.bf16.mxu0 %v4580_v23  ;;  %2203 = vmatprep.subr.bf16.mxu1 %v4582_v24 }
 0x9cf   :  { %2163 = vmatpush1.bf16.msra.mxu0 %v4586_v25  ;;  %2204 = vmatpush1.bf16.msra.mxu1 %v4588_v26 }
 0x9d0   :  { %2277 = vmatprep.subr.bf16.mxu0 %v4488_v56  ;;  %2318 = vmatprep.subr.bf16.mxu1 %v4490_v49 }
 0xa85   :  { %v2053_v57 = vpop.f32.mrb[40].mxu0  ;;  %v2094_v27 = vpop.f32.mrb[48].mxu1 }
 0xa86   :  { %v2105_v55 = vrot.slane %v2053_v57, 6  ;;  %v2055_v5 = vpop.f32.mrb[41].mxu0  ;;  %v2096_v28 = vpop.f32.mrb[49].mxu1  ;;  %v2107_v32 = vrot.slane %v2094_v27, 6 }
 0xa87   :  { %v2106_v21 = vrot.slane %v2055_v5, 6  ;;  %v2057_v2 = vpop.f32.mrb[42].mxu0  ;;  %v2098_v43 = vpop.f32.mrb[50].mxu1  ;;  %v2108_v6 = vrot.slane %v2096_v28, 6  ;;  %v2137_v28 = vrot.slane %v4663_v29, 6 }
 0xa88   :  { %v2113_v3 = vadd.f32 %v2105_v55, %v4651_v33  ;;  %v2058_v1 = vpop.f32.mrb[43].mxu0  ;;  %v2099_v31 = vpop.f32.mrb[51].mxu1  ;;  %v2115_v39 = vadd.f32 %v2107_v32, %v4660_v30 }
 0xa89   :  { %v2114_v62 = vadd.f32 %v2106_v21, %v4653_v34  ;;  %v2116_v36 = vadd.f32 %v2108_v6, %v4657_v14 }
 0xa8a   :  { %v3199_v41 = vmul.f32 -1.442695, %v2113_v3 }
 0xa8b   :  { %v3200_v22 = vmul.f32 -1.442695, %v2114_v62  ;;  %v3201_v60 = vmul.f32 -1.442695, %v2116_v36 }
 0xa8c   :  { %3569 = vpow2.f32 %v3199_v41 }
 0xa8d   :  { %3571 = vpow2.f32 %v3200_v22 }
 0xa8e   :  { %3573 = vpow2.f32 %v3201_v60 }
 0xa8f   :  { %3575 = vtanh.f32 %v2115_v39 }
 0xa96   :  { %v3570_v35 = vpop.eup %3569 }
 0xa97   :  { %v3572_v38 = vpop.eup %3571  ;;  %v2120_v57 = vadd.f32 1.0, %v3570_v35 }
 0xa98   :  { %v2126_v55 = vadd.f32 1.0, %v3572_v38  ;;  %v3574_v5 = vpop.eup %3573 }
 0xa99   :  { %3577 = vrcp.f32 %v2120_v57  ;;  %v3576_v21 = vpop.eup %3575  ;;  %v2133_v1 = vadd.f32 1.0, %v3574_v5 }
 0xa9a   :  { %3579 = vrcp.f32 %v2126_v55 }
 0xa9b   :  { %3581 = vrcp.f32 %v2133_v1 }
 0xaa3   :  { %v3578_v2 = vpop.eup %3577 }
 0xaa4   :  { %v3580_v43 = vpop.eup %3579  ;;  %v2140_v3 = vmul.f32 %v3578_v2, %v3576_v21 }
 0xaa5   :  { %v2139_v27 = vmul.f32 %v3580_v43, %v2137_v28  ;;  %v3582_v62 = vpop.eup %3581 }
 0xaa7   :  { %v4709_v31 = vadd.f32 %v2140_v3, %v2139_v27 }
 0xaa9   :  { %3583 = vtanh.f32 %v4709_v31 }
 0xab3   :  { %v3584_v41 = vpop.eup %3583 }
 0xab4   :  { %v4712_v22 = vmul.f32 %v3584_v41, %v3582_v62 }
 0xab6   :  { %v2144_v6 = vpack.c.bf16 %v4712_v22, %v4712_v22 }
 0xab8   :  { %v2146_v36 = vrot.slane %v2144_v6, 1 }
 0xaba   :  { %2181 = vmatmul.mubr.bf16.vlgmr.msra.gmra.mrb[44].mxu0 %v2146_v36  ;;  %2222 = vmatmul.mubr.bf16.vlgmr.msra.gmra.mrb[52].mxu1 %v2146_v36 }
 0xabb   :  { %2278 = vmatpush1.bf16.msra.mxu0 %v4501_v48  ;;  %2319 = vmatpush1.bf16.msra.mxu1 %v4503_v44 }
 0xabc   :  { %2279 = vmatprep.subr.bf16.mxu0 %v4506_v40  ;;  %2320 = vmatprep.subr.bf16.mxu1 %v4508_v58 }
 0xabd   :  { %2309 = vmatprep.mubr.bf16.mxu0 %v3824_v0  ;;  %2350 = vmatprep.mubr.bf16.mxu1 %v3824_v0 }
 0xabf   :  { %2280 = vmatpush1.bf16.msra.mxu0 %v4512_v54  ;;  %2321 = vmatpush1.bf16.msra.mxu1 %v4514_v15 }
 0xac0   :  { %2281 = vmatprep.subr.bf16.mxu0 %v4518_v7  ;;  %2322 = vmatprep.subr.bf16.mxu1 %v4520_v12 }
 0xac3   :  { %2282 = vmatpush1.bf16.msra.mxu0 %v4526_v47  ;;  %2323 = vmatpush1.bf16.msra.mxu1 %v4528_v17 }
 0xac4   :  { %2283 = vmatprep.subr.bf16.mxu0 %v4532_v16  ;;  %2324 = vmatprep.subr.bf16.mxu1 %v4534_v18 }
 0xac7   :  { %2284 = vmatpush1.bf16.msra.mxu0 %v4538_v19  ;;  %2325 = vmatpush1.bf16.msra.mxu1 %v4540_v20 }
 0xac8   :  { %2285 = vmatprep.subr.bf16.mxu0 %v4544_v11  ;;  %2326 = vmatprep.subr.bf16.mxu1 %v4546_v10 }
 0xacb   :  { %2286 = vmatpush1.bf16.msra.mxu0 %v4550_v59  ;;  %2327 = vmatpush1.bf16.msra.mxu1 %v4552_v52 }
 0xacc   :  { %2287 = vmatprep.subr.bf16.mxu0 %v4556_v46  ;;  %2328 = vmatprep.subr.bf16.mxu1 %v4558_v61 }
 0xacf   :  { %2288 = vmatpush1.bf16.msra.mxu0 %v4562_v51  ;;  %2329 = vmatpush1.bf16.msra.mxu1 %v4564_v45 }
 0xad0   :  { %2289 = vmatprep.subr.bf16.mxu0 %v4568_v4  ;;  %2330 = vmatprep.subr.bf16.mxu1 %v4570_v8 }
 0xad3   :  { %2290 = vmatpush1.bf16.msra.mxu0 %v4574_v9  ;;  %2331 = vmatpush1.bf16.msra.mxu1 %v4576_v13 }
 0xad4   :  { %2291 = vmatprep.subr.bf16.mxu0 %v4580_v23  ;;  %2332 = vmatprep.subr.bf16.mxu1 %v4582_v24 }
 0xad7   :  { %2292 = vmatpush1.bf16.msra.mxu0 %v4586_v25  ;;  %2333 = vmatpush1.bf16.msra.mxu1 %v4588_v26 }
 0xad8   :  { %2406 = vmatprep.subr.bf16.mxu0 %v4488_v56  ;;  %2447 = vmatprep.subr.bf16.mxu1 %v4490_v49 }
 0xb8d   :  { %v2182_v29 = vpop.f32.mrb[44].mxu0  ;;  %v2223_v32 = vpop.f32.mrb[52].mxu1 }
 0xb8e   :  { %v2234_v60 = vrot.slane %v2182_v29, 4  ;;  %v2184_v39 = vpop.f32.mrb[45].mxu0  ;;  %v2225_v35 = vpop.f32.mrb[53].mxu1  ;;  %v2236_v62 = vrot.slane %v2223_v32, 4 }
 0xb8f   :  { %v2235_v38 = vrot.slane %v2184_v39, 4  ;;  %v2186_v57 = vpop.f32.mrb[46].mxu0  ;;  %v2227_v55 = vpop.f32.mrb[54].mxu1  ;;  %v2237_v1 = vrot.slane %v2225_v35, 4  ;;  %v2266_v35 = vrot.slane %v4709_v31, 6 }
 0xb90   :  { %v2242_v5 = vadd.f32 %v2234_v60, %v4651_v33  ;;  %v2187_v21 = vpop.f32.mrb[47].mxu0  ;;  %v2228_v2 = vpop.f32.mrb[55].mxu1  ;;  %v2244_v6 = vadd.f32 %v2236_v62, %v4660_v30 }
 0xb91   :  { %v2243_v28 = vadd.f32 %v2235_v38, %v4653_v34  ;;  %v2245_v27 = vadd.f32 %v2237_v1, %v4657_v14 }
 0xb92   :  { %v3202_v43 = vmul.f32 -1.442695, %v2242_v5 }
 0xb93   :  { %v3203_v3 = vmul.f32 -1.442695, %v2243_v28  ;;  %v3204_v41 = vmul.f32 -1.442695, %v2245_v27  ;;  %v2903_v27 = vsel %vm1406_vm1, %v4666_v37, %v4712_v22 }
 0xb94   :  { %3585 = vpow2.f32 %v3202_v43 }
 0xb95   :  { %3587 = vpow2.f32 %v3203_v3 }
 0xb96   :  { %3589 = vpow2.f32 %v3204_v41 }
 0xb97   :  { %3591 = vtanh.f32 %v2244_v6 }
 0xb9e   :  { %v3586_v36 = vpop.eup %3585 }
 0xb9f   :  { %v3588_v29 = vpop.eup %3587  ;;  %v2249_v39 = vadd.f32 1.0, %v3586_v36 }
 0xba0   :  { %v2255_v60 = vadd.f32 1.0, %v3588_v29  ;;  %v3590_v38 = vpop.eup %3589 }
 0xba1   :  { %3593 = vrcp.f32 %v2249_v39  ;;  %v3592_v57 = vpop.eup %3591  ;;  %v2262_v2 = vadd.f32 1.0, %v3590_v38 }
 0xba2   :  { %3595 = vrcp.f32 %v2255_v60 }
 0xba3   :  { %3597 = vrcp.f32 %v2262_v2 }
 0xbab   :  { %v3594_v55 = vpop.eup %3593 }
 0xbac   :  { %v3596_v5 = vpop.eup %3595  ;;  %v2269_v21 = vmul.f32 %v3594_v55, %v3592_v57 }
 0xbad   :  { %v2268_v32 = vmul.f32 %v3596_v5, %v2266_v35  ;;  %v3598_v43 = vpop.eup %3597 }
 0xbaf   :  { %v4755_v28 = vadd.f32 %v2269_v21, %v2268_v32 }
 0xbb1   :  { %3599 = vtanh.f32 %v4755_v28 }
 0xbbb   :  { %v3600_v3 = vpop.eup %3599 }
 0xbbc   :  { %v2272_v1 = vmul.f32 %v3600_v3, %v3598_v43 }
 0xbbe   :  { %v2273_v62 = vpack.c.bf16 %v2272_v1, %v2272_v1  ;;  %v4762_v41 = vsel %vm1408_vm2, %v2903_v27, %v2272_v1 }
 0xbc0   :  { %v2275_v31 = vrot.slane %v2273_v62, 2 }
 0xbc2   :  { %2310 = vmatmul.mubr.bf16.vlgmr.msra.gmra.mrb[48].mxu0 %v2275_v31  ;;  %2351 = vmatmul.mubr.bf16.vlgmr.msra.gmra.mrb[56].mxu1 %v2275_v31 }
 0xbc3   :  { %2407 = vmatpush1.bf16.msra.mxu0 %v4501_v48  ;;  %2448 = vmatpush1.bf16.msra.mxu1 %v4503_v44 }
 0xbc4   :  { %2408 = vmatprep.subr.bf16.mxu0 %v4506_v40  ;;  %2449 = vmatprep.subr.bf16.mxu1 %v4508_v58 }
 0xbc5   :  { %2438 = vmatprep.mubr.bf16.mxu0 %v3824_v0  ;;  %2479 = vmatprep.mubr.bf16.mxu1 %v3824_v0 }
 0xbc7   :  { %2409 = vmatpush1.bf16.msra.mxu0 %v4512_v54  ;;  %2450 = vmatpush1.bf16.msra.mxu1 %v4514_v15 }
 0xbc8   :  { %2410 = vmatprep.subr.bf16.mxu0 %v4518_v7  ;;  %2451 = vmatprep.subr.bf16.mxu1 %v4520_v12 }
 0xbcb   :  { %2411 = vmatpush1.bf16.msra.mxu0 %v4526_v47  ;;  %2452 = vmatpush1.bf16.msra.mxu1 %v4528_v17 }
 0xbcc   :  { %2412 = vmatprep.subr.bf16.mxu0 %v4532_v16  ;;  %2453 = vmatprep.subr.bf16.mxu1 %v4534_v18 }
 0xbcf   :  { %2413 = vmatpush1.bf16.msra.mxu0 %v4538_v19  ;;  %2454 = vmatpush1.bf16.msra.mxu1 %v4540_v20 }
 0xbd0   :  { %2414 = vmatprep.subr.bf16.mxu0 %v4544_v11  ;;  %2455 = vmatprep.subr.bf16.mxu1 %v4546_v10 }
 0xbd3   :  { %2415 = vmatpush1.bf16.msra.mxu0 %v4550_v59  ;;  %2456 = vmatpush1.bf16.msra.mxu1 %v4552_v52 }
 0xbd4   :  { %2416 = vmatprep.subr.bf16.mxu0 %v4556_v46  ;;  %2457 = vmatprep.subr.bf16.mxu1 %v4558_v61 }
 0xbd7   :  { %2417 = vmatpush1.bf16.msra.mxu0 %v4562_v51  ;;  %2458 = vmatpush1.bf16.msra.mxu1 %v4564_v45 }
 0xbd8   :  { %2418 = vmatprep.subr.bf16.mxu0 %v4568_v4  ;;  %2459 = vmatprep.subr.bf16.mxu1 %v4570_v8 }
 0xbdb   :  { %2419 = vmatpush1.bf16.msra.mxu0 %v4574_v9  ;;  %2460 = vmatpush1.bf16.msra.mxu1 %v4576_v13 }
 0xbdc   :  { %2420 = vmatprep.subr.bf16.mxu0 %v4580_v23  ;;  %2461 = vmatprep.subr.bf16.mxu1 %v4582_v24 }
 0xbdf   :  { %2421 = vmatpush1.bf16.msra.mxu0 %v4586_v25  ;;  %2462 = vmatpush1.bf16.msra.mxu1 %v4588_v26 }
 0xbe0   :  { %2520 = vmatprep.subr.bf16.mxu0 %v4488_v56  ;;  %2561 = vmatprep.subr.bf16.mxu1 %v4490_v49 }
 0xc95   :  { %v2311_v37 = vpop.f32.mrb[48].mxu0  ;;  %v2352_v22 = vpop.f32.mrb[56].mxu1 }
 0xc96   :  { %v2363_v6 = vrot.slane %v2311_v37, 2  ;;  %v2313_v36 = vpop.f32.mrb[49].mxu0  ;;  %v2354_v29 = vpop.f32.mrb[57].mxu1  ;;  %v2365_v3 = vrot.slane %v2352_v22, 2 }
 0xc97   :  { %v2364_v39 = vrot.slane %v2313_v36, 2  ;;  %v2315_v60 = vpop.f32.mrb[50].mxu0  ;;  %v2356_v38 = vpop.f32.mrb[58].mxu1  ;;  %v2366_v32 = vrot.slane %v2354_v29, 2  ;;  %v2395_v29 = vrot.slane %v4755_v28, 6 }
 0xc98   :  { %v2371_v57 = vadd.f32 %v2363_v6, %v4651_v33  ;;  %v2316_v55 = vpop.f32.mrb[51].mxu0  ;;  %v2357_v35 = vpop.f32.mrb[59].mxu1  ;;  %v2373_v27 = vadd.f32 %v2365_v3, %v4660_v30 }
 0xc99   :  { %v2372_v5 = vadd.f32 %v2364_v39, %v4653_v34  ;;  %v2374_v43 = vadd.f32 %v2366_v32, %v4657_v14 }
 0xc9a   :  { %v3205_v21 = vmul.f32 -1.442695, %v2371_v57 }
 0xc9b   :  { %v3206_v2 = vmul.f32 -1.442695, %v2372_v5  ;;  %v3207_v1 = vmul.f32 -1.442695, %v2374_v43 }
 0xc9c   :  { %3601 = vpow2.f32 %v3205_v21 }
 0xc9d   :  { %3603 = vpow2.f32 %v3206_v2 }
 0xc9e   :  { %3605 = vpow2.f32 %v3207_v1 }
 0xc9f   :  { %3607 = vtanh.f32 %v2373_v27 }
 0xca6   :  { %v3602_v62 = vpop.eup %3601 }
 0xca7   :  { %v3604_v31 = vpop.eup %3603  ;;  %v2378_v37 = vadd.f32 1.0, %v3602_v62 }
 0xca8   :  { %v2384_v33 = vadd.f32 1.0, %v3604_v31  ;;  %v3606_v34 = vpop.eup %3605 }
 0xca9   :  { %3609 = vrcp.f32 %v2378_v37  ;;  %v3608_v6 = vpop.eup %3607  ;;  %v2391_v14 = vadd.f32 1.0, %v3606_v34 }
 0xcaa   :  { %3611 = vrcp.f32 %v2384_v33 }
 0xcab   :  { %3613 = vrcp.f32 %v2391_v14 }
 0xcb3   :  { %v3610_v36 = vpop.eup %3609 }
 0xcb4   :  { %v3612_v39 = vpop.eup %3611  ;;  %v2398_v60 = vmul.f32 %v3610_v36, %v3608_v6 }
 0xcb5   :  { %v2397_v22 = vmul.f32 %v3612_v39, %v2395_v29  ;;  %v3614_v30 = vpop.eup %3613 }
 0xcb7   :  { %v4803_v38 = vadd.f32 %v2398_v60, %v2397_v22 }
 0xcb9   :  { %3615 = vtanh.f32 %v4803_v38 }
 0xcc3   :  { %v3616_v57 = vpop.eup %3615 }
 0xcc4   :  { %v2401_v55 = vmul.f32 %v3616_v57, %v3614_v30  ;;  %v2512_v30 = vrot.slane %v4803_v38, 6 }
 0xcc6   :  { %v2402_v35 = vpack.c.bf16 %v2401_v55, %v2401_v55  ;;  %v4808_v5 = vsel %vm1410_vm3, %v4762_v41, %v2401_v55 }
 0xcc8   :  { %v2404_v21 = vrot.slane %v2402_v35, 3 }
 0xcca   :  { %2439 = vmatmul.mubr.bf16.vlgmr.msra.gmra.mrb[52].mxu0 %v2404_v21  ;;  %2480 = vmatmul.mubr.bf16.vlgmr.msra.gmra.mrb[60].mxu1 %v2404_v21 }
 0xccb   :  { %2521 = vmatpush1.bf16.msra.mxu0 %v4501_v48  ;;  %2562 = vmatpush1.bf16.msra.mxu1 %v4503_v44 }
 0xccc   :  { %2522 = vmatprep.subr.bf16.mxu0 %v4506_v40  ;;  %2563 = vmatprep.subr.bf16.mxu1 %v4508_v58 }
 0xccd   :  { %2552 = vmatprep.mubr.bf16.mxu0 %v3824_v0  ;;  %2593 = vmatprep.mubr.bf16.mxu1 %v3824_v0 }
 0xccf   :  { %2523 = vmatpush1.bf16.msra.mxu0 %v4512_v54  ;;  %2564 = vmatpush1.bf16.msra.mxu1 %v4514_v15 }
 0xcd0   :  { %2524 = vmatprep.subr.bf16.mxu0 %v4518_v7  ;;  %2565 = vmatprep.subr.bf16.mxu1 %v4520_v12 }
 0xcd3   :  { %2525 = vmatpush1.bf16.msra.mxu0 %v4526_v47  ;;  %2566 = vmatpush1.bf16.msra.mxu1 %v4528_v17 }
 0xcd4   :  { %2526 = vmatprep.subr.bf16.mxu0 %v4532_v16  ;;  %2567 = vmatprep.subr.bf16.mxu1 %v4534_v18 }
 0xcd7   :  { %2527 = vmatpush1.bf16.msra.mxu0 %v4538_v19  ;;  %2568 = vmatpush1.bf16.msra.mxu1 %v4540_v20 }
 0xcd8   :  { %2528 = vmatprep.subr.bf16.mxu0 %v4544_v11  ;;  %2569 = vmatprep.subr.bf16.mxu1 %v4546_v10 }
 0xcdb   :  { %2529 = vmatpush1.bf16.msra.mxu0 %v4550_v59  ;;  %2570 = vmatpush1.bf16.msra.mxu1 %v4552_v52 }
 0xcdc   :  { %2530 = vmatprep.subr.bf16.mxu0 %v4556_v46  ;;  %2571 = vmatprep.subr.bf16.mxu1 %v4558_v61 }
 0xcdf   :  { %2531 = vmatpush1.bf16.msra.mxu0 %v4562_v51  ;;  %2572 = vmatpush1.bf16.msra.mxu1 %v4564_v45 }
 0xce0   :  { %2532 = vmatprep.subr.bf16.mxu0 %v4568_v4  ;;  %2573 = vmatprep.subr.bf16.mxu1 %v4570_v8 }
 0xce3   :  { %2533 = vmatpush1.bf16.msra.mxu0 %v4574_v9  ;;  %2574 = vmatpush1.bf16.msra.mxu1 %v4576_v13 }
 0xce4   :  { %2534 = vmatprep.subr.bf16.mxu0 %v4580_v23  ;;  %2575 = vmatprep.subr.bf16.mxu1 %v4582_v24 }
 0xce7   :  { %2535 = vmatpush1.bf16.msra.mxu0 %v4586_v25  ;;  %2576 = vmatpush1.bf16.msra.mxu1 %v4588_v26 }
 0xce8   :  { %2649 = vmatprep.subr.bf16.mxu0 %v4488_v56  ;;  %2690 = vmatprep.subr.bf16.mxu1 %v4490_v49 }
 0xd9d   :  { %v2440_v28 = vpop.f32.mrb[52].mxu0  ;;  %v2481_v41 = vpop.f32.mrb[60].mxu1 }
 0xd9e   :  { %v2488_v2 = vadd.f32 %v2440_v28, %v4643_v50  ;;  %v2442_v32 = vpop.f32.mrb[53].mxu0  ;;  %v2483_v43 = vpop.f32.mrb[61].mxu1  ;;  %v2490_v49 = vadd.f32 %v2481_v41, %v4645_v53 }
 0xd9f   :  { %v2489_v3 = vadd.f32 %v2442_v32, %v4647_v42  ;;  %v2444_v1 = vpop.f32.mrb[54].mxu0  ;;  %v2485_v27 = vpop.f32.mrb[62].mxu1  ;;  %v2491_v56 = vadd.f32 %v2483_v43, %v4649_v63 }
 0xda0   :  { %v3208_v62 = vmul.f32 -1.442695, %v2488_v2  ;;  %v2445_v31 = vpop.f32.mrb[55].mxu0  ;;  %v2486_v37 = vpop.f32.mrb[63].mxu1 }
 0xda1   :  { %v3209_v33 = vmul.f32 -1.442695, %v2489_v3  ;;  %v3210_v34 = vmul.f32 -1.442695, %v2491_v56 }
 0xda2   :  { %3617 = vpow2.f32 %v3208_v62 }
 0xda3   :  { %3619 = vpow2.f32 %v3209_v33 }
 0xda4   :  { %3621 = vpow2.f32 %v3210_v34  ;;  %v3719_v34 = vld [vmem:[#allocation6] ss:$16 sps:$4 sm:$0xff]  }
 0xda5   :  { %3623 = vtanh.f32 %v2490_v49  ;;  %v3720_v49 = vld [vmem:[#allocation6 + $0x8] ss:$16 sps:$4 sm:$0xff]  }
 0xdac   :  { %v3618_v6 = vpop.eup %3617 }
 0xdad   :  { %v3620_v36 = vpop.eup %3619  ;;  %v2495_v29 = vadd.f32 1.0, %v3618_v6  ;;  %v3721_v6 = vld [vmem:[#allocation6 + $0x24] ss:$16 sps:$4 sm:$0xff]  }
 0xdae   :  { %v2501_v39 = vadd.f32 1.0, %v3620_v36  ;;  %v3622_v60 = vpop.eup %3621  ;;  %v3722_v36 = vld [vmem:[#allocation6 + $0x2c] ss:$16 sps:$4 sm:$0xff]  }
 0xdaf   :  { %3625 = vrcp.f32 %v2495_v29  ;;  %v3624_v14 = vpop.eup %3623  ;;  %v2508_v35 = vadd.f32 1.0, %v3622_v60  ;;  %v3723_v29 = vld [vmem:[#allocation6 + $0x20] ss:$16 sps:$4 sm:$0xff]   ;;  %v3725_v60 = vld [vmem:[#allocation6 + $0x44] ss:$16 sps:$4 sm:$0xff]  }
 0xdb0   :  { %3627 = vrcp.f32 %v2501_v39  ;;  %v3724_v39 = vld [vmem:[#allocation6 + $0x28] ss:$16 sps:$4 sm:$0xff]  }
 0xdb1   :  { %3629 = vrcp.f32 %v2508_v35  ;;  %v3731_v35 = vld [vmem:[#allocation6 + $0x60] ss:$16 sps:$4 sm:$0xff]  }
 0xdb9   :  { %v3626_v22 = vpop.eup %3625 }
 0xdba   :  { %v3628_v57 = vpop.eup %3627  ;;  %v2515_v55 = vmul.f32 %v3626_v22, %v3624_v14  ;;  %v3726_v14 = vld [vmem:[#allocation6 + $0x4c] ss:$16 sps:$4 sm:$0xff]   ;;  %v3727_v22 = vld [vmem:[#allocation6 + $0x40] ss:$16 sps:$4 sm:$0xff]  }
 0xdbb   :  { %v2514_v21 = vmul.f32 %v3628_v57, %v2512_v30  ;;  %v3630_v41 = vpop.eup %3629  ;;  %v3728_v30 = vld [vmem:[#allocation6 + $0x48] ss:$16 sps:$4 sm:$0xff]   ;;  %v3729_v57 = vld [vmem:[#allocation6 + $0x64] ss:$16 sps:$4 sm:$0xff]  }
 0xdbd   :  { %v4849_v28 = vadd.f32 %v2515_v55, %v2514_v21  ;;  %v3730_v55 = vld [vmem:[#allocation6 + $0x6c] ss:$16 sps:$4 sm:$0xff]   ;;  %v3732_v21 = vld [vmem:[#allocation6 + $0x68] ss:$16 sps:$4 sm:$0xff]  }
 0xdbf   :  { %3631 = vtanh.f32 %v4849_v28 }
 0xdc9   :  { %v3632_v2 = vpop.eup %3631 }
 0xdca   :  { %v4852_v32 = vmul.f32 %v3632_v2, %v3630_v41  ;;  %v3735_v41 = vld [vmem:[#allocation6 + $0x80] ss:$16 sps:$4 sm:$0xff]   ;;  %v3736_v2 = vld [vmem:[#allocation6 + $0x88] ss:$16 sps:$4 sm:$0xff]  }
 0xdcc   :  { %v2519_v43 = vpack.c.bf16 %v4852_v32, %v4852_v32 }
 0xdce   :  { %2553 = vmatmul.mubr.bf16.vlgmr.msra.gmra.mrb[56].mxu0 %v2519_v43  ;;  %2594 = vmatmul.mubr.bf16.vlgmr.msra.gmra.mrb[64].mxu1 %v2519_v43  ;;  %v3737_v43 = vld [vmem:[#allocation6 + $0xa4] ss:$16 sps:$4 sm:$0xff]  }
 0xdcf   :  { %2650 = vmatpush1.bf16.msra.mxu0 %v4501_v48  ;;  %2691 = vmatpush1.bf16.msra.mxu1 %v4503_v44  ;;  %v3717_v48 = vld [vmem:[#allocation6 + $0x4] ss:$16 sps:$4 sm:$0xff]   ;;  %v3718_v44 = vld [vmem:[#allocation6 + $0xc] ss:$16 sps:$4 sm:$0xff]  }
 0xdd0   :  { %2651 = vmatprep.subr.bf16.mxu0 %v4506_v40  ;;  %2692 = vmatprep.subr.bf16.mxu1 %v4508_v58 }
 0xdd1   :  { %2681 = vmatprep.mubr.bf16.mxu0 %v3824_v0  ;;  %2722 = vmatprep.mubr.bf16.mxu1 %v3824_v0 }
 0xdd3   :  { %2652 = vmatpush1.bf16.msra.mxu0 %v4512_v54  ;;  %2693 = vmatpush1.bf16.msra.mxu1 %v4514_v15 }
 0xdd4   :  { %2653 = vmatprep.subr.bf16.mxu0 %v4518_v7  ;;  %2694 = vmatprep.subr.bf16.mxu1 %v4520_v12 }
 0xdd7   :  { %2654 = vmatpush1.bf16.msra.mxu0 %v4526_v47  ;;  %2695 = vmatpush1.bf16.msra.mxu1 %v4528_v17 }
 0xdd8   :  { %2655 = vmatprep.subr.bf16.mxu0 %v4532_v16  ;;  %2696 = vmatprep.subr.bf16.mxu1 %v4534_v18 }
 0xddb   :  { %2656 = vmatpush1.bf16.msra.mxu0 %v4538_v19  ;;  %2697 = vmatpush1.bf16.msra.mxu1 %v4540_v20 }
 0xddc   :  { %2657 = vmatprep.subr.bf16.mxu0 %v4544_v11  ;;  %2698 = vmatprep.subr.bf16.mxu1 %v4546_v10 }
 0xddf   :  { %2658 = vmatpush1.bf16.msra.mxu0 %v4550_v59  ;;  %2699 = vmatpush1.bf16.msra.mxu1 %v4552_v52 }
 0xde0   :  { %2659 = vmatprep.subr.bf16.mxu0 %v4556_v46  ;;  %2700 = vmatprep.subr.bf16.mxu1 %v4558_v61 }
 0xde3   :  { %2660 = vmatpush1.bf16.msra.mxu0 %v4562_v51  ;;  %2701 = vmatpush1.bf16.msra.mxu1 %v4564_v45 }
 0xde4   :  { %2661 = vmatprep.subr.bf16.mxu0 %v4568_v4  ;;  %2702 = vmatprep.subr.bf16.mxu1 %v4570_v8 }
 0xde7   :  { %2662 = vmatpush1.bf16.msra.mxu0 %v4574_v9  ;;  %2703 = vmatpush1.bf16.msra.mxu1 %v4576_v13 }
 0xde8   :  { %2663 = vmatprep.subr.bf16.mxu0 %v4580_v23  ;;  %2704 = vmatprep.subr.bf16.mxu1 %v4582_v24 }
 0xdeb   :  { %2664 = vmatpush1.bf16.msra.mxu0 %v4586_v25  ;;  %2705 = vmatpush1.bf16.msra.mxu1 %v4588_v26  ;;  %v2638_v25 = vrot.slane %v4849_v28, 6  ;;  %v3734_v28 = vld [vmem:[#allocation6 + $0x8c] ss:$16 sps:$4 sm:$0xff]  }
 0xdec   :  { %2778 = vmatprep.subr.bf16.mxu0 %v3717_v48  ;;  %2819 = vmatprep.subr.bf16.mxu1 %v3718_v44  ;;  %v3738_v48 = vld [vmem:[#allocation6 + $0xac] ss:$16 sps:$4 sm:$0xff]   ;;  %v3739_v44 = vld [vmem:[#allocation6 + $0xa0] ss:$16 sps:$4 sm:$0xff]  }
 0xea1   :  { %v2554_v40 = vpop.f32.mrb[56].mxu0  ;;  %v2595_v58 = vpop.f32.mrb[64].mxu1 }
 0xea2   :  { %v2606_v54 = vrot.slane %v2554_v40, 6  ;;  %v2556_v15 = vpop.f32.mrb[57].mxu0  ;;  %v2597_v7 = vpop.f32.mrb[65].mxu1  ;;  %v2608_v46 = vrot.slane %v2595_v58, 6  ;;  %v3740_v40 = vld [vmem:[#allocation6 + $0xa8] ss:$16 sps:$4 sm:$0xff]  }
 0xea3   :  { %v2607_v12 = vrot.slane %v2556_v15, 6  ;;  %v2558_v47 = vpop.f32.mrb[58].mxu0  ;;  %v2599_v17 = vpop.f32.mrb[66].mxu1  ;;  %v2609_v59 = vrot.slane %v2597_v7, 6  ;;  %v3741_v58 = vld [vmem:[#allocation6 + $0xc4] ss:$16 sps:$4 sm:$0xff]  }
 0xea4   :  { %v2614_v16 = vadd.f32 %v2606_v54, %v4643_v50  ;;  %v2559_v18 = vpop.f32.mrb[59].mxu0  ;;  %v2600_v19 = vpop.f32.mrb[67].mxu1  ;;  %v2616_v51 = vadd.f32 %v2608_v46, %v4645_v53  ;;  %v3742_v54 = vld [vmem:[#allocation6 + $0xcc] ss:$16 sps:$4 sm:$0xff]   ;;  %v3743_v15 = vld [vmem:[#allocation6 + $0xc0] ss:$16 sps:$4 sm:$0xff]  }
 0xea5   :  { %v2615_v20 = vadd.f32 %v2607_v12, %v4647_v42  ;;  %v2617_v52 = vadd.f32 %v2609_v59, %v4649_v63  ;;  %v3744_v7 = vld [vmem:[#allocation6 + $0xc8] ss:$16 sps:$4 sm:$0xff]   ;;  %v3745_v12 = vld [vmem:[#allocation6 + $0xe4] ss:$16 sps:$4 sm:$0xff]   ;;  %v3746_v47 = vld [vmem:[#allocation6 + $0xec] ss:$16 sps:$4 sm:$0xff]  }
 0xea6   :  { %v3211_v11 = vmul.f32 -1.442695, %v2614_v16  ;;  %v3747_v17 = vld [vmem:[#allocation6 + $0xe0] ss:$16 sps:$4 sm:$0xff]   ;;  %v3748_v16 = vld [vmem:[#allocation6 + $0xe8] ss:$16 sps:$4 sm:$0xff]  }
 0xea7   :  { %v3212_v10 = vmul.f32 -1.442695, %v2615_v20  ;;  %v3213_v61 = vmul.f32 -1.442695, %v2617_v52 }
 0xea8   :  { %3633 = vpow2.f32 %v3211_v11 }
 0xea9   :  { %3635 = vpow2.f32 %v3212_v10 }
 0xeaa   :  { %3637 = vpow2.f32 %v3213_v61 }
 0xeab   :  { %3639 = vtanh.f32 %v2616_v51 }
 0xeb2   :  { %v3634_v45 = vpop.eup %3633 }
 0xeb3   :  { %v3636_v4 = vpop.eup %3635  ;;  %v2621_v8 = vadd.f32 1.0, %v3634_v45 }
 0xeb4   :  { %v2627_v9 = vadd.f32 1.0, %v3636_v4  ;;  %v3638_v13 = vpop.eup %3637 }
 0xeb5   :  { %3641 = vrcp.f32 %v2621_v8  ;;  %v3640_v23 = vpop.eup %3639  ;;  %v2634_v3 = vadd.f32 1.0, %v3638_v13 }
 0xeb6   :  { %3643 = vrcp.f32 %v2627_v9 }
 0xeb7   :  { %3645 = vrcp.f32 %v2634_v3 }
 0xebf   :  { %v3642_v24 = vpop.eup %3641 }
 0xec0   :  { %v3644_v26 = vpop.eup %3643  ;;  %v2641_v38 = vmul.f32 %v3642_v24, %v3640_v23 }
 0xec1   :  { %v2640_v1 = vmul.f32 %v3644_v26, %v2638_v25  ;;  %v3646_v62 = vpop.eup %3645 }
 0xec3   :  { %v4893_v27 = vadd.f32 %v2641_v38, %v2640_v1 }
 0xec5   :  { %3647 = vtanh.f32 %v4893_v27 }
 0xecf   :  { %v3648_v31 = vpop.eup %3647 }
 0xed0   :  { %v4896_v37 = vmul.f32 %v3648_v31, %v3646_v62 }
 0xed2   :  { %v2645_v33 = vpack.c.bf16 %v4896_v37, %v4896_v37 }
 0xed4   :  { %v2647_v56 = vrot.slane %v2645_v33, 1 }
 0xed6   :  { %2682 = vmatmul.mubr.bf16.vlgmr.msra.gmra.mrb[60].mxu0 %v2647_v56  ;;  %2723 = vmatmul.mubr.bf16.vlgmr.msra.gmra.mrb[68].mxu1 %v2647_v56 }
 0xed7   :  { %2779 = vmatpush1.bf16.msra.mxu0 %v3719_v34  ;;  %2820 = vmatpush1.bf16.msra.mxu1 %v3720_v49  ;;  %v2767_v34 = vrot.slane %v4893_v27, 6 }
 0xed8   :  { %2780 = vmatprep.subr.bf16.mxu0 %v3721_v6  ;;  %2821 = vmatprep.subr.bf16.mxu1 %v3722_v36 }
 0xed9   :  { %2810 = vmatprep.mubr.bf16.mxu0 %v3824_v0  ;;  %2851 = vmatprep.mubr.bf16.mxu1 %v3824_v0  ;;  %v3733_v0 = vld [vmem:[#allocation6 + $0x84] ss:$16 sps:$4 sm:$0xff]  }
 0xedb   :  { %2781 = vmatpush1.bf16.msra.mxu0 %v3723_v29  ;;  %2822 = vmatpush1.bf16.msra.mxu1 %v3724_v39 }
 0xedc   :  { %2782 = vmatprep.subr.bf16.mxu0 %v3725_v60  ;;  %2823 = vmatprep.subr.bf16.mxu1 %v3726_v14 }
 0xedf   :  { %2783 = vmatpush1.bf16.msra.mxu0 %v3727_v22  ;;  %2824 = vmatpush1.bf16.msra.mxu1 %v3728_v30  ;;  %v2906_v30 = vsel %vm1406_vm1, %v4852_v32, %v4896_v37  ;;  %v3419_v32 = vld [vmem:[%s4989_s8 + $0x10] sm:$0xff]   ;;  %v3420_v37 = vld [vmem:[%s4989_s8 + $0x18] sm:$0xff]  }
 0xee0   :  { %2784 = vmatprep.subr.bf16.mxu0 %v3729_v57  ;;  %2825 = vmatprep.subr.bf16.mxu1 %v3730_v55 }
 0xee3   :  { %2785 = vmatpush1.bf16.msra.mxu0 %v3731_v35  ;;  %2826 = vmatpush1.bf16.msra.mxu1 %v3732_v21  ;;  %v3417_v35 = vld [vmem:[%s4989_s8] sm:$0xff]   ;;  %v3825_v21 = vmov 0.0  }
 0xee4   :  { %2786 = vmatprep.subr.bf16.mxu0 %v3733_v0  ;;  %2827 = vmatprep.subr.bf16.mxu1 %v3734_v28  ;;  %v3418_v0 = vld [vmem:[%s4989_s8 + $0x8] sm:$0xff]   ;;  %v3421_v28 = vld [vmem:[%s4989_s8 + $0x20] sm:$0xff]  }
 0xee7   :  { %2787 = vmatpush1.bf16.msra.mxu0 %v3735_v41  ;;  %2828 = vmatpush1.bf16.msra.mxu1 %v3736_v2  ;;  %v3422_v41 = vld [vmem:[%s4989_s8 + $0x28] sm:$0xff]   ;;  %v3423_v2 = vld [vmem:[%s4989_s8 + $0x30] sm:$0xff]  }
 0xee8   :  { %2788 = vmatprep.subr.bf16.mxu0 %v3737_v43  ;;  %2829 = vmatprep.subr.bf16.mxu1 %v3738_v48  ;;  %v3424_v43 = vld [vmem:[%s4989_s8 + $0x38] sm:$0xff]  }
 0xeeb   :  { %2789 = vmatpush1.bf16.msra.mxu0 %v3739_v44  ;;  %2830 = vmatpush1.bf16.msra.mxu1 %v3740_v40 }
 0xeec   :  { %2790 = vmatprep.subr.bf16.mxu0 %v3741_v58  ;;  %2831 = vmatprep.subr.bf16.mxu1 %v3742_v54 }
 0xeef   :  { %2791 = vmatpush1.bf16.msra.mxu0 %v3743_v15  ;;  %2832 = vmatpush1.bf16.msra.mxu1 %v3744_v7 }
 0xef0   :  { %2792 = vmatprep.subr.bf16.mxu0 %v3745_v12  ;;  %2833 = vmatprep.subr.bf16.mxu1 %v3746_v47 }
 0xef3   :  { %2793 = vmatpush1.bf16.msra.mxu0 %v3747_v17  ;;  %2834 = vmatpush1.bf16.msra.mxu1 %v3748_v16 }
 0xef4   :  { %3238 = vmatprep.subr.bf16.mxu0 %v3825_v21 }
 0xfa9   :  { %v2683_v18 = vpop.f32.mrb[60].mxu0  ;;  %v2724_v19 = vpop.f32.mrb[68].mxu1 }
 0xfaa   :  { %v2735_v20 = vrot.slane %v2683_v18, 4  ;;  %v2685_v11 = vpop.f32.mrb[61].mxu0  ;;  %v2726_v10 = vpop.f32.mrb[69].mxu1  ;;  %v2737_v24 = vrot.slane %v2724_v19, 4 }
 0xfab   :  { %v2736_v59 = vrot.slane %v2685_v11, 4  ;;  %v2687_v52 = vpop.f32.mrb[62].mxu0  ;;  %v2728_v46 = vpop.f32.mrb[70].mxu1  ;;  %v2738_v13 = vrot.slane %v2726_v10, 4 }
 0xfac   :  { %v2743_v61 = vadd.f32 %v2735_v20, %v4643_v50  ;;  %v2688_v51 = vpop.f32.mrb[63].mxu0  ;;  %v2729_v45 = vpop.f32.mrb[71].mxu1  ;;  %v2745_v26 = vadd.f32 %v2737_v24, %v4645_v53 }
 0xfad   :  { %v2744_v4 = vadd.f32 %v2736_v59, %v4647_v42  ;;  %v2746_v23 = vadd.f32 %v2738_v13, %v4649_v63 }
 0xfae   :  { %v3214_v8 = vmul.f32 -1.442695, %v2743_v61 }
 0xfaf   :  { %v3215_v9 = vmul.f32 -1.442695, %v2744_v4  ;;  %v3216_v25 = vmul.f32 -1.442695, %v2746_v23 }
 0xfb0   :  { %3649 = vpow2.f32 %v3214_v8 }
 0xfb1   :  { %3651 = vpow2.f32 %v3215_v9 }
 0xfb2   :  { %3653 = vpow2.f32 %v3216_v25 }
 0xfb3   :  { %3655 = vtanh.f32 %v2745_v26 }
 0xfba   :  { %v3650_v38 = vpop.eup %3649 }
 0xfbb   :  { %v3652_v3 = vpop.eup %3651  ;;  %v2750_v1 = vadd.f32 1.0, %v3650_v38 }
 0xfbc   :  { %v2756_v62 = vadd.f32 1.0, %v3652_v3  ;;  %v3654_v31 = vpop.eup %3653 }
 0xfbd   :  { %3657 = vrcp.f32 %v2750_v1  ;;  %v3656_v33 = vpop.eup %3655  ;;  %v2763_v36 = vadd.f32 1.0, %v3654_v31 }
 0xfbe   :  { %3659 = vrcp.f32 %v2756_v62  ;;  %v3220_v62 = vld [vmem:[%s4990_s9] ss:$0 sm:$0xff] }
 0xfbf   :  { %3661 = vrcp.f32 %v2763_v36 }
 0xfc7   :  { %v3658_v56 = vpop.eup %3657 }
 0xfc8   :  { %v3660_v49 = vpop.eup %3659  ;;  %v2770_v6 = vmul.f32 %v3658_v56, %v3656_v33 }
 0xfc9   :  { %v2769_v29 = vmul.f32 %v3660_v49, %v2767_v34  ;;  %v3662_v60 = vpop.eup %3661 }
 0xfcb   :  { %v4907_v39 = vadd.f32 %v2770_v6, %v2769_v29 }
 0xfcd   :  { %3663 = vtanh.f32 %v4907_v39  ;;  %v2896_v9 = vrot.slane %v4907_v39, 6 }
 0xfd7   :  { %v3664_v14 = vpop.eup %3663 }
 0xfd8   :  { %v2773_v22 = vmul.f32 %v3664_v14, %v3662_v60 }
 0xfda   :  { %v2774_v57 = vpack.c.bf16 %v2773_v22, %v2773_v22  ;;  %v4914_v55 = vsel %vm1408_vm2, %v2906_v30, %v2773_v22 }
 0xfdc   :  { %v2776_v27 = vrot.slane %v2774_v57, 2  ;;  %v3022_v57 = vld [vmem:[%s4982_s1] sm:$0xff] }
 0xfde   :  { %2811 = vmatmul.mubr.bf16.vlgmr.msra.gmra.mrb[64].mxu0 %v2776_v27  ;;  %2852 = vmatmul.mubr.bf16.vlgmr.msra.gmra.mrb[72].mxu1 %v2776_v27 }
 0xfdf   :  { %3239 = vmatpush3.bf16.msra.mxu0 %v3417_v35  ;;  %3254 = vmatprep.mubr.msk.bf16.mxu0 %vm3826_vm4, %v3825_v21  ;;  %v3023_v35 = vld [vmem:[%s4982_s1 + $0x8] sm:$0xff] }
 0xfe0   :  { %3240 = vmatprep.subr.bf16.mxu0 %v3825_v21 }
 0xfe3   :  { %3241 = vmatpush3.bf16.msra.mxu0 %v3418_v0 }
 0xfe4   :  { %3242 = vmatprep.subr.bf16.mxu0 %v3825_v21 }
 0xfe7   :  { %3243 = vmatpush3.bf16.msra.mxu0 %v3419_v32 }
 0xfe8   :  { %3244 = vmatprep.subr.bf16.mxu0 %v3825_v21 }
 0xfeb   :  { %3245 = vmatpush3.bf16.msra.mxu0 %v3420_v37 }
 0xfec   :  { %3246 = vmatprep.subr.bf16.mxu0 %v3825_v21 }
 0xfef   :  { %3247 = vmatpush3.bf16.msra.mxu0 %v3421_v28 }
 0xff0   :  { %3248 = vmatprep.subr.bf16.mxu0 %v3825_v21 }
 0xff3   :  { %3249 = vmatpush3.bf16.msra.mxu0 %v3422_v41 }
 0xff4   :  { %3250 = vmatprep.subr.bf16.mxu0 %v3825_v21 }
 0xff7   :  { %3251 = vmatpush3.bf16.msra.mxu0 %v3423_v2 }
 0xff8   :  { %3252 = vmatprep.subr.bf16.mxu0 %v3825_v21 }
 0xffb   :  { %3253 = vmatpush3.bf16.msra.mxu0 %v3424_v43 }
0x10b1   :  { %v2812_v48 = vpop.f32.mrb[64].mxu0  ;;  %v2853_v44 = vpop.f32.mrb[72].mxu1 }
0x10b2   :  { %v2864_v40 = vrot.slane %v2812_v48, 2  ;;  %v2814_v58 = vpop.f32.mrb[65].mxu0  ;;  %v2855_v54 = vpop.f32.mrb[73].mxu1  ;;  %v2866_v59 = vrot.slane %v2853_v44, 2 }
0x10b3   :  { %v2865_v15 = vrot.slane %v2814_v58, 2  ;;  %v2816_v7 = vpop.f32.mrb[66].mxu0  ;;  %v2857_v12 = vpop.f32.mrb[74].mxu1  ;;  %v2867_v11 = vrot.slane %v2855_v54, 2 }
0x10b4   :  { %v2872_v47 = vadd.f32 %v2864_v40, %v4643_v50  ;;  %v2817_v17 = vpop.f32.mrb[67].mxu0  ;;  %v2858_v16 = vpop.f32.mrb[75].mxu1  ;;  %v2874_v46 = vadd.f32 %v2866_v59, %v4645_v53 }
0x10b5   :  { %v2873_v18 = vadd.f32 %v2865_v15, %v4647_v42  ;;  %v2875_v10 = vadd.f32 %v2867_v11, %v4649_v63 }
0x10b6   :  { %v3217_v19 = vmul.f32 -1.442695, %v2872_v47 }
0x10b7   :  { %v3218_v20 = vmul.f32 -1.442695, %v2873_v18  ;;  %v3219_v52 = vmul.f32 -1.442695, %v2875_v10 }
0x10b8   :  { %3665 = vpow2.f32 %v3217_v19 }
0x10b9   :  { %3667 = vpow2.f32 %v3218_v20 }
0x10ba   :  { %3669 = vpow2.f32 %v3219_v52 }
0x10bb   :  { %3671 = vtanh.f32 %v2874_v46 }
0x10c2   :  { %v3666_v61 = vpop.eup %3665 }
0x10c3   :  { %v3668_v51 = vpop.eup %3667  ;;  %v2879_v45 = vadd.f32 1.0, %v3666_v61 }
0x10c4   :  { %v2885_v50 = vadd.f32 1.0, %v3668_v51  ;;  %v3670_v42 = vpop.eup %3669 }
0x10c5   :  { %3673 = vrcp.f32 %v2879_v45  ;;  %v3672_v4 = vpop.eup %3671  ;;  %v2892_v63 = vadd.f32 1.0, %v3670_v42 }
0x10c6   :  { %3675 = vrcp.f32 %v2885_v50 }
0x10c7   :  { %3677 = vrcp.f32 %v2892_v63 }
0x10cf   :  { %v3674_v8 = vpop.eup %3673 }
0x10d0   :  { %v3676_v13 = vpop.eup %3675  ;;  %v2899_v23 = vmul.f32 %v3674_v8, %v3672_v4 }
0x10d1   :  { %v2898_v24 = vmul.f32 %v3676_v13, %v2896_v9  ;;  %v3678_v53 = vpop.eup %3677 }
0x10d3   :  { %v2900_v25 = vadd.f32 %v2899_v23, %v2898_v24 }
0x10d5   :  { %3679 = vtanh.f32 %v2900_v25 }
0x10df   :  { %v3680_v26 = vpop.eup %3679 }
0x10e0   :  { %v2902_v38 = vmul.f32 %v3680_v26, %v3678_v53 }
0x10e2   :  { %v2908_v3 = vsel %vm1410_vm3, %v4914_v55, %v2902_v38 }
0x10e3   :  { %v2909_v1 = vpack.c.bf16 %v2908_v3, %v4808_v5 }
0x10e5   :  { %3255 = vmatmul.mubr.bf16.vlgmr.msra.gmra.mrb[68].mxu0 %v2909_v1 }
0x11b8   :  { %v3015_v31 = vpop.f32.mrb[68].mxu0 }
0x11b9   :  { %v3016_v33 = vadd.f32 %v3220_v62, %v3015_v31  ;;  %v3256_v56 = vpop.f32.mrb[69].mxu0 }
0x11ba   :  { %v3018_v34 = vpop.f32.mrb[70].mxu0 }
0x11bb   :  { %v3024_v49 = vmul.f32 0.5, %v3016_v33  ;;  %3042 = vst.msk [vmem:[%s4991_s10] sm:$0xff] %vm129_vm0, %v3016_v33  ;;  %v3019_v6 = vadd.f32 %v3220_v62, %v3018_v34  ;;  %3046 = vrot.lane.b32.xlu1 %v3016_v33, %s3827_s30  ;;  %v3257_v36 = vpop.f32.mrb[71].mxu0 }
0x11bd   :  { %v3026_v5 = vmul.f32 1.442695, %v3024_v49  ;;  %v3025_v29 = vmul.f32 0.5, %v3019_v6  ;;  %3043 = vst.msk [vmem:[%s4991_s10 + $0x8] sm:$0xff] %vm129_vm0, %v3019_v6 }
0x11bf   :  { %3681 = vpow2.f32 %v3026_v5  ;;  %v3028_v39 = vmul.f32 1.442695, %v3025_v29  ;;  %3048 = vrot.lane.b32.xlu1 %v3019_v6, %s3827_s30 }
0x11c1   :  { %3683 = vpow2.f32 %v3028_v39 }
0x11c9   :  { %v3682_v60 = vpop.eup %3681 }
0x11ca   :  { %3032 = vrot.lane.b32.xlu0 %v3682_v60, %s3827_s30 }
0x11cb   :  { %v3684_v14 = vpop.eup %3683 }
0x11ce   :  { %3034 = vrot.lane.b32.xlu0 %v3684_v14, %s3827_s30 }
0x122d   :  { %v3047_v22 = vpop.permute.xlu1 %3046 }
0x122e   :  { %3052 = vst.msk [vmem:[%s4992_s11] sm:$0xff] %vm129_vm0, %v3047_v22 }
0x1231   :  { %v3049_v30 = vpop.permute.xlu1 %3048 }
0x1232   :  { %3053 = vst.msk [vmem:[%s4992_s11 + $0x8] sm:$0xff] %vm129_vm0, %v3049_v30 }
0x123c   :  { %v3033_v55 = vpop.permute.xlu0 %3032 }
0x123d   :  { %v3038_v27 = vmul.f32 %v3033_v55, %v3022_v57 }
0x123f   :  { %v3040_v21 = vadd.f32 %v3038_v27, %v3016_v33 }
0x1240   :  { %v3035_v0 = vpop.permute.xlu0 %3034 }
0x1241   :  { %3054 = vst.msk [vmem:[%s4993_s12] sm:$0xff] %vm129_vm0, %v3040_v21  ;;  %v3039_v32 = vmul.f32 %v3035_v0, %v3023_v35 }
0x1243   :  { %v3041_v37 = vadd.f32 %v3039_v32, %v3019_v6 }
0x1245   :  { %3055 = vst.msk [vmem:[%s4993_s12 + $0x8] sm:$0xff] %vm129_vm0, %v3041_v37 }
0x1246   :  { %3068 = vsyncpa [#allocation3], 1 }
0x1247   :  { %3069 = vsyncpa [#allocation5], 1 }

</bundles_post_ra>
